<compile_context>
chip_gen: v6e
topology: v6e:2x2x1
jax: 0.10.0
libtpu: 0.0.40
codegen_flags: <defaults>
</compile_context>

<pallas_src>
import math
import functools

import jax
import jax.numpy as jnp
import numpy as np
from jax.experimental import pallas as pl
from jax.experimental.pallas import tpu as pltpu


# ----------------------------- kernel helpers ------------------------------
def _softmax(x):
    m = jnp.max(x, axis=-1, keepdims=True)
    e = jnp.exp(x - m)
    return e * pl.reciprocal(jnp.sum(e, axis=-1, keepdims=True))


def _layer_norm(x, g, b, eps=1e-5):
    mu = jnp.mean(x, axis=-1, keepdims=True)
    xc = x - mu
    var = jnp.mean(xc * xc, axis=-1, keepdims=True)
    return xc * jax.lax.rsqrt(var + eps) * g + b


# --------------------------------- kernel ----------------------------------
def decoder_layer_kernel(
        tgt_ref, mem_ref,
        sa_wqkv, sa_bqkv, sa_wo, sa_bo,
        ca_wq, ca_bq, ca_wkv, ca_bkv, ca_wo, ca_bo,
        w1, b1, w2, b2, ln_g, ln_b,
        out_ref, selfw_ref, crossw_ref,
        *, nhead, bc, tq, skv):
    D = tgt_ref.shape[-1]
    dp = D // nhead
    inv_heads = 1.0 / nhead
    scale_self = 1.0 / (dp ** 0.5)          # CustomMultiheadAttention: depth**0.5
    scale_cross = 1.0 / math.sqrt(dp)       # nn.MultiheadAttention: sqrt(head_dim)

    tgt = tgt_ref[...]                       # (bc*T, D) batch-major flattened
    mem = mem_ref[...]                       # (bc*S, D)
    gamma = ln_g[...]                        # (3, D)
    beta = ln_b[...]                         # (3, D)

    def attend(qmat, kvmat, koff, voff, wout_t, scale, w_ref, n_kv):
        """Multi-head attention with Wo folded into the per-head loop.

        qmat:  (bc*tq, >=D) with Q heads in columns [0, D)
        kvmat: (bc*n_kv, *) with K heads at column offset `koff`, V at `voff`
        wout_t: (D, D) output projection already transposed to (in, out)
        w_ref: (bc, tq, n_kv) output ref for head-averaged attention weights
        """
        rows = []
        for b in range(bc):                              # static, small bc
            q_b = qmat[b * tq:(b + 1) * tq, :]
            kv_b = kvmat[b * n_kv:(b + 1) * n_kv, :]
            proj = None
            w_acc = None
            for h in range(nhead):                       # static, small nhead
                qh = q_b[:, h * dp:(h + 1) * dp]
                kh = kv_b[:, koff + h * dp:koff + (h + 1) * dp]
                vh = kv_b[:, voff + h * dp:voff + (h + 1) * dp]
                s = jax.lax.dot_general(
                    qh, kh, (((1,), (1,)), ((), ())),
                    preferred_element_type=jnp.float32) * scale
                w = _softmax(s)
                w_acc = w if w_acc is None else w_acc + w
                c = jnp.dot(w, vh, preferred_element_type=jnp.float32)
                p = jnp.dot(c, wout_t[h * dp:(h + 1) * dp, :],
                            preferred_element_type=jnp.float32)
                proj = p if proj is None else proj + p
            # Early store of the head-averaged map: frees its vregs now.
            w_ref[b] = w_acc * inv_heads
            rows.append(proj)
        return jnp.concatenate(rows, axis=0) if bc > 1 else rows[0]

    # ---------------- self attention (CustomMultiheadAttention) -------------
    qkv = jnp.dot(tgt, sa_wqkv[...],
                  preferred_element_type=jnp.float32) + sa_bqkv[...]   # (bc*T, 3D)
    attn = attend(qkv, qkv, D, 2 * D, sa_wo[...],
                  scale_self, selfw_ref, tq) + sa_bo[...]
    x = _layer_norm(tgt + attn, gamma[0:1, :], beta[0:1, :])

    # ---------------- cross attention (nn.MultiheadAttention) ---------------
    q2 = jnp.dot(x, ca_wq[...],
                 preferred_element_type=jnp.float32) + ca_bq[...]      # (bc*T, D)
    kv = jnp.dot(mem, ca_wkv[...],
                 preferred_element_type=jnp.float32) + ca_bkv[...]     # (bc*S, 2D)
    attn2 = attend(q2, kv, 0, D, ca_wo[...],
                   scale_cross, crossw_ref, skv) + ca_bo[...]
    y = _layer_norm(x + attn2, gamma[1:2, :], beta[1:2, :])

    # ------------------------------ feed-forward ----------------------------
    h1 = jnp.maximum(jnp.dot(y, w1[...],
                             preferred_element_type=jnp.float32) + b1[...], 0.0)
    ff = jnp.dot(h1, w2[...], preferred_element_type=jnp.float32) + b2[...]
    out_ref[...] = _layer_norm(y + ff, gamma[2:3, :], beta[2:3, :])


# -------------------------------- wrapper -----------------------------------
def decoder_layer(tgt, memory, params, nhead, *, batch_blocks=1):
    """tgt: (T, B, D), memory: (S, B, D) (PyTorch seq-first convention).

    batch_blocks: number of grid steps the batch is split into.  1 is best on
    v5e/v6e (single TensorCore); 2 keeps both v7x TensorCores busy.
    """
    T, B, D = tgt.shape
    S = memory.shape[0]
    assert D % nhead == 0, "d_model must be divisible by nhead"
    assert B % batch_blocks == 0, "batch must divide evenly into batch_blocks"
    Bc = B // batch_blocks

    f32 = jnp.float32
    # Flatten to batch-major (B*T, D)/(B*S, D) slabs once, outside the kernel.
    tgt2d = jnp.transpose(tgt, (1, 0, 2)).reshape(B * T, D).astype(f32)
    mem2d = jnp.transpose(memory, (1, 0, 2)).reshape(B * S, D).astype(f32)

    # Pre-transpose all Linear weights to (in, out): kernel does plain x @ W.
    weights = [
        params['sa_wqkv'].T, params['sa_bqkv'],
        params['sa_wo'].T, params['sa_bo'],
        params['ca_wq'].T, params['ca_bq'],
        params['ca_wkv'].T, params['ca_bkv'],
        params['ca_wo'].T, params['ca_bo'],
        params['w1'].T, params['b1'],
        params['w2'].T, params['b2'],
        params['ln_g'], params['ln_b'],
    ]
    weights = [jnp.asarray(w, f32) for w in weights]

    def const_spec(shape):
        zeros = (0,) * len(shape)
        return pl.BlockSpec(shape, lambda i, z=zeros: z)

    in_specs = [
        pl.BlockSpec((Bc * T, D), lambda i: (i, 0)),
        pl.BlockSpec((Bc * S, D), lambda i: (i, 0)),
    ] + [const_spec(w.shape) for w in weights]

    out_specs = [
        pl.BlockSpec((Bc * T, D), lambda i: (i, 0)),
        pl.BlockSpec((Bc, T, T), lambda i: (i, 0, 0)),
        pl.BlockSpec((Bc, T, S), lambda i: (i, 0, 0)),
    ]
    out_shape = [
        jax.ShapeDtypeStruct((B * T, D), f32),
        jax.ShapeDtypeStruct((B, T, T), f32),
        jax.ShapeDtypeStruct((B, T, S), f32),
    ]

    kernel = functools.partial(
        decoder_layer_kernel, nhead=nhead, bc=Bc, tq=T, skv=S)

    out2d, selfw, crossw = pl.pallas_call(
        kernel,
        out_shape=out_shape,
        grid_spec=pltpu.PrefetchScalarGridSpec(
            num_scalar_prefetch=0,
            grid=(batch_blocks,),
            in_specs=in_specs,
            out_specs=out_specs,
        ),
        compiler_params=pltpu.CompilerParams(
            dimension_semantics=("parallel",),   # batch blocks are independent
            vmem_limit_bytes=32 * 1024 * 1024,
        ),
    )(tgt2d, mem2d, *weights)

    out = jnp.transpose(out2d.reshape(B, T, D), (1, 0, 2))   # back to (T, B, D)
    return out, selfw, crossw


# ----------------------------- pure-JAX reference ----------------------------
def _ref_ln(x, g, b, eps=1e-5):
    mu = x.mean(-1, keepdims=True)
    var = ((x - mu) ** 2).mean(-1, keepdims=True)
    return (x - mu) / jnp.sqrt(var + eps) * g + b


def reference(tgt, memory, p, nhead):
    tgt_b = jnp.transpose(tgt, (1, 0, 2))
    mem_b = jnp.transpose(memory, (1, 0, 2))
    B, T, D = tgt_b.shape
    dp = D // nhead

    def mha(xq, xkv, wq, bq, wk, bk, wv, bv, wo, bo, scale):
        q = xq @ wq.T + bq
        k = xkv @ wk.T + bk
        v = xkv @ wv.T + bv
        Tq, Sk = q.shape[1], k.shape[1]
        qh = q.reshape(B, Tq, nhead, dp).transpose(0, 2, 1, 3)
        kh = k.reshape(B, Sk, nhead, dp).transpose(0, 2, 1, 3)
        vh = v.reshape(B, Sk, nhead, dp).transpose(0, 2, 1, 3)
        s = jnp.einsum('bhtd,bhsd->bhts', qh, kh) * scale
        w = jax.nn.softmax(s, axis=-1)
        ctx = jnp.einsum('bhts,bhsd->bhtd', w, vh)
        ctx = ctx.transpose(0, 2, 1, 3).reshape(B, Tq, D)
        return ctx @ wo.T + bo, w.mean(axis=1)

    sw_w, sw_b = p['sa_wqkv'], p['sa_bqkv'][0]
    a, sw = mha(tgt_b, tgt_b,
                sw_w[:D], sw_b[:D], sw_w[D:2 * D], sw_b[D:2 * D],
                sw_w[2 * D:], sw_b[2 * D:], p['sa_wo'], p['sa_bo'][0],
                1.0 / dp ** 0.5)
    x = _ref_ln(tgt_b + a, p['ln_g'][0], p['ln_b'][0])

    ckv_w, ckv_b = p['ca_wkv'], p['ca_bkv'][0]
    a2, cw = mha(x, mem_b,
                 p['ca_wq'], p['ca_bq'][0], ckv_w[:D], ckv_b[:D],
                 ckv_w[D:], ckv_b[D:], p['ca_wo'], p['ca_bo'][0],
                 1.0 / math.sqrt(dp))
    y = _ref_ln(x + a2, p['ln_g'][1], p['ln_b'][1])

    h = jnp.maximum(y @ p['w1'].T + p['b1'][0], 0.0)
    ff = h @ p['w2'].T + p['b2'][0]
    out = _ref_ln(y + ff, p['ln_g'][2], p['ln_b'][2])
    return jnp.transpose(out, (1, 0, 2)), sw, cw


# ---------------------------------- main -------------------------------------
if __name__ == "__main__":
    T, S, B, D, H, FF = 8, 12, 2, 32, 4, 64   # tgt-seq, mem-seq, batch, d_model, heads, ffn

    key = jax.random.PRNGKey(0)
    ks = jax.random.split(key, 16)

    def lin(k, out_dim, in_dim, scale=0.08):
        kw, kb = jax.random.split(k)
        w = (jax.random.normal(kw, (out_dim, in_dim)) * scale).astype(jnp.float32)
        b = (jax.random.normal(kb, (1, out_dim)) * scale).astype(jnp.float32)
        return w, b

    # self-attention qkv_linear (3D, D) kept fused, out_linear
    sa_wqkv, sa_bqkv = lin(ks[0], 3 * D, D)
    sa_wo, sa_bo = lin(ks[1], D, D)
    # cross-attention in_proj (3D, D): q kept separate, k/v fused; out_proj
    ca_wqkv, ca_bqkv = lin(ks[2], 3 * D, D)
    ca_wo, ca_bo = lin(ks[3], D, D)
    # FFN
    w1, b1 = lin(ks[4], FF, D)
    w2, b2 = lin(ks[5], D, FF)
    # LayerNorm affine params stacked: rows = [norm1, norm2, norm3]
    ln_g = (1.0 + 0.1 * jax.random.normal(ks[6], (3, D))).astype(jnp.float32)
    ln_b = (0.05 * jax.random.normal(ks[7], (3, D))).astype(jnp.float32)

    params = dict(
        sa_wqkv=sa_wqkv, sa_bqkv=sa_bqkv, sa_wo=sa_wo, sa_bo=sa_bo,
        ca_wq=ca_wqkv[:D], ca_bq=ca_bqkv[:, :D],
        ca_wkv=ca_wqkv[D:], ca_bkv=ca_bqkv[:, D:],
        ca_wo=ca_wo, ca_bo=ca_bo,
        w1=w1, b1=b1, w2=w2, b2=b2,
        ln_g=ln_g, ln_b=ln_b,
    )

    tgt = jax.random.normal(ks[10], (T, B, D), jnp.float32)
    memory = jax.random.normal(ks[11], (S, B, D), jnp.float32)

    # batch_blocks=1: single well-filled grid step (best for v5e/v6e single TC;
    # on v7x use batch_blocks=2 to feed both TensorCores).
    out, self_w, cross_w = decoder_layer(tgt, memory, params, H, batch_blocks=1)
    out = jax.block_until_ready(out)
    self_w = jax.block_until_ready(self_w)
    cross_w = jax.block_until_ready(cross_w)

    # correctness check vs pure-JAX reference
    ref_out, ref_sw, ref_cw = reference(tgt, memory, params, H)
    np.testing.assert_allclose(np.asarray(out), np.asarray(ref_out), atol=1e-4, rtol=1e-4)
    np.testing.assert_allclose(np.asarray(self_w), np.asarray(ref_sw), atol=1e-4, rtol=1e-4)
    np.testing.assert_allclose(np.asarray(cross_w), np.asarray(ref_cw), atol=1e-4, rtol=1e-4)

    assert out.shape == (T, B, D)
    assert self_w.shape == (B, T, T)
    assert cross_w.shape == (B, T, S)

    print("KERNEL_OK")
</pallas_src>

<mosaic_0001>
module attributes {stable_mosaic.version = 11 : i64} {
  func.func @decoder_layer_kernel(%arg0: i32, %arg1: memref<16x32xf32, #tpu.memory_space<vmem>>, %arg2: memref<24x32xf32, #tpu.memory_space<vmem>>, %arg3: memref<32x96xf32, #tpu.memory_space<vmem>>, %arg4: memref<1x96xf32, #tpu.memory_space<vmem>>, %arg5: memref<32x32xf32, #tpu.memory_space<vmem>>, %arg6: memref<1x32xf32, #tpu.memory_space<vmem>>, %arg7: memref<32x32xf32, #tpu.memory_space<vmem>>, %arg8: memref<1x32xf32, #tpu.memory_space<vmem>>, %arg9: memref<32x64xf32, #tpu.memory_space<vmem>>, %arg10: memref<1x64xf32, #tpu.memory_space<vmem>>, %arg11: memref<32x32xf32, #tpu.memory_space<vmem>>, %arg12: memref<1x32xf32, #tpu.memory_space<vmem>>, %arg13: memref<32x64xf32, #tpu.memory_space<vmem>>, %arg14: memref<1x64xf32, #tpu.memory_space<vmem>>, %arg15: memref<64x32xf32, #tpu.memory_space<vmem>>, %arg16: memref<1x32xf32, #tpu.memory_space<vmem>>, %arg17: memref<3x32xf32, #tpu.memory_space<vmem>>, %arg18: memref<3x32xf32, #tpu.memory_space<vmem>>, %arg19: memref<16x32xf32, #tpu.memory_space<vmem>>, %arg20: memref<2x8x8xf32, #tpu.memory_space<vmem>>, %arg21: memref<2x8x12xf32, #tpu.memory_space<vmem>>) attributes {dimension_semantics = [#tpu.dimension_semantics<parallel>], iteration_bounds = array<i64: 1>, scalar_prefetch = 0 : i64, scratch_operands = 0 : i64, tpu.core_type = #tpu.core_type<tc>, window_params = [{transform_indices = @transform_0, window_bounds = array<i64: 16, 32>}, {transform_indices = @transform_1, window_bounds = array<i64: 24, 32>}, {pipeline_mode = #tpu.pipeline_mode<synchronous>, transform_indices = @transform_2, window_bounds = array<i64: 32, 96>}, {pipeline_mode = #tpu.pipeline_mode<synchronous>, transform_indices = @transform_3, window_bounds = array<i64: 1, 96>}, {pipeline_mode = #tpu.pipeline_mode<synchronous>, transform_indices = @transform_4, window_bounds = array<i64: 32, 32>}, {pipeline_mode = #tpu.pipeline_mode<synchronous>, transform_indices = @transform_5, window_bounds = array<i64: 1, 32>}, {pipeline_mode = #tpu.pipeline_mode<synchronous>, transform_indices = @transform_6, window_bounds = array<i64: 32, 32>}, {pipeline_mode = #tpu.pipeline_mode<synchronous>, transform_indices = @transform_7, window_bounds = array<i64: 1, 32>}, {pipeline_mode = #tpu.pipeline_mode<synchronous>, transform_indices = @transform_8, window_bounds = array<i64: 32, 64>}, {pipeline_mode = #tpu.pipeline_mode<synchronous>, transform_indices = @transform_9, window_bounds = array<i64: 1, 64>}, {pipeline_mode = #tpu.pipeline_mode<synchronous>, transform_indices = @transform_10, window_bounds = array<i64: 32, 32>}, {pipeline_mode = #tpu.pipeline_mode<synchronous>, transform_indices = @transform_11, window_bounds = array<i64: 1, 32>}, {pipeline_mode = #tpu.pipeline_mode<synchronous>, transform_indices = @transform_12, window_bounds = array<i64: 32, 64>}, {pipeline_mode = #tpu.pipeline_mode<synchronous>, transform_indices = @transform_13, window_bounds = array<i64: 1, 64>}, {pipeline_mode = #tpu.pipeline_mode<synchronous>, transform_indices = @transform_14, window_bounds = array<i64: 64, 32>}, {pipeline_mode = #tpu.pipeline_mode<synchronous>, transform_indices = @transform_15, window_bounds = array<i64: 1, 32>}, {pipeline_mode = #tpu.pipeline_mode<synchronous>, transform_indices = @transform_16, window_bounds = array<i64: 3, 32>}, {pipeline_mode = #tpu.pipeline_mode<synchronous>, transform_indices = @transform_17, window_bounds = array<i64: 3, 32>}, {transform_indices = @transform_18, window_bounds = array<i64: 16, 32>}, {transform_indices = @transform_19, window_bounds = array<i64: 2, 8, 8>}, {transform_indices = @transform_20, window_bounds = array<i64: 2, 8, 12>}]} {
    %c0 = arith.constant 0 : index
    %c0_0 = arith.constant 0 : index
    %0 = vector.load %arg1[%c0, %c0_0] : memref<16x32xf32, #tpu.memory_space<vmem>>, vector<16x32xf32>
    %c0_1 = arith.constant 0 : index
    %c0_2 = arith.constant 0 : index
    %1 = vector.load %arg2[%c0_1, %c0_2] : memref<24x32xf32, #tpu.memory_space<vmem>>, vector<24x32xf32>
    %c0_3 = arith.constant 0 : index
    %c0_4 = arith.constant 0 : index
    %2 = vector.load %arg17[%c0_3, %c0_4] : memref<3x32xf32, #tpu.memory_space<vmem>>, vector<3x32xf32>
    %c0_5 = arith.constant 0 : index
    %c0_6 = arith.constant 0 : index
    %3 = vector.load %arg18[%c0_5, %c0_6] : memref<3x32xf32, #tpu.memory_space<vmem>>, vector<3x32xf32>
    %c0_7 = arith.constant 0 : index
    %c0_8 = arith.constant 0 : index
    %4 = vector.load %arg3[%c0_7, %c0_8] : memref<32x96xf32, #tpu.memory_space<vmem>>, vector<32x96xf32>
    %cst = arith.constant dense<0.000000e+00> : vector<16x96xf32>
    %5 = tpu.matmul %0, %4, %cst {dimension_numbers = #tpu.dot_dimension_numbers<[1], [0], [0], [1], [0, 0, 1, 1], [], []>} : vector<16x32xf32>, vector<32x96xf32>, vector<16x96xf32> -> vector<16x96xf32>
    %c0_9 = arith.constant 0 : index
    %c0_10 = arith.constant 0 : index
    %6 = vector.load %arg4[%c0_9, %c0_10] : memref<1x96xf32, #tpu.memory_space<vmem>>, vector<1x96xf32>
    %7 = vector.broadcast %6 : vector<1x96xf32> to vector<16x96xf32>
    %8 = arith.addf %5, %7 : vector<16x96xf32>
    %c0_11 = arith.constant 0 : index
    %c0_12 = arith.constant 0 : index
    %9 = vector.load %arg5[%c0_11, %c0_12] : memref<32x32xf32, #tpu.memory_space<vmem>>, vector<32x32xf32>
    %10 = vector.extract_strided_slice %8 {offsets = [0, 0], sizes = [8, 96], strides = [1, 1]} : vector<16x96xf32> to vector<8x96xf32>
    %11 = vector.extract_strided_slice %8 {offsets = [0, 0], sizes = [8, 96], strides = [1, 1]} : vector<16x96xf32> to vector<8x96xf32>
    %12 = vector.extract_strided_slice %10 {offsets = [0, 0], sizes = [8, 8], strides = [1, 1]} : vector<8x96xf32> to vector<8x8xf32>
    %13 = vector.extract_strided_slice %11 {offsets = [0, 32], sizes = [8, 8], strides = [1, 1]} : vector<8x96xf32> to vector<8x8xf32>
    %14 = vector.extract_strided_slice %11 {offsets = [0, 64], sizes = [8, 8], strides = [1, 1]} : vector<8x96xf32> to vector<8x8xf32>
    %cst_13 = arith.constant dense<0.000000e+00> : vector<8x8xf32>
    %15 = tpu.matmul %12, %13, %cst_13 {dimension_numbers = #tpu.dot_dimension_numbers<[1], [1], [0], [0], [0, 0, 1, 0], [], []>} : vector<8x8xf32>, vector<8x8xf32>, vector<8x8xf32> -> vector<8x8xf32>
    %cst_14 = arith.constant 0.353553385 : f32
    %16 = vector.broadcast %cst_14 : f32 to vector<8x8xf32>
    %17 = arith.mulf %15, %16 : vector<8x8xf32>
    %cst_15 = arith.constant dense<0xFF800000> : vector<8xf32>
    %18 = vector.multi_reduction <maximumf>, %17, %cst_15 [1] : vector<8x8xf32> to vector<8xf32>
    %19 = vector.shape_cast %18 : vector<8xf32> to vector<8x1xf32>
    %20 = vector.broadcast %19 : vector<8x1xf32> to vector<8x8xf32>
    %21 = arith.subf %17, %20 : vector<8x8xf32>
    %22 = math.exp %21 : vector<8x8xf32>
    %cst_16 = arith.constant dense<0.000000e+00> : vector<8xf32>
    %23 = vector.multi_reduction <add>, %22, %cst_16 [1] : vector<8x8xf32> to vector<8xf32>
    %24 = vector.shape_cast %23 : vector<8xf32> to vector<8x1xf32>
    %25 = tpu.reciprocal %24 : vector<8x1xf32> -> vector<8x1xf32>
    %26 = vector.broadcast %25 : vector<8x1xf32> to vector<8x8xf32>
    %27 = arith.mulf %22, %26 : vector<8x8xf32>
    %cst_17 = arith.constant dense<0.000000e+00> : vector<8x8xf32>
    %28 = tpu.matmul %27, %14, %cst_17 {dimension_numbers = #tpu.dot_dimension_numbers<[1], [0], [0], [1], [0, 0, 1, 1], [], []>} : vector<8x8xf32>, vector<8x8xf32>, vector<8x8xf32> -> vector<8x8xf32>
    %29 = vector.extract_strided_slice %9 {offsets = [0, 0], sizes = [8, 32], strides = [1, 1]} : vector<32x32xf32> to vector<8x32xf32>
    %cst_18 = arith.constant dense<0.000000e+00> : vector<8x32xf32>
    %30 = tpu.matmul %28, %29, %cst_18 {dimension_numbers = #tpu.dot_dimension_numbers<[1], [0], [0], [1], [0, 0, 1, 1], [], []>} : vector<8x8xf32>, vector<8x32xf32>, vector<8x32xf32> -> vector<8x32xf32>
    %31 = vector.extract_strided_slice %10 {offsets = [0, 8], sizes = [8, 8], strides = [1, 1]} : vector<8x96xf32> to vector<8x8xf32>
    %32 = vector.extract_strided_slice %11 {offsets = [0, 40], sizes = [8, 8], strides = [1, 1]} : vector<8x96xf32> to vector<8x8xf32>
    %33 = vector.extract_strided_slice %11 {offsets = [0, 72], sizes = [8, 8], strides = [1, 1]} : vector<8x96xf32> to vector<8x8xf32>
    %cst_19 = arith.constant dense<0.000000e+00> : vector<8x8xf32>
    %34 = tpu.matmul %31, %32, %cst_19 {dimension_numbers = #tpu.dot_dimension_numbers<[1], [1], [0], [0], [0, 0, 1, 0], [], []>} : vector<8x8xf32>, vector<8x8xf32>, vector<8x8xf32> -> vector<8x8xf32>
    %cst_20 = arith.constant 0.353553385 : f32
    %35 = vector.broadcast %cst_20 : f32 to vector<8x8xf32>
    %36 = arith.mulf %34, %35 : vector<8x8xf32>
    %cst_21 = arith.constant dense<0xFF800000> : vector<8xf32>
    %37 = vector.multi_reduction <maximumf>, %36, %cst_21 [1] : vector<8x8xf32> to vector<8xf32>
    %38 = vector.shape_cast %37 : vector<8xf32> to vector<8x1xf32>
    %39 = vector.broadcast %38 : vector<8x1xf32> to vector<8x8xf32>
    %40 = arith.subf %36, %39 : vector<8x8xf32>
    %41 = math.exp %40 : vector<8x8xf32>
    %cst_22 = arith.constant dense<0.000000e+00> : vector<8xf32>
    %42 = vector.multi_reduction <add>, %41, %cst_22 [1] : vector<8x8xf32> to vector<8xf32>
    %43 = vector.shape_cast %42 : vector<8xf32> to vector<8x1xf32>
    %44 = tpu.reciprocal %43 : vector<8x1xf32> -> vector<8x1xf32>
    %45 = vector.broadcast %44 : vector<8x1xf32> to vector<8x8xf32>
    %46 = arith.mulf %41, %45 : vector<8x8xf32>
    %47 = arith.addf %27, %46 : vector<8x8xf32>
    %cst_23 = arith.constant dense<0.000000e+00> : vector<8x8xf32>
    %48 = tpu.matmul %46, %33, %cst_23 {dimension_numbers = #tpu.dot_dimension_numbers<[1], [0], [0], [1], [0, 0, 1, 1], [], []>} : vector<8x8xf32>, vector<8x8xf32>, vector<8x8xf32> -> vector<8x8xf32>
    %49 = vector.extract_strided_slice %9 {offsets = [8, 0], sizes = [8, 32], strides = [1, 1]} : vector<32x32xf32> to vector<8x32xf32>
    %cst_24 = arith.constant dense<0.000000e+00> : vector<8x32xf32>
    %50 = tpu.matmul %48, %49, %cst_24 {dimension_numbers = #tpu.dot_dimension_numbers<[1], [0], [0], [1], [0, 0, 1, 1], [], []>} : vector<8x8xf32>, vector<8x32xf32>, vector<8x32xf32> -> vector<8x32xf32>
    %51 = arith.addf %30, %50 : vector<8x32xf32>
    %52 = vector.extract_strided_slice %10 {offsets = [0, 16], sizes = [8, 8], strides = [1, 1]} : vector<8x96xf32> to vector<8x8xf32>
    %53 = vector.extract_strided_slice %11 {offsets = [0, 48], sizes = [8, 8], strides = [1, 1]} : vector<8x96xf32> to vector<8x8xf32>
    %54 = vector.extract_strided_slice %11 {offsets = [0, 80], sizes = [8, 8], strides = [1, 1]} : vector<8x96xf32> to vector<8x8xf32>
    %cst_25 = arith.constant dense<0.000000e+00> : vector<8x8xf32>
    %55 = tpu.matmul %52, %53, %cst_25 {dimension_numbers = #tpu.dot_dimension_numbers<[1], [1], [0], [0], [0, 0, 1, 0], [], []>} : vector<8x8xf32>, vector<8x8xf32>, vector<8x8xf32> -> vector<8x8xf32>
    %cst_26 = arith.constant 0.353553385 : f32
    %56 = vector.broadcast %cst_26 : f32 to vector<8x8xf32>
    %57 = arith.mulf %55, %56 : vector<8x8xf32>
    %cst_27 = arith.constant dense<0xFF800000> : vector<8xf32>
    %58 = vector.multi_reduction <maximumf>, %57, %cst_27 [1] : vector<8x8xf32> to vector<8xf32>
    %59 = vector.shape_cast %58 : vector<8xf32> to vector<8x1xf32>
    %60 = vector.broadcast %59 : vector<8x1xf32> to vector<8x8xf32>
    %61 = arith.subf %57, %60 : vector<8x8xf32>
    %62 = math.exp %61 : vector<8x8xf32>
    %cst_28 = arith.constant dense<0.000000e+00> : vector<8xf32>
    %63 = vector.multi_reduction <add>, %62, %cst_28 [1] : vector<8x8xf32> to vector<8xf32>
    %64 = vector.shape_cast %63 : vector<8xf32> to vector<8x1xf32>
    %65 = tpu.reciprocal %64 : vector<8x1xf32> -> vector<8x1xf32>
    %66 = vector.broadcast %65 : vector<8x1xf32> to vector<8x8xf32>
    %67 = arith.mulf %62, %66 : vector<8x8xf32>
    %68 = arith.addf %47, %67 : vector<8x8xf32>
    %cst_29 = arith.constant dense<0.000000e+00> : vector<8x8xf32>
    %69 = tpu.matmul %67, %54, %cst_29 {dimension_numbers = #tpu.dot_dimension_numbers<[1], [0], [0], [1], [0, 0, 1, 1], [], []>} : vector<8x8xf32>, vector<8x8xf32>, vector<8x8xf32> -> vector<8x8xf32>
    %70 = vector.extract_strided_slice %9 {offsets = [16, 0], sizes = [8, 32], strides = [1, 1]} : vector<32x32xf32> to vector<8x32xf32>
    %cst_30 = arith.constant dense<0.000000e+00> : vector<8x32xf32>
    %71 = tpu.matmul %69, %70, %cst_30 {dimension_numbers = #tpu.dot_dimension_numbers<[1], [0], [0], [1], [0, 0, 1, 1], [], []>} : vector<8x8xf32>, vector<8x32xf32>, vector<8x32xf32> -> vector<8x32xf32>
    %72 = arith.addf %51, %71 : vector<8x32xf32>
    %73 = vector.extract_strided_slice %10 {offsets = [0, 24], sizes = [8, 8], strides = [1, 1]} : vector<8x96xf32> to vector<8x8xf32>
    %74 = vector.extract_strided_slice %11 {offsets = [0, 56], sizes = [8, 8], strides = [1, 1]} : vector<8x96xf32> to vector<8x8xf32>
    %75 = vector.extract_strided_slice %11 {offsets = [0, 88], sizes = [8, 8], strides = [1, 1]} : vector<8x96xf32> to vector<8x8xf32>
    %cst_31 = arith.constant dense<0.000000e+00> : vector<8x8xf32>
    %76 = tpu.matmul %73, %74, %cst_31 {dimension_numbers = #tpu.dot_dimension_numbers<[1], [1], [0], [0], [0, 0, 1, 0], [], []>} : vector<8x8xf32>, vector<8x8xf32>, vector<8x8xf32> -> vector<8x8xf32>
    %cst_32 = arith.constant 0.353553385 : f32
    %77 = vector.broadcast %cst_32 : f32 to vector<8x8xf32>
    %78 = arith.mulf %76, %77 : vector<8x8xf32>
    %cst_33 = arith.constant dense<0xFF800000> : vector<8xf32>
    %79 = vector.multi_reduction <maximumf>, %78, %cst_33 [1] : vector<8x8xf32> to vector<8xf32>
    %80 = vector.shape_cast %79 : vector<8xf32> to vector<8x1xf32>
    %81 = vector.broadcast %80 : vector<8x1xf32> to vector<8x8xf32>
    %82 = arith.subf %78, %81 : vector<8x8xf32>
    %83 = math.exp %82 : vector<8x8xf32>
    %cst_34 = arith.constant dense<0.000000e+00> : vector<8xf32>
    %84 = vector.multi_reduction <add>, %83, %cst_34 [1] : vector<8x8xf32> to vector<8xf32>
    %85 = vector.shape_cast %84 : vector<8xf32> to vector<8x1xf32>
    %86 = tpu.reciprocal %85 : vector<8x1xf32> -> vector<8x1xf32>
    %87 = vector.broadcast %86 : vector<8x1xf32> to vector<8x8xf32>
    %88 = arith.mulf %83, %87 : vector<8x8xf32>
    %89 = arith.addf %68, %88 : vector<8x8xf32>
    %cst_35 = arith.constant dense<0.000000e+00> : vector<8x8xf32>
    %90 = tpu.matmul %88, %75, %cst_35 {dimension_numbers = #tpu.dot_dimension_numbers<[1], [0], [0], [1], [0, 0, 1, 1], [], []>} : vector<8x8xf32>, vector<8x8xf32>, vector<8x8xf32> -> vector<8x8xf32>
    %91 = vector.extract_strided_slice %9 {offsets = [24, 0], sizes = [8, 32], strides = [1, 1]} : vector<32x32xf32> to vector<8x32xf32>
    %cst_36 = arith.constant dense<0.000000e+00> : vector<8x32xf32>
    %92 = tpu.matmul %90, %91, %cst_36 {dimension_numbers = #tpu.dot_dimension_numbers<[1], [0], [0], [1], [0, 0, 1, 1], [], []>} : vector<8x8xf32>, vector<8x32xf32>, vector<8x32xf32> -> vector<8x32xf32>
    %93 = arith.addf %72, %92 : vector<8x32xf32>
    %cst_37 = arith.constant 2.500000e-01 : f32
    %94 = vector.broadcast %cst_37 : f32 to vector<8x8xf32>
    %95 = arith.mulf %89, %94 : vector<8x8xf32>
    %c0_38 = arith.constant 0 : index
    %c0_39 = arith.constant 0 : index
    %c0_40 = arith.constant 0 : index
    %96 = vector.load %arg20[%c0_38, %c0_39, %c0_40] : memref<2x8x8xf32, #tpu.memory_space<vmem>>, vector<1x8x8xf32>
    %97 = vector.shape_cast %96 : vector<1x8x8xf32> to vector<8x8xf32>
    %98 = vector.shape_cast %95 : vector<8x8xf32> to vector<1x8x8xf32>
    tpu.vector_store %arg20[%c0_38, %c0_39, %c0_40], %98 {strides = array<i32>} : memref<2x8x8xf32, #tpu.memory_space<vmem>>, vector<1x8x8xf32>,
    %99 = vector.extract_strided_slice %8 {offsets = [8, 0], sizes = [8, 96], strides = [1, 1]} : vector<16x96xf32> to vector<8x96xf32>
    %100 = vector.extract_strided_slice %8 {offsets = [8, 0], sizes = [8, 96], strides = [1, 1]} : vector<16x96xf32> to vector<8x96xf32>
    %101 = vector.extract_strided_slice %99 {offsets = [0, 0], sizes = [8, 8], strides = [1, 1]} : vector<8x96xf32> to vector<8x8xf32>
    %102 = vector.extract_strided_slice %100 {offsets = [0, 32], sizes = [8, 8], strides = [1, 1]} : vector<8x96xf32> to vector<8x8xf32>
    %103 = vector.extract_strided_slice %100 {offsets = [0, 64], sizes = [8, 8], strides = [1, 1]} : vector<8x96xf32> to vector<8x8xf32>
    %cst_41 = arith.constant dense<0.000000e+00> : vector<8x8xf32>
    %104 = tpu.matmul %101, %102, %cst_41 {dimension_numbers = #tpu.dot_dimension_numbers<[1], [1], [0], [0], [0, 0, 1, 0], [], []>} : vector<8x8xf32>, vector<8x8xf32>, vector<8x8xf32> -> vector<8x8xf32>
    %cst_42 = arith.constant 0.353553385 : f32
    %105 = vector.broadcast %cst_42 : f32 to vector<8x8xf32>
    %106 = arith.mulf %104, %105 : vector<8x8xf32>
    %cst_43 = arith.constant dense<0xFF800000> : vector<8xf32>
    %107 = vector.multi_reduction <maximumf>, %106, %cst_43 [1] : vector<8x8xf32> to vector<8xf32>
    %108 = vector.shape_cast %107 : vector<8xf32> to vector<8x1xf32>
    %109 = vector.broadcast %108 : vector<8x1xf32> to vector<8x8xf32>
    %110 = arith.subf %106, %109 : vector<8x8xf32>
    %111 = math.exp %110 : vector<8x8xf32>
    %cst_44 = arith.constant dense<0.000000e+00> : vector<8xf32>
    %112 = vector.multi_reduction <add>, %111, %cst_44 [1] : vector<8x8xf32> to vector<8xf32>
    %113 = vector.shape_cast %112 : vector<8xf32> to vector<8x1xf32>
    %114 = tpu.reciprocal %113 : vector<8x1xf32> -> vector<8x1xf32>
    %115 = vector.broadcast %114 : vector<8x1xf32> to vector<8x8xf32>
    %116 = arith.mulf %111, %115 : vector<8x8xf32>
    %cst_45 = arith.constant dense<0.000000e+00> : vector<8x8xf32>
    %117 = tpu.matmul %116, %103, %cst_45 {dimension_numbers = #tpu.dot_dimension_numbers<[1], [0], [0], [1], [0, 0, 1, 1], [], []>} : vector<8x8xf32>, vector<8x8xf32>, vector<8x8xf32> -> vector<8x8xf32>
    %118 = vector.extract_strided_slice %9 {offsets = [0, 0], sizes = [8, 32], strides = [1, 1]} : vector<32x32xf32> to vector<8x32xf32>
    %cst_46 = arith.constant dense<0.000000e+00> : vector<8x32xf32>
    %119 = tpu.matmul %117, %118, %cst_46 {dimension_numbers = #tpu.dot_dimension_numbers<[1], [0], [0], [1], [0, 0, 1, 1], [], []>} : vector<8x8xf32>, vector<8x32xf32>, vector<8x32xf32> -> vector<8x32xf32>
    %120 = vector.extract_strided_slice %99 {offsets = [0, 8], sizes = [8, 8], strides = [1, 1]} : vector<8x96xf32> to vector<8x8xf32>
    %121 = vector.extract_strided_slice %100 {offsets = [0, 40], sizes = [8, 8], strides = [1, 1]} : vector<8x96xf32> to vector<8x8xf32>
    %122 = vector.extract_strided_slice %100 {offsets = [0, 72], sizes = [8, 8], strides = [1, 1]} : vector<8x96xf32> to vector<8x8xf32>
    %cst_47 = arith.constant dense<0.000000e+00> : vector<8x8xf32>
    %123 = tpu.matmul %120, %121, %cst_47 {dimension_numbers = #tpu.dot_dimension_numbers<[1], [1], [0], [0], [0, 0, 1, 0], [], []>} : vector<8x8xf32>, vector<8x8xf32>, vector<8x8xf32> -> vector<8x8xf32>
    %cst_48 = arith.constant 0.353553385 : f32
    %124 = vector.broadcast %cst_48 : f32 to vector<8x8xf32>
    %125 = arith.mulf %123, %124 : vector<8x8xf32>
    %cst_49 = arith.constant dense<0xFF800000> : vector<8xf32>
    %126 = vector.multi_reduction <maximumf>, %125, %cst_49 [1] : vector<8x8xf32> to vector<8xf32>
    %127 = vector.shape_cast %126 : vector<8xf32> to vector<8x1xf32>
    %128 = vector.broadcast %127 : vector<8x1xf32> to vector<8x8xf32>
    %129 = arith.subf %125, %128 : vector<8x8xf32>
    %130 = math.exp %129 : vector<8x8xf32>
    %cst_50 = arith.constant dense<0.000000e+00> : vector<8xf32>
    %131 = vector.multi_reduction <add>, %130, %cst_50 [1] : vector<8x8xf32> to vector<8xf32>
    %132 = vector.shape_cast %131 : vector<8xf32> to vector<8x1xf32>
    %133 = tpu.reciprocal %132 : vector<8x1xf32> -> vector<8x1xf32>
    %134 = vector.broadcast %133 : vector<8x1xf32> to vector<8x8xf32>
    %135 = arith.mulf %130, %134 : vector<8x8xf32>
    %136 = arith.addf %116, %135 : vector<8x8xf32>
    %cst_51 = arith.constant dense<0.000000e+00> : vector<8x8xf32>
    %137 = tpu.matmul %135, %122, %cst_51 {dimension_numbers = #tpu.dot_dimension_numbers<[1], [0], [0], [1], [0, 0, 1, 1], [], []>} : vector<8x8xf32>, vector<8x8xf32>, vector<8x8xf32> -> vector<8x8xf32>
    %138 = vector.extract_strided_slice %9 {offsets = [8, 0], sizes = [8, 32], strides = [1, 1]} : vector<32x32xf32> to vector<8x32xf32>
    %cst_52 = arith.constant dense<0.000000e+00> : vector<8x32xf32>
    %139 = tpu.matmul %137, %138, %cst_52 {dimension_numbers = #tpu.dot_dimension_numbers<[1], [0], [0], [1], [0, 0, 1, 1], [], []>} : vector<8x8xf32>, vector<8x32xf32>, vector<8x32xf32> -> vector<8x32xf32>
    %140 = arith.addf %119, %139 : vector<8x32xf32>
    %141 = vector.extract_strided_slice %99 {offsets = [0, 16], sizes = [8, 8], strides = [1, 1]} : vector<8x96xf32> to vector<8x8xf32>
    %142 = vector.extract_strided_slice %100 {offsets = [0, 48], sizes = [8, 8], strides = [1, 1]} : vector<8x96xf32> to vector<8x8xf32>
    %143 = vector.extract_strided_slice %100 {offsets = [0, 80], sizes = [8, 8], strides = [1, 1]} : vector<8x96xf32> to vector<8x8xf32>
    %cst_53 = arith.constant dense<0.000000e+00> : vector<8x8xf32>
    %144 = tpu.matmul %141, %142, %cst_53 {dimension_numbers = #tpu.dot_dimension_numbers<[1], [1], [0], [0], [0, 0, 1, 0], [], []>} : vector<8x8xf32>, vector<8x8xf32>, vector<8x8xf32> -> vector<8x8xf32>
    %cst_54 = arith.constant 0.353553385 : f32
    %145 = vector.broadcast %cst_54 : f32 to vector<8x8xf32>
    %146 = arith.mulf %144, %145 : vector<8x8xf32>
    %cst_55 = arith.constant dense<0xFF800000> : vector<8xf32>
    %147 = vector.multi_reduction <maximumf>, %146, %cst_55 [1] : vector<8x8xf32> to vector<8xf32>
    %148 = vector.shape_cast %147 : vector<8xf32> to vector<8x1xf32>
    %149 = vector.broadcast %148 : vector<8x1xf32> to vector<8x8xf32>
    %150 = arith.subf %146, %149 : vector<8x8xf32>
    %151 = math.exp %150 : vector<8x8xf32>
    %cst_56 = arith.constant dense<0.000000e+00> : vector<8xf32>
    %152 = vector.multi_reduction <add>, %151, %cst_56 [1] : vector<8x8xf32> to vector<8xf32>
    %153 = vector.shape_cast %152 : vector<8xf32> to vector<8x1xf32>
    %154 = tpu.reciprocal %153 : vector<8x1xf32> -> vector<8x1xf32>
    %155 = vector.broadcast %154 : vector<8x1xf32> to vector<8x8xf32>
    %156 = arith.mulf %151, %155 : vector<8x8xf32>
    %157 = arith.addf %136, %156 : vector<8x8xf32>
    %cst_57 = arith.constant dense<0.000000e+00> : vector<8x8xf32>
    %158 = tpu.matmul %156, %143, %cst_57 {dimension_numbers = #tpu.dot_dimension_numbers<[1], [0], [0], [1], [0, 0, 1, 1], [], []>} : vector<8x8xf32>, vector<8x8xf32>, vector<8x8xf32> -> vector<8x8xf32>
    %159 = vector.extract_strided_slice %9 {offsets = [16, 0], sizes = [8, 32], strides = [1, 1]} : vector<32x32xf32> to vector<8x32xf32>
    %cst_58 = arith.constant dense<0.000000e+00> : vector<8x32xf32>
    %160 = tpu.matmul %158, %159, %cst_58 {dimension_numbers = #tpu.dot_dimension_numbers<[1], [0], [0], [1], [0, 0, 1, 1], [], []>} : vector<8x8xf32>, vector<8x32xf32>, vector<8x32xf32> -> vector<8x32xf32>
    %161 = arith.addf %140, %160 : vector<8x32xf32>
    %162 = vector.extract_strided_slice %99 {offsets = [0, 24], sizes = [8, 8], strides = [1, 1]} : vector<8x96xf32> to vector<8x8xf32>
    %163 = vector.extract_strided_slice %100 {offsets = [0, 56], sizes = [8, 8], strides = [1, 1]} : vector<8x96xf32> to vector<8x8xf32>
    %164 = vector.extract_strided_slice %100 {offsets = [0, 88], sizes = [8, 8], strides = [1, 1]} : vector<8x96xf32> to vector<8x8xf32>
    %cst_59 = arith.constant dense<0.000000e+00> : vector<8x8xf32>
    %165 = tpu.matmul %162, %163, %cst_59 {dimension_numbers = #tpu.dot_dimension_numbers<[1], [1], [0], [0], [0, 0, 1, 0], [], []>} : vector<8x8xf32>, vector<8x8xf32>, vector<8x8xf32> -> vector<8x8xf32>
    %cst_60 = arith.constant 0.353553385 : f32
    %166 = vector.broadcast %cst_60 : f32 to vector<8x8xf32>
    %167 = arith.mulf %165, %166 : vector<8x8xf32>
    %cst_61 = arith.constant dense<0xFF800000> : vector<8xf32>
    %168 = vector.multi_reduction <maximumf>, %167, %cst_61 [1] : vector<8x8xf32> to vector<8xf32>
    %169 = vector.shape_cast %168 : vector<8xf32> to vector<8x1xf32>
    %170 = vector.broadcast %169 : vector<8x1xf32> to vector<8x8xf32>
    %171 = arith.subf %167, %170 : vector<8x8xf32>
    %172 = math.exp %171 : vector<8x8xf32>
    %cst_62 = arith.constant dense<0.000000e+00> : vector<8xf32>
    %173 = vector.multi_reduction <add>, %172, %cst_62 [1] : vector<8x8xf32> to vector<8xf32>
    %174 = vector.shape_cast %173 : vector<8xf32> to vector<8x1xf32>
    %175 = tpu.reciprocal %174 : vector<8x1xf32> -> vector<8x1xf32>
    %176 = vector.broadcast %175 : vector<8x1xf32> to vector<8x8xf32>
    %177 = arith.mulf %172, %176 : vector<8x8xf32>
    %178 = arith.addf %157, %177 : vector<8x8xf32>
    %cst_63 = arith.constant dense<0.000000e+00> : vector<8x8xf32>
    %179 = tpu.matmul %177, %164, %cst_63 {dimension_numbers = #tpu.dot_dimension_numbers<[1], [0], [0], [1], [0, 0, 1, 1], [], []>} : vector<8x8xf32>, vector<8x8xf32>, vector<8x8xf32> -> vector<8x8xf32>
    %180 = vector.extract_strided_slice %9 {offsets = [24, 0], sizes = [8, 32], strides = [1, 1]} : vector<32x32xf32> to vector<8x32xf32>
    %cst_64 = arith.constant dense<0.000000e+00> : vector<8x32xf32>
    %181 = tpu.matmul %179, %180, %cst_64 {dimension_numbers = #tpu.dot_dimension_numbers<[1], [0], [0], [1], [0, 0, 1, 1], [], []>} : vector<8x8xf32>, vector<8x32xf32>, vector<8x32xf32> -> vector<8x32xf32>
    %182 = arith.addf %161, %181 : vector<8x32xf32>
    %cst_65 = arith.constant 2.500000e-01 : f32
    %183 = vector.broadcast %cst_65 : f32 to vector<8x8xf32>
    %184 = arith.mulf %178, %183 : vector<8x8xf32>
    %c1 = arith.constant 1 : index
    %c0_66 = arith.constant 0 : index
    %c0_67 = arith.constant 0 : index
    %185 = vector.load %arg20[%c1, %c0_66, %c0_67] : memref<2x8x8xf32, #tpu.memory_space<vmem>>, vector<1x8x8xf32>
    %186 = vector.shape_cast %185 : vector<1x8x8xf32> to vector<8x8xf32>
    %187 = vector.shape_cast %184 : vector<8x8xf32> to vector<1x8x8xf32>
    tpu.vector_store %arg20[%c1, %c0_66, %c0_67], %187 {strides = array<i32>} : memref<2x8x8xf32, #tpu.memory_space<vmem>>, vector<1x8x8xf32>,
    %188 = tpu.concatenate %93, %182 in 0 : vector<8x32xf32>, vector<8x32xf32> -> vector<16x32xf32>
    %c0_68 = arith.constant 0 : index
    %c0_69 = arith.constant 0 : index
    %189 = vector.load %arg6[%c0_68, %c0_69] : memref<1x32xf32, #tpu.memory_space<vmem>>, vector<1x32xf32>
    %190 = vector.broadcast %189 : vector<1x32xf32> to vector<16x32xf32>
    %191 = arith.addf %188, %190 : vector<16x32xf32>
    %192 = arith.addf %0, %191 : vector<16x32xf32>
    %193 = vector.extract_strided_slice %2 {offsets = [0, 0], sizes = [1, 32], strides = [1, 1]} : vector<3x32xf32> to vector<1x32xf32>
    %194 = vector.extract_strided_slice %3 {offsets = [0, 0], sizes = [1, 32], strides = [1, 1]} : vector<3x32xf32> to vector<1x32xf32>
    %cst_70 = arith.constant dense<0.000000e+00> : vector<16xf32>
    %195 = vector.multi_reduction <add>, %192, %cst_70 [1] : vector<16x32xf32> to vector<16xf32>
    %196 = vector.shape_cast %195 : vector<16xf32> to vector<16x1xf32>
    %cst_71 = arith.constant 3.200000e+01 : f32
    %197 = vector.broadcast %cst_71 : f32 to vector<16x1xf32>
    %198 = arith.divf %196, %197 : vector<16x1xf32>
    %199 = vector.broadcast %198 : vector<16x1xf32> to vector<16x32xf32>
    %200 = arith.subf %192, %199 : vector<16x32xf32>
    %201 = arith.mulf %200, %200 : vector<16x32xf32>
    %cst_72 = arith.constant dense<0.000000e+00> : vector<16xf32>
    %202 = vector.multi_reduction <add>, %201, %cst_72 [1] : vector<16x32xf32> to vector<16xf32>
    %203 = vector.shape_cast %202 : vector<16xf32> to vector<16x1xf32>
    %cst_73 = arith.constant 3.200000e+01 : f32
    %204 = vector.broadcast %cst_73 : f32 to vector<16x1xf32>
    %205 = arith.divf %203, %204 : vector<16x1xf32>
    %cst_74 = arith.constant 9.99999974E-6 : f32
    %206 = vector.broadcast %cst_74 : f32 to vector<16x1xf32>
    %207 = arith.addf %205, %206 : vector<16x1xf32>
    %208 = math.rsqrt %207 : vector<16x1xf32>
    %209 = vector.broadcast %208 : vector<16x1xf32> to vector<16x32xf32>
    %210 = arith.mulf %200, %209 : vector<16x32xf32>
    %211 = vector.broadcast %193 : vector<1x32xf32> to vector<16x32xf32>
    %212 = arith.mulf %210, %211 : vector<16x32xf32>
    %213 = vector.broadcast %194 : vector<1x32xf32> to vector<16x32xf32>
    %214 = arith.addf %212, %213 : vector<16x32xf32>
    %c0_75 = arith.constant 0 : index
    %c0_76 = arith.constant 0 : index
    %215 = vector.load %arg7[%c0_75, %c0_76] : memref<32x32xf32, #tpu.memory_space<vmem>>, vector<32x32xf32>
    %cst_77 = arith.constant dense<0.000000e+00> : vector<16x32xf32>
    %216 = tpu.matmul %214, %215, %cst_77 {dimension_numbers = #tpu.dot_dimension_numbers<[1], [0], [0], [1], [0, 0, 1, 1], [], []>} : vector<16x32xf32>, vector<32x32xf32>, vector<16x32xf32> -> vector<16x32xf32>
    %c0_78 = arith.constant 0 : index
    %c0_79 = arith.constant 0 : index
    %217 = vector.load %arg8[%c0_78, %c0_79] : memref<1x32xf32, #tpu.memory_space<vmem>>, vector<1x32xf32>
    %218 = vector.broadcast %217 : vector<1x32xf32> to vector<16x32xf32>
    %219 = arith.addf %216, %218 : vector<16x32xf32>
    %c0_80 = arith.constant 0 : index
    %c0_81 = arith.constant 0 : index
    %220 = vector.load %arg9[%c0_80, %c0_81] : memref<32x64xf32, #tpu.memory_space<vmem>>, vector<32x64xf32>
    %cst_82 = arith.constant dense<0.000000e+00> : vector<24x64xf32>
    %221 = tpu.matmul %1, %220, %cst_82 {dimension_numbers = #tpu.dot_dimension_numbers<[1], [0], [0], [1], [0, 0, 1, 1], [], []>} : vector<24x32xf32>, vector<32x64xf32>, vector<24x64xf32> -> vector<24x64xf32>
    %c0_83 = arith.constant 0 : index
    %c0_84 = arith.constant 0 : index
    %222 = vector.load %arg10[%c0_83, %c0_84] : memref<1x64xf32, #tpu.memory_space<vmem>>, vector<1x64xf32>
    %223 = vector.broadcast %222 : vector<1x64xf32> to vector<24x64xf32>
    %224 = arith.addf %221, %223 : vector<24x64xf32>
    %c0_85 = arith.constant 0 : index
    %c0_86 = arith.constant 0 : index
    %225 = vector.load %arg11[%c0_85, %c0_86] : memref<32x32xf32, #tpu.memory_space<vmem>>, vector<32x32xf32>
    %226 = vector.extract_strided_slice %219 {offsets = [0, 0], sizes = [8, 32], strides = [1, 1]} : vector<16x32xf32> to vector<8x32xf32>
    %227 = vector.extract_strided_slice %224 {offsets = [0, 0], sizes = [12, 64], strides = [1, 1]} : vector<24x64xf32> to vector<12x64xf32>
    %228 = vector.extract_strided_slice %226 {offsets = [0, 0], sizes = [8, 8], strides = [1, 1]} : vector<8x32xf32> to vector<8x8xf32>
    %229 = vector.extract_strided_slice %227 {offsets = [0, 0], sizes = [12, 8], strides = [1, 1]} : vector<12x64xf32> to vector<12x8xf32>
    %230 = vector.extract_strided_slice %227 {offsets = [0, 32], sizes = [12, 8], strides = [1, 1]} : vector<12x64xf32> to vector<12x8xf32>
    %cst_87 = arith.constant dense<0.000000e+00> : vector<8x12xf32>
    %231 = tpu.matmul %228, %229, %cst_87 {dimension_numbers = #tpu.dot_dimension_numbers<[1], [1], [0], [0], [0, 0, 1, 0], [], []>} : vector<8x8xf32>, vector<12x8xf32>, vector<8x12xf32> -> vector<8x12xf32>
    %cst_88 = arith.constant 0.353553385 : f32
    %232 = vector.broadcast %cst_88 : f32 to vector<8x12xf32>
    %233 = arith.mulf %231, %232 : vector<8x12xf32>
    %cst_89 = arith.constant dense<0xFF800000> : vector<8xf32>
    %234 = vector.multi_reduction <maximumf>, %233, %cst_89 [1] : vector<8x12xf32> to vector<8xf32>
    %235 = vector.shape_cast %234 : vector<8xf32> to vector<8x1xf32>
    %236 = vector.broadcast %235 : vector<8x1xf32> to vector<8x12xf32>
    %237 = arith.subf %233, %236 : vector<8x12xf32>
    %238 = math.exp %237 : vector<8x12xf32>
    %cst_90 = arith.constant dense<0.000000e+00> : vector<8xf32>
    %239 = vector.multi_reduction <add>, %238, %cst_90 [1] : vector<8x12xf32> to vector<8xf32>
    %240 = vector.shape_cast %239 : vector<8xf32> to vector<8x1xf32>
    %241 = tpu.reciprocal %240 : vector<8x1xf32> -> vector<8x1xf32>
    %242 = vector.broadcast %241 : vector<8x1xf32> to vector<8x12xf32>
    %243 = arith.mulf %238, %242 : vector<8x12xf32>
    %cst_91 = arith.constant dense<0.000000e+00> : vector<8x8xf32>
    %244 = tpu.matmul %243, %230, %cst_91 {dimension_numbers = #tpu.dot_dimension_numbers<[1], [0], [0], [1], [0, 0, 1, 1], [], []>} : vector<8x12xf32>, vector<12x8xf32>, vector<8x8xf32> -> vector<8x8xf32>
    %245 = vector.extract_strided_slice %225 {offsets = [0, 0], sizes = [8, 32], strides = [1, 1]} : vector<32x32xf32> to vector<8x32xf32>
    %cst_92 = arith.constant dense<0.000000e+00> : vector<8x32xf32>
    %246 = tpu.matmul %244, %245, %cst_92 {dimension_numbers = #tpu.dot_dimension_numbers<[1], [0], [0], [1], [0, 0, 1, 1], [], []>} : vector<8x8xf32>, vector<8x32xf32>, vector<8x32xf32> -> vector<8x32xf32>
    %247 = vector.extract_strided_slice %226 {offsets = [0, 8], sizes = [8, 8], strides = [1, 1]} : vector<8x32xf32> to vector<8x8xf32>
    %248 = vector.extract_strided_slice %227 {offsets = [0, 8], sizes = [12, 8], strides = [1, 1]} : vector<12x64xf32> to vector<12x8xf32>
    %249 = vector.extract_strided_slice %227 {offsets = [0, 40], sizes = [12, 8], strides = [1, 1]} : vector<12x64xf32> to vector<12x8xf32>
    %cst_93 = arith.constant dense<0.000000e+00> : vector<8x12xf32>
    %250 = tpu.matmul %247, %248, %cst_93 {dimension_numbers = #tpu.dot_dimension_numbers<[1], [1], [0], [0], [0, 0, 1, 0], [], []>} : vector<8x8xf32>, vector<12x8xf32>, vector<8x12xf32> -> vector<8x12xf32>
    %cst_94 = arith.constant 0.353553385 : f32
    %251 = vector.broadcast %cst_94 : f32 to vector<8x12xf32>
    %252 = arith.mulf %250, %251 : vector<8x12xf32>
    %cst_95 = arith.constant dense<0xFF800000> : vector<8xf32>
    %253 = vector.multi_reduction <maximumf>, %252, %cst_95 [1] : vector<8x12xf32> to vector<8xf32>
    %254 = vector.shape_cast %253 : vector<8xf32> to vector<8x1xf32>
    %255 = vector.broadcast %254 : vector<8x1xf32> to vector<8x12xf32>
    %256 = arith.subf %252, %255 : vector<8x12xf32>
    %257 = math.exp %256 : vector<8x12xf32>
    %cst_96 = arith.constant dense<0.000000e+00> : vector<8xf32>
    %258 = vector.multi_reduction <add>, %257, %cst_96 [1] : vector<8x12xf32> to vector<8xf32>
    %259 = vector.shape_cast %258 : vector<8xf32> to vector<8x1xf32>
    %260 = tpu.reciprocal %259 : vector<8x1xf32> -> vector<8x1xf32>
    %261 = vector.broadcast %260 : vector<8x1xf32> to vector<8x12xf32>
    %262 = arith.mulf %257, %261 : vector<8x12xf32>
    %263 = arith.addf %243, %262 : vector<8x12xf32>
    %cst_97 = arith.constant dense<0.000000e+00> : vector<8x8xf32>
    %264 = tpu.matmul %262, %249, %cst_97 {dimension_numbers = #tpu.dot_dimension_numbers<[1], [0], [0], [1], [0, 0, 1, 1], [], []>} : vector<8x12xf32>, vector<12x8xf32>, vector<8x8xf32> -> vector<8x8xf32>
    %265 = vector.extract_strided_slice %225 {offsets = [8, 0], sizes = [8, 32], strides = [1, 1]} : vector<32x32xf32> to vector<8x32xf32>
    %cst_98 = arith.constant dense<0.000000e+00> : vector<8x32xf32>
    %266 = tpu.matmul %264, %265, %cst_98 {dimension_numbers = #tpu.dot_dimension_numbers<[1], [0], [0], [1], [0, 0, 1, 1], [], []>} : vector<8x8xf32>, vector<8x32xf32>, vector<8x32xf32> -> vector<8x32xf32>
    %267 = arith.addf %246, %266 : vector<8x32xf32>
    %268 = vector.extract_strided_slice %226 {offsets = [0, 16], sizes = [8, 8], strides = [1, 1]} : vector<8x32xf32> to vector<8x8xf32>
    %269 = vector.extract_strided_slice %227 {offsets = [0, 16], sizes = [12, 8], strides = [1, 1]} : vector<12x64xf32> to vector<12x8xf32>
    %270 = vector.extract_strided_slice %227 {offsets = [0, 48], sizes = [12, 8], strides = [1, 1]} : vector<12x64xf32> to vector<12x8xf32>
    %cst_99 = arith.constant dense<0.000000e+00> : vector<8x12xf32>
    %271 = tpu.matmul %268, %269, %cst_99 {dimension_numbers = #tpu.dot_dimension_numbers<[1], [1], [0], [0], [0, 0, 1, 0], [], []>} : vector<8x8xf32>, vector<12x8xf32>, vector<8x12xf32> -> vector<8x12xf32>
    %cst_100 = arith.constant 0.353553385 : f32
    %272 = vector.broadcast %cst_100 : f32 to vector<8x12xf32>
    %273 = arith.mulf %271, %272 : vector<8x12xf32>
    %cst_101 = arith.constant dense<0xFF800000> : vector<8xf32>
    %274 = vector.multi_reduction <maximumf>, %273, %cst_101 [1] : vector<8x12xf32> to vector<8xf32>
    %275 = vector.shape_cast %274 : vector<8xf32> to vector<8x1xf32>
    %276 = vector.broadcast %275 : vector<8x1xf32> to vector<8x12xf32>
    %277 = arith.subf %273, %276 : vector<8x12xf32>
    %278 = math.exp %277 : vector<8x12xf32>
    %cst_102 = arith.constant dense<0.000000e+00> : vector<8xf32>
    %279 = vector.multi_reduction <add>, %278, %cst_102 [1] : vector<8x12xf32> to vector<8xf32>
    %280 = vector.shape_cast %279 : vector<8xf32> to vector<8x1xf32>
    %281 = tpu.reciprocal %280 : vector<8x1xf32> -> vector<8x1xf32>
    %282 = vector.broadcast %281 : vector<8x1xf32> to vector<8x12xf32>
    %283 = arith.mulf %278, %282 : vector<8x12xf32>
    %284 = arith.addf %263, %283 : vector<8x12xf32>
    %cst_103 = arith.constant dense<0.000000e+00> : vector<8x8xf32>
    %285 = tpu.matmul %283, %270, %cst_103 {dimension_numbers = #tpu.dot_dimension_numbers<[1], [0], [0], [1], [0, 0, 1, 1], [], []>} : vector<8x12xf32>, vector<12x8xf32>, vector<8x8xf32> -> vector<8x8xf32>
    %286 = vector.extract_strided_slice %225 {offsets = [16, 0], sizes = [8, 32], strides = [1, 1]} : vector<32x32xf32> to vector<8x32xf32>
    %cst_104 = arith.constant dense<0.000000e+00> : vector<8x32xf32>
    %287 = tpu.matmul %285, %286, %cst_104 {dimension_numbers = #tpu.dot_dimension_numbers<[1], [0], [0], [1], [0, 0, 1, 1], [], []>} : vector<8x8xf32>, vector<8x32xf32>, vector<8x32xf32> -> vector<8x32xf32>
    %288 = arith.addf %267, %287 : vector<8x32xf32>
    %289 = vector.extract_strided_slice %226 {offsets = [0, 24], sizes = [8, 8], strides = [1, 1]} : vector<8x32xf32> to vector<8x8xf32>
    %290 = vector.extract_strided_slice %227 {offsets = [0, 24], sizes = [12, 8], strides = [1, 1]} : vector<12x64xf32> to vector<12x8xf32>
    %291 = vector.extract_strided_slice %227 {offsets = [0, 56], sizes = [12, 8], strides = [1, 1]} : vector<12x64xf32> to vector<12x8xf32>
    %cst_105 = arith.constant dense<0.000000e+00> : vector<8x12xf32>
    %292 = tpu.matmul %289, %290, %cst_105 {dimension_numbers = #tpu.dot_dimension_numbers<[1], [1], [0], [0], [0, 0, 1, 0], [], []>} : vector<8x8xf32>, vector<12x8xf32>, vector<8x12xf32> -> vector<8x12xf32>
    %cst_106 = arith.constant 0.353553385 : f32
    %293 = vector.broadcast %cst_106 : f32 to vector<8x12xf32>
    %294 = arith.mulf %292, %293 : vector<8x12xf32>
    %cst_107 = arith.constant dense<0xFF800000> : vector<8xf32>
    %295 = vector.multi_reduction <maximumf>, %294, %cst_107 [1] : vector<8x12xf32> to vector<8xf32>
    %296 = vector.shape_cast %295 : vector<8xf32> to vector<8x1xf32>
    %297 = vector.broadcast %296 : vector<8x1xf32> to vector<8x12xf32>
    %298 = arith.subf %294, %297 : vector<8x12xf32>
    %299 = math.exp %298 : vector<8x12xf32>
    %cst_108 = arith.constant dense<0.000000e+00> : vector<8xf32>
    %300 = vector.multi_reduction <add>, %299, %cst_108 [1] : vector<8x12xf32> to vector<8xf32>
    %301 = vector.shape_cast %300 : vector<8xf32> to vector<8x1xf32>
    %302 = tpu.reciprocal %301 : vector<8x1xf32> -> vector<8x1xf32>
    %303 = vector.broadcast %302 : vector<8x1xf32> to vector<8x12xf32>
    %304 = arith.mulf %299, %303 : vector<8x12xf32>
    %305 = arith.addf %284, %304 : vector<8x12xf32>
    %cst_109 = arith.constant dense<0.000000e+00> : vector<8x8xf32>
    %306 = tpu.matmul %304, %291, %cst_109 {dimension_numbers = #tpu.dot_dimension_numbers<[1], [0], [0], [1], [0, 0, 1, 1], [], []>} : vector<8x12xf32>, vector<12x8xf32>, vector<8x8xf32> -> vector<8x8xf32>
    %307 = vector.extract_strided_slice %225 {offsets = [24, 0], sizes = [8, 32], strides = [1, 1]} : vector<32x32xf32> to vector<8x32xf32>
    %cst_110 = arith.constant dense<0.000000e+00> : vector<8x32xf32>
    %308 = tpu.matmul %306, %307, %cst_110 {dimension_numbers = #tpu.dot_dimension_numbers<[1], [0], [0], [1], [0, 0, 1, 1], [], []>} : vector<8x8xf32>, vector<8x32xf32>, vector<8x32xf32> -> vector<8x32xf32>
    %309 = arith.addf %288, %308 : vector<8x32xf32>
    %cst_111 = arith.constant 2.500000e-01 : f32
    %310 = vector.broadcast %cst_111 : f32 to vector<8x12xf32>
    %311 = arith.mulf %305, %310 : vector<8x12xf32>
    %c0_112 = arith.constant 0 : index
    %c0_113 = arith.constant 0 : index
    %c0_114 = arith.constant 0 : index
    %312 = vector.load %arg21[%c0_112, %c0_113, %c0_114] : memref<2x8x12xf32, #tpu.memory_space<vmem>>, vector<1x8x12xf32>
    %313 = vector.shape_cast %312 : vector<1x8x12xf32> to vector<8x12xf32>
    %314 = vector.shape_cast %311 : vector<8x12xf32> to vector<1x8x12xf32>
    tpu.vector_store %arg21[%c0_112, %c0_113, %c0_114], %314 {strides = array<i32>} : memref<2x8x12xf32, #tpu.memory_space<vmem>>, vector<1x8x12xf32>,
    %315 = vector.extract_strided_slice %219 {offsets = [8, 0], sizes = [8, 32], strides = [1, 1]} : vector<16x32xf32> to vector<8x32xf32>
    %316 = vector.extract_strided_slice %224 {offsets = [12, 0], sizes = [12, 64], strides = [1, 1]} : vector<24x64xf32> to vector<12x64xf32>
    %317 = vector.extract_strided_slice %315 {offsets = [0, 0], sizes = [8, 8], strides = [1, 1]} : vector<8x32xf32> to vector<8x8xf32>
    %318 = vector.extract_strided_slice %316 {offsets = [0, 0], sizes = [12, 8], strides = [1, 1]} : vector<12x64xf32> to vector<12x8xf32>
    %319 = vector.extract_strided_slice %316 {offsets = [0, 32], sizes = [12, 8], strides = [1, 1]} : vector<12x64xf32> to vector<12x8xf32>
    %cst_115 = arith.constant dense<0.000000e+00> : vector<8x12xf32>
    %320 = tpu.matmul %317, %318, %cst_115 {dimension_numbers = #tpu.dot_dimension_numbers<[1], [1], [0], [0], [0, 0, 1, 0], [], []>} : vector<8x8xf32>, vector<12x8xf32>, vector<8x12xf32> -> vector<8x12xf32>
    %cst_116 = arith.constant 0.353553385 : f32
    %321 = vector.broadcast %cst_116 : f32 to vector<8x12xf32>
    %322 = arith.mulf %320, %321 : vector<8x12xf32>
    %cst_117 = arith.constant dense<0xFF800000> : vector<8xf32>
    %323 = vector.multi_reduction <maximumf>, %322, %cst_117 [1] : vector<8x12xf32> to vector<8xf32>
    %324 = vector.shape_cast %323 : vector<8xf32> to vector<8x1xf32>
    %325 = vector.broadcast %324 : vector<8x1xf32> to vector<8x12xf32>
    %326 = arith.subf %322, %325 : vector<8x12xf32>
    %327 = math.exp %326 : vector<8x12xf32>
    %cst_118 = arith.constant dense<0.000000e+00> : vector<8xf32>
    %328 = vector.multi_reduction <add>, %327, %cst_118 [1] : vector<8x12xf32> to vector<8xf32>
    %329 = vector.shape_cast %328 : vector<8xf32> to vector<8x1xf32>
    %330 = tpu.reciprocal %329 : vector<8x1xf32> -> vector<8x1xf32>
    %331 = vector.broadcast %330 : vector<8x1xf32> to vector<8x12xf32>
    %332 = arith.mulf %327, %331 : vector<8x12xf32>
    %cst_119 = arith.constant dense<0.000000e+00> : vector<8x8xf32>
    %333 = tpu.matmul %332, %319, %cst_119 {dimension_numbers = #tpu.dot_dimension_numbers<[1], [0], [0], [1], [0, 0, 1, 1], [], []>} : vector<8x12xf32>, vector<12x8xf32>, vector<8x8xf32> -> vector<8x8xf32>
    %334 = vector.extract_strided_slice %225 {offsets = [0, 0], sizes = [8, 32], strides = [1, 1]} : vector<32x32xf32> to vector<8x32xf32>
    %cst_120 = arith.constant dense<0.000000e+00> : vector<8x32xf32>
    %335 = tpu.matmul %333, %334, %cst_120 {dimension_numbers = #tpu.dot_dimension_numbers<[1], [0], [0], [1], [0, 0, 1, 1], [], []>} : vector<8x8xf32>, vector<8x32xf32>, vector<8x32xf32> -> vector<8x32xf32>
    %336 = vector.extract_strided_slice %315 {offsets = [0, 8], sizes = [8, 8], strides = [1, 1]} : vector<8x32xf32> to vector<8x8xf32>
    %337 = vector.extract_strided_slice %316 {offsets = [0, 8], sizes = [12, 8], strides = [1, 1]} : vector<12x64xf32> to vector<12x8xf32>
    %338 = vector.extract_strided_slice %316 {offsets = [0, 40], sizes = [12, 8], strides = [1, 1]} : vector<12x64xf32> to vector<12x8xf32>
    %cst_121 = arith.constant dense<0.000000e+00> : vector<8x12xf32>
    %339 = tpu.matmul %336, %337, %cst_121 {dimension_numbers = #tpu.dot_dimension_numbers<[1], [1], [0], [0], [0, 0, 1, 0], [], []>} : vector<8x8xf32>, vector<12x8xf32>, vector<8x12xf32> -> vector<8x12xf32>
    %cst_122 = arith.constant 0.353553385 : f32
    %340 = vector.broadcast %cst_122 : f32 to vector<8x12xf32>
    %341 = arith.mulf %339, %340 : vector<8x12xf32>
    %cst_123 = arith.constant dense<0xFF800000> : vector<8xf32>
    %342 = vector.multi_reduction <maximumf>, %341, %cst_123 [1] : vector<8x12xf32> to vector<8xf32>
    %343 = vector.shape_cast %342 : vector<8xf32> to vector<8x1xf32>
    %344 = vector.broadcast %343 : vector<8x1xf32> to vector<8x12xf32>
    %345 = arith.subf %341, %344 : vector<8x12xf32>
    %346 = math.exp %345 : vector<8x12xf32>
    %cst_124 = arith.constant dense<0.000000e+00> : vector<8xf32>
    %347 = vector.multi_reduction <add>, %346, %cst_124 [1] : vector<8x12xf32> to vector<8xf32>
    %348 = vector.shape_cast %347 : vector<8xf32> to vector<8x1xf32>
    %349 = tpu.reciprocal %348 : vector<8x1xf32> -> vector<8x1xf32>
    %350 = vector.broadcast %349 : vector<8x1xf32> to vector<8x12xf32>
    %351 = arith.mulf %346, %350 : vector<8x12xf32>
    %352 = arith.addf %332, %351 : vector<8x12xf32>
    %cst_125 = arith.constant dense<0.000000e+00> : vector<8x8xf32>
    %353 = tpu.matmul %351, %338, %cst_125 {dimension_numbers = #tpu.dot_dimension_numbers<[1], [0], [0], [1], [0, 0, 1, 1], [], []>} : vector<8x12xf32>, vector<12x8xf32>, vector<8x8xf32> -> vector<8x8xf32>
    %354 = vector.extract_strided_slice %225 {offsets = [8, 0], sizes = [8, 32], strides = [1, 1]} : vector<32x32xf32> to vector<8x32xf32>
    %cst_126 = arith.constant dense<0.000000e+00> : vector<8x32xf32>
    %355 = tpu.matmul %353, %354, %cst_126 {dimension_numbers = #tpu.dot_dimension_numbers<[1], [0], [0], [1], [0, 0, 1, 1], [], []>} : vector<8x8xf32>, vector<8x32xf32>, vector<8x32xf32> -> vector<8x32xf32>
    %356 = arith.addf %335, %355 : vector<8x32xf32>
    %357 = vector.extract_strided_slice %315 {offsets = [0, 16], sizes = [8, 8], strides = [1, 1]} : vector<8x32xf32> to vector<8x8xf32>
    %358 = vector.extract_strided_slice %316 {offsets = [0, 16], sizes = [12, 8], strides = [1, 1]} : vector<12x64xf32> to vector<12x8xf32>
    %359 = vector.extract_strided_slice %316 {offsets = [0, 48], sizes = [12, 8], strides = [1, 1]} : vector<12x64xf32> to vector<12x8xf32>
    %cst_127 = arith.constant dense<0.000000e+00> : vector<8x12xf32>
    %360 = tpu.matmul %357, %358, %cst_127 {dimension_numbers = #tpu.dot_dimension_numbers<[1], [1], [0], [0], [0, 0, 1, 0], [], []>} : vector<8x8xf32>, vector<12x8xf32>, vector<8x12xf32> -> vector<8x12xf32>
    %cst_128 = arith.constant 0.353553385 : f32
    %361 = vector.broadcast %cst_128 : f32 to vector<8x12xf32>
    %362 = arith.mulf %360, %361 : vector<8x12xf32>
    %cst_129 = arith.constant dense<0xFF800000> : vector<8xf32>
    %363 = vector.multi_reduction <maximumf>, %362, %cst_129 [1] : vector<8x12xf32> to vector<8xf32>
    %364 = vector.shape_cast %363 : vector<8xf32> to vector<8x1xf32>
    %365 = vector.broadcast %364 : vector<8x1xf32> to vector<8x12xf32>
    %366 = arith.subf %362, %365 : vector<8x12xf32>
    %367 = math.exp %366 : vector<8x12xf32>
    %cst_130 = arith.constant dense<0.000000e+00> : vector<8xf32>
    %368 = vector.multi_reduction <add>, %367, %cst_130 [1] : vector<8x12xf32> to vector<8xf32>
    %369 = vector.shape_cast %368 : vector<8xf32> to vector<8x1xf32>
    %370 = tpu.reciprocal %369 : vector<8x1xf32> -> vector<8x1xf32>
    %371 = vector.broadcast %370 : vector<8x1xf32> to vector<8x12xf32>
    %372 = arith.mulf %367, %371 : vector<8x12xf32>
    %373 = arith.addf %352, %372 : vector<8x12xf32>
    %cst_131 = arith.constant dense<0.000000e+00> : vector<8x8xf32>
    %374 = tpu.matmul %372, %359, %cst_131 {dimension_numbers = #tpu.dot_dimension_numbers<[1], [0], [0], [1], [0, 0, 1, 1], [], []>} : vector<8x12xf32>, vector<12x8xf32>, vector<8x8xf32> -> vector<8x8xf32>
    %375 = vector.extract_strided_slice %225 {offsets = [16, 0], sizes = [8, 32], strides = [1, 1]} : vector<32x32xf32> to vector<8x32xf32>
    %cst_132 = arith.constant dense<0.000000e+00> : vector<8x32xf32>
    %376 = tpu.matmul %374, %375, %cst_132 {dimension_numbers = #tpu.dot_dimension_numbers<[1], [0], [0], [1], [0, 0, 1, 1], [], []>} : vector<8x8xf32>, vector<8x32xf32>, vector<8x32xf32> -> vector<8x32xf32>
    %377 = arith.addf %356, %376 : vector<8x32xf32>
    %378 = vector.extract_strided_slice %315 {offsets = [0, 24], sizes = [8, 8], strides = [1, 1]} : vector<8x32xf32> to vector<8x8xf32>
    %379 = vector.extract_strided_slice %316 {offsets = [0, 24], sizes = [12, 8], strides = [1, 1]} : vector<12x64xf32> to vector<12x8xf32>
    %380 = vector.extract_strided_slice %316 {offsets = [0, 56], sizes = [12, 8], strides = [1, 1]} : vector<12x64xf32> to vector<12x8xf32>
    %cst_133 = arith.constant dense<0.000000e+00> : vector<8x12xf32>
    %381 = tpu.matmul %378, %379, %cst_133 {dimension_numbers = #tpu.dot_dimension_numbers<[1], [1], [0], [0], [0, 0, 1, 0], [], []>} : vector<8x8xf32>, vector<12x8xf32>, vector<8x12xf32> -> vector<8x12xf32>
    %cst_134 = arith.constant 0.353553385 : f32
    %382 = vector.broadcast %cst_134 : f32 to vector<8x12xf32>
    %383 = arith.mulf %381, %382 : vector<8x12xf32>
    %cst_135 = arith.constant dense<0xFF800000> : vector<8xf32>
    %384 = vector.multi_reduction <maximumf>, %383, %cst_135 [1] : vector<8x12xf32> to vector<8xf32>
    %385 = vector.shape_cast %384 : vector<8xf32> to vector<8x1xf32>
    %386 = vector.broadcast %385 : vector<8x1xf32> to vector<8x12xf32>
    %387 = arith.subf %383, %386 : vector<8x12xf32>
    %388 = math.exp %387 : vector<8x12xf32>
    %cst_136 = arith.constant dense<0.000000e+00> : vector<8xf32>
    %389 = vector.multi_reduction <add>, %388, %cst_136 [1] : vector<8x12xf32> to vector<8xf32>
    %390 = vector.shape_cast %389 : vector<8xf32> to vector<8x1xf32>
    %391 = tpu.reciprocal %390 : vector<8x1xf32> -> vector<8x1xf32>
    %392 = vector.broadcast %391 : vector<8x1xf32> to vector<8x12xf32>
    %393 = arith.mulf %388, %392 : vector<8x12xf32>
    %394 = arith.addf %373, %393 : vector<8x12xf32>
    %cst_137 = arith.constant dense<0.000000e+00> : vector<8x8xf32>
    %395 = tpu.matmul %393, %380, %cst_137 {dimension_numbers = #tpu.dot_dimension_numbers<[1], [0], [0], [1], [0, 0, 1, 1], [], []>} : vector<8x12xf32>, vector<12x8xf32>, vector<8x8xf32> -> vector<8x8xf32>
    %396 = vector.extract_strided_slice %225 {offsets = [24, 0], sizes = [8, 32], strides = [1, 1]} : vector<32x32xf32> to vector<8x32xf32>
    %cst_138 = arith.constant dense<0.000000e+00> : vector<8x32xf32>
    %397 = tpu.matmul %395, %396, %cst_138 {dimension_numbers = #tpu.dot_dimension_numbers<[1], [0], [0], [1], [0, 0, 1, 1], [], []>} : vector<8x8xf32>, vector<8x32xf32>, vector<8x32xf32> -> vector<8x32xf32>
    %398 = arith.addf %377, %397 : vector<8x32xf32>
    %cst_139 = arith.constant 2.500000e-01 : f32
    %399 = vector.broadcast %cst_139 : f32 to vector<8x12xf32>
    %400 = arith.mulf %394, %399 : vector<8x12xf32>
    %c1_140 = arith.constant 1 : index
    %c0_141 = arith.constant 0 : index
    %c0_142 = arith.constant 0 : index
    %401 = vector.load %arg21[%c1_140, %c0_141, %c0_142] : memref<2x8x12xf32, #tpu.memory_space<vmem>>, vector<1x8x12xf32>
    %402 = vector.shape_cast %401 : vector<1x8x12xf32> to vector<8x12xf32>
    %403 = vector.shape_cast %400 : vector<8x12xf32> to vector<1x8x12xf32>
    tpu.vector_store %arg21[%c1_140, %c0_141, %c0_142], %403 {strides = array<i32>} : memref<2x8x12xf32, #tpu.memory_space<vmem>>, vector<1x8x12xf32>,
    %404 = tpu.concatenate %309, %398 in 0 : vector<8x32xf32>, vector<8x32xf32> -> vector<16x32xf32>
    %c0_143 = arith.constant 0 : index
    %c0_144 = arith.constant 0 : index
    %405 = vector.load %arg12[%c0_143, %c0_144] : memref<1x32xf32, #tpu.memory_space<vmem>>, vector<1x32xf32>
    %406 = vector.broadcast %405 : vector<1x32xf32> to vector<16x32xf32>
    %407 = arith.addf %404, %406 : vector<16x32xf32>
    %408 = arith.addf %214, %407 : vector<16x32xf32>
    %409 = vector.extract_strided_slice %2 {offsets = [1, 0], sizes = [1, 32], strides = [1, 1]} : vector<3x32xf32> to vector<1x32xf32>
    %410 = vector.extract_strided_slice %3 {offsets = [1, 0], sizes = [1, 32], strides = [1, 1]} : vector<3x32xf32> to vector<1x32xf32>
    %cst_145 = arith.constant dense<0.000000e+00> : vector<16xf32>
    %411 = vector.multi_reduction <add>, %408, %cst_145 [1] : vector<16x32xf32> to vector<16xf32>
    %412 = vector.shape_cast %411 : vector<16xf32> to vector<16x1xf32>
    %cst_146 = arith.constant 3.200000e+01 : f32
    %413 = vector.broadcast %cst_146 : f32 to vector<16x1xf32>
    %414 = arith.divf %412, %413 : vector<16x1xf32>
    %415 = vector.broadcast %414 : vector<16x1xf32> to vector<16x32xf32>
    %416 = arith.subf %408, %415 : vector<16x32xf32>
    %417 = arith.mulf %416, %416 : vector<16x32xf32>
    %cst_147 = arith.constant dense<0.000000e+00> : vector<16xf32>
    %418 = vector.multi_reduction <add>, %417, %cst_147 [1] : vector<16x32xf32> to vector<16xf32>
    %419 = vector.shape_cast %418 : vector<16xf32> to vector<16x1xf32>
    %cst_148 = arith.constant 3.200000e+01 : f32
    %420 = vector.broadcast %cst_148 : f32 to vector<16x1xf32>
    %421 = arith.divf %419, %420 : vector<16x1xf32>
    %cst_149 = arith.constant 9.99999974E-6 : f32
    %422 = vector.broadcast %cst_149 : f32 to vector<16x1xf32>
    %423 = arith.addf %421, %422 : vector<16x1xf32>
    %424 = math.rsqrt %423 : vector<16x1xf32>
    %425 = vector.broadcast %424 : vector<16x1xf32> to vector<16x32xf32>
    %426 = arith.mulf %416, %425 : vector<16x32xf32>
    %427 = vector.broadcast %409 : vector<1x32xf32> to vector<16x32xf32>
    %428 = arith.mulf %426, %427 : vector<16x32xf32>
    %429 = vector.broadcast %410 : vector<1x32xf32> to vector<16x32xf32>
    %430 = arith.addf %428, %429 : vector<16x32xf32>
    %c0_150 = arith.constant 0 : index
    %c0_151 = arith.constant 0 : index
    %431 = vector.load %arg13[%c0_150, %c0_151] : memref<32x64xf32, #tpu.memory_space<vmem>>, vector<32x64xf32>
    %cst_152 = arith.constant dense<0.000000e+00> : vector<16x64xf32>
    %432 = tpu.matmul %430, %431, %cst_152 {dimension_numbers = #tpu.dot_dimension_numbers<[1], [0], [0], [1], [0, 0, 1, 1], [], []>} : vector<16x32xf32>, vector<32x64xf32>, vector<16x64xf32> -> vector<16x64xf32>
    %c0_153 = arith.constant 0 : index
    %c0_154 = arith.constant 0 : index
    %433 = vector.load %arg14[%c0_153, %c0_154] : memref<1x64xf32, #tpu.memory_space<vmem>>, vector<1x64xf32>
    %434 = vector.broadcast %433 : vector<1x64xf32> to vector<16x64xf32>
    %435 = arith.addf %432, %434 : vector<16x64xf32>
    %cst_155 = arith.constant 0.000000e+00 : f32
    %436 = vector.broadcast %cst_155 : f32 to vector<16x64xf32>
    %437 = arith.maximumf %435, %436 : vector<16x64xf32>
    %c0_156 = arith.constant 0 : index
    %c0_157 = arith.constant 0 : index
    %438 = vector.load %arg15[%c0_156, %c0_157] : memref<64x32xf32, #tpu.memory_space<vmem>>, vector<64x32xf32>
    %cst_158 = arith.constant dense<0.000000e+00> : vector<16x32xf32>
    %439 = tpu.matmul %437, %438, %cst_158 {dimension_numbers = #tpu.dot_dimension_numbers<[1], [0], [0], [1], [0, 0, 1, 1], [], []>} : vector<16x64xf32>, vector<64x32xf32>, vector<16x32xf32> -> vector<16x32xf32>
    %c0_159 = arith.constant 0 : index
    %c0_160 = arith.constant 0 : index
    %440 = vector.load %arg16[%c0_159, %c0_160] : memref<1x32xf32, #tpu.memory_space<vmem>>, vector<1x32xf32>
    %441 = vector.broadcast %440 : vector<1x32xf32> to vector<16x32xf32>
    %442 = arith.addf %439, %441 : vector<16x32xf32>
    %443 = arith.addf %430, %442 : vector<16x32xf32>
    %444 = vector.extract_strided_slice %2 {offsets = [2, 0], sizes = [1, 32], strides = [1, 1]} : vector<3x32xf32> to vector<1x32xf32>
    %445 = vector.extract_strided_slice %3 {offsets = [2, 0], sizes = [1, 32], strides = [1, 1]} : vector<3x32xf32> to vector<1x32xf32>
    %cst_161 = arith.constant dense<0.000000e+00> : vector<16xf32>
    %446 = vector.multi_reduction <add>, %443, %cst_161 [1] : vector<16x32xf32> to vector<16xf32>
    %447 = vector.shape_cast %446 : vector<16xf32> to vector<16x1xf32>
    %cst_162 = arith.constant 3.200000e+01 : f32
    %448 = vector.broadcast %cst_162 : f32 to vector<16x1xf32>
    %449 = arith.divf %447, %448 : vector<16x1xf32>
    %450 = vector.broadcast %449 : vector<16x1xf32> to vector<16x32xf32>
    %451 = arith.subf %443, %450 : vector<16x32xf32>
    %452 = arith.mulf %451, %451 : vector<16x32xf32>
    %cst_163 = arith.constant dense<0.000000e+00> : vector<16xf32>
    %453 = vector.multi_reduction <add>, %452, %cst_163 [1] : vector<16x32xf32> to vector<16xf32>
    %454 = vector.shape_cast %453 : vector<16xf32> to vector<16x1xf32>
    %cst_164 = arith.constant 3.200000e+01 : f32
    %455 = vector.broadcast %cst_164 : f32 to vector<16x1xf32>
    %456 = arith.divf %454, %455 : vector<16x1xf32>
    %cst_165 = arith.constant 9.99999974E-6 : f32
    %457 = vector.broadcast %cst_165 : f32 to vector<16x1xf32>
    %458 = arith.addf %456, %457 : vector<16x1xf32>
    %459 = math.rsqrt %458 : vector<16x1xf32>
    %460 = vector.broadcast %459 : vector<16x1xf32> to vector<16x32xf32>
    %461 = arith.mulf %451, %460 : vector<16x32xf32>
    %462 = vector.broadcast %444 : vector<1x32xf32> to vector<16x32xf32>
    %463 = arith.mulf %461, %462 : vector<16x32xf32>
    %464 = vector.broadcast %445 : vector<1x32xf32> to vector<16x32xf32>
    %465 = arith.addf %463, %464 : vector<16x32xf32>
    %c0_166 = arith.constant 0 : index
    %c0_167 = arith.constant 0 : index
    %466 = vector.load %arg19[%c0_166, %c0_167] : memref<16x32xf32, #tpu.memory_space<vmem>>, vector<16x32xf32>
    tpu.vector_store %arg19[%c0_166, %c0_167], %465 {strides = array<i32>} : memref<16x32xf32, #tpu.memory_space<vmem>>, vector<16x32xf32>,
    return
  }
  func.func @transform_0(%arg0: i32) -> (i32, i32) {
    %c0_i32 = arith.constant 0 : i32
    %c0_i32_0 = arith.constant 0 : i32
    return %arg0, %c0_i32 : i32, i32
  }
  func.func @transform_1(%arg0: i32) -> (i32, i32) {
    %c0_i32 = arith.constant 0 : i32
    %c0_i32_0 = arith.constant 0 : i32
    return %arg0, %c0_i32 : i32, i32
  }
  func.func @transform_2(%arg0: i32) -> (i32, i32) {
    %c0_i32 = arith.constant 0 : i32
    %c0_i32_0 = arith.constant 0 : i32
    %c0_i32_1 = arith.constant 0 : i32
    return %c0_i32, %c0_i32_0 : i32, i32
  }
  func.func @transform_3(%arg0: i32) -> (i32, i32) {
    %c0_i32 = arith.constant 0 : i32
    %c0_i32_0 = arith.constant 0 : i32
    %c0_i32_1 = arith.constant 0 : i32
    return %c0_i32, %c0_i32_0 : i32, i32
  }
  func.func @transform_4(%arg0: i32) -> (i32, i32) {
    %c0_i32 = arith.constant 0 : i32
    %c0_i32_0 = arith.constant 0 : i32
    %c0_i32_1 = arith.constant 0 : i32
    return %c0_i32, %c0_i32_0 : i32, i32
  }
  func.func @transform_5(%arg0: i32) -> (i32, i32) {
    %c0_i32 = arith.constant 0 : i32
    %c0_i32_0 = arith.constant 0 : i32
    %c0_i32_1 = arith.constant 0 : i32
    return %c0_i32, %c0_i32_0 : i32, i32
  }
  func.func @transform_6(%arg0: i32) -> (i32, i32) {
    %c0_i32 = arith.constant 0 : i32
    %c0_i32_0 = arith.constant 0 : i32
    %c0_i32_1 = arith.constant 0 : i32
    return %c0_i32, %c0_i32_0 : i32, i32
  }
  func.func @transform_7(%arg0: i32) -> (i32, i32) {
    %c0_i32 = arith.constant 0 : i32
    %c0_i32_0 = arith.constant 0 : i32
    %c0_i32_1 = arith.constant 0 : i32
    return %c0_i32, %c0_i32_0 : i32, i32
  }
  func.func @transform_8(%arg0: i32) -> (i32, i32) {
    %c0_i32 = arith.constant 0 : i32
    %c0_i32_0 = arith.constant 0 : i32
    %c0_i32_1 = arith.constant 0 : i32
    return %c0_i32, %c0_i32_0 : i32, i32
  }
  func.func @transform_9(%arg0: i32) -> (i32, i32) {
    %c0_i32 = arith.constant 0 : i32
    %c0_i32_0 = arith.constant 0 : i32
    %c0_i32_1 = arith.constant 0 : i32
    return %c0_i32, %c0_i32_0 : i32, i32
  }
  func.func @transform_10(%arg0: i32) -> (i32, i32) {
    %c0_i32 = arith.constant 0 : i32
    %c0_i32_0 = arith.constant 0 : i32
    %c0_i32_1 = arith.constant 0 : i32
    return %c0_i32, %c0_i32_0 : i32, i32
  }
  func.func @transform_11(%arg0: i32) -> (i32, i32) {
    %c0_i32 = arith.constant 0 : i32
    %c0_i32_0 = arith.constant 0 : i32
    %c0_i32_1 = arith.constant 0 : i32
    return %c0_i32, %c0_i32_0 : i32, i32
  }
  func.func @transform_12(%arg0: i32) -> (i32, i32) {
    %c0_i32 = arith.constant 0 : i32
    %c0_i32_0 = arith.constant 0 : i32
    %c0_i32_1 = arith.constant 0 : i32
    return %c0_i32, %c0_i32_0 : i32, i32
  }
  func.func @transform_13(%arg0: i32) -> (i32, i32) {
    %c0_i32 = arith.constant 0 : i32
    %c0_i32_0 = arith.constant 0 : i32
    %c0_i32_1 = arith.constant 0 : i32
    return %c0_i32, %c0_i32_0 : i32, i32
  }
  func.func @transform_14(%arg0: i32) -> (i32, i32) {
    %c0_i32 = arith.constant 0 : i32
    %c0_i32_0 = arith.constant 0 : i32
    %c0_i32_1 = arith.constant 0 : i32
    return %c0_i32, %c0_i32_0 : i32, i32
  }
  func.func @transform_15(%arg0: i32) -> (i32, i32) {
    %c0_i32 = arith.constant 0 : i32
    %c0_i32_0 = arith.constant 0 : i32
    %c0_i32_1 = arith.constant 0 : i32
    return %c0_i32, %c0_i32_0 : i32, i32
  }
  func.func @transform_16(%arg0: i32) -> (i32, i32) {
    %c0_i32 = arith.constant 0 : i32
    %c0_i32_0 = arith.constant 0 : i32
    %c0_i32_1 = arith.constant 0 : i32
    return %c0_i32, %c0_i32_0 : i32, i32
  }
  func.func @transform_17(%arg0: i32) -> (i32, i32) {
    %c0_i32 = arith.constant 0 : i32
    %c0_i32_0 = arith.constant 0 : i32
    %c0_i32_1 = arith.constant 0 : i32
    return %c0_i32, %c0_i32_0 : i32, i32
  }
  func.func @transform_18(%arg0: i32) -> (i32, i32) {
    %c0_i32 = arith.constant 0 : i32
    %c0_i32_0 = arith.constant 0 : i32
    return %arg0, %c0_i32 : i32, i32
  }
  func.func @transform_19(%arg0: i32) -> (i32, i32, i32) {
    %c0_i32 = arith.constant 0 : i32
    %c0_i32_0 = arith.constant 0 : i32
    %c0_i32_1 = arith.constant 0 : i32
    return %arg0, %c0_i32, %c0_i32_0 : i32, i32, i32
  }
  func.func @transform_20(%arg0: i32) -> (i32, i32, i32) {
    %c0_i32 = arith.constant 0 : i32
    %c0_i32_0 = arith.constant 0 : i32
    %c0_i32_1 = arith.constant 0 : i32
    return %arg0, %c0_i32, %c0_i32_0 : i32, i32, i32
  }
}

</mosaic_0001>

<bundles_post_ra>
// kernel: tpu_custom_call.1
= control target key start
LH: loop header
LB: loop body
LE: loop exit
PB: predicated region body
PF: predicated region fallthrough
CT: control target
= control target key end

     0   :  { %s6454_s0 = inlined_call_operand.hbm [shape: f32[16,32], index: 0, kind: input, shape index: {}]   ;;  %s6455_s1 = inlined_call_operand.hbm [shape: f32[24,32], index: 1, kind: input, shape index: {}]   ;;  %s6456_s2 = inlined_call_operand.vmem [shape: f32[32,96], index: 2, kind: input, shape index: {}]   ;;  %s6457_s3 = inlined_call_operand.vmem [shape: f32[1,96], index: 3, kind: input, shape index: {}]   ;;  %s6458_s4 = inlined_call_operand.vmem [shape: f32[32,32], index: 4, kind: input, shape index: {}]   ;;  %s6459_s5 = inlined_call_operand.hbm [shape: f32[1,32], index: 5, kind: input, shape index: {}]   ;;  %s6460_s6 = inlined_call_operand.vmem [shape: f32[32,32], index: 6, kind: input, shape index: {}]   ;;  %s6461_s7 = inlined_call_operand.vmem [shape: f32[1,32], index: 7, kind: input, shape index: {}]   ;;  %s6462_s8 = inlined_call_operand.hbm [shape: f32[32,64], index: 8, kind: input, shape index: {}]   ;;  %s6463_s9 = inlined_call_operand.vmem [shape: f32[1,64], index: 9, kind: input, shape index: {}]   ;;  %s6464_s10 = inlined_call_operand.hbm [shape: f32[32,32], index: 10, kind: input, shape index: {}]   ;;  %s6465_s11 = inlined_call_operand.vmem [shape: f32[1,32], index: 11, kind: input, shape index: {}]   ;;  %s6466_s12 = inlined_call_operand.hbm [shape: f32[32,64], index: 12, kind: input, shape index: {}]   ;;  %s6467_s13 = inlined_call_operand.vmem [shape: f32[1,64], index: 13, kind: input, shape index: {}]   ;;  %s6468_s14 = inlined_call_operand.vmem [shape: f32[64,32], index: 14, kind: input, shape index: {}]   ;;  %s6469_s15 = inlined_call_operand.vmem [shape: f32[1,32], index: 15, kind: input, shape index: {}]   ;;  %s6470_s16 = inlined_call_operand.vmem [shape: f32[3,32], index: 16, kind: input, shape index: {}]   ;;  %s6471_s17 = inlined_call_operand.vmem [shape: f32[3,32], index: 17, kind: input, shape index: {}]   ;;  %s6472_s18 = inlined_call_operand.hbm [shape: f32[16,32], index: 18, kind: output, shape index: {0}]   ;;  %s6473_s19 = inlined_call_operand.hbm [shape: f32[2,8,8], index: 19, kind: output, shape index: {1}]   ;;  %s6474_s20 = inlined_call_operand.hbm [shape: f32[2,8,12], index: 20, kind: output, shape index: {2}]  }
   0x1   :  { %6477 = sst [smem:[#allocation23_spill]] %s6454_s0 }
   0x2   :  { %6478 = sst [smem:[#allocation24_spill]] %s6455_s1 }
   0x3   :  { %6479 = sst [smem:[#allocation25_spill]] %s6456_s2 }
   0x4   :  { %6480 = sst [smem:[#allocation26_spill]] %s6457_s3 }
   0x5   :  { %6481 = sst [smem:[#allocation27_spill]] %s6458_s4 }
   0x6   :  { %26 = vsyncpa [#allocation3], 0 }
   0x7   :  { %27 = vsyncpa [#allocation6], 0 }
   0x8   :  { %28 = vsyncpa [#allocation9], 0 }
   0x9   :  { %29 = vsyncpa [#allocation12], 0 }
   0xa   :  { %30 = vsyncpa [#allocation4], 0 }
   0xb   :  { %31 = vsyncpa [#allocation15], 0  ;;  %s5622_s1 = smov [#allocation5]   ;;  %s5623_s23 = smov [#allocation8]  }
   0xc   :  { %s49_s22 = sshll.u32 %s5622_s1, 4  ;;  %s81_s24 = sshll.u32 %s5623_s23, 4  ;;  %s50_s22 = int_to_ptr.vmem [resolvable:$true] %s49_s22  ;;  %s82_s24 = int_to_ptr.vmem [resolvable:$true] %s81_s24 }
   0xd   :  { %s5438_s2 = scalar_lea.vmem %s50_s22, 384  ;;  %p5443_p1 = scmp.lt.s32.totalorder %s50_s22, %s50_s22 }
   0xe   :  { %p5439_p0 = scmp.ne.s32.totalorder %s50_s22, %s5438_s2  ;;  %p5444_p2 = scmp.lt.s32.totalorder %s5438_s2, %s5438_s2 }
  0x10   :  { %p5445_p3 = por %p5444_p2, %p5443_p1 }
  0x12   :  { %p5446_p4 = pnand %p5445_p3, %p5439_p0 }
  0x14   :  { %5449 = shalt.err (!%p5446_p4)
}
  0x15   :  { %s5624_s25 = smov 128   ;;  %s5625_s3 = smov 8  }
  0x16   :  { %s6482_s28 = sld [smem:[#allocation24_spill]]  ;;  %s5458_s4 = scalar_lea.vmem %s82_s24, 512 }
  0x17   :  { %p5459_p5 = scmp.ne.s32.totalorder %s82_s24, %s5458_s4  ;;  %p5463_p6 = scmp.lt.s32.totalorder %s82_s24, %s82_s24 }
  0x18   :  { %p5464_p7 = scmp.lt.s32.totalorder %s5458_s4, %s5458_s4 }
  0x1a   :  { %p5465_p8 = por %p5464_p7, %p5463_p6 }
  0x1c   :  { %55 = dma.hbm_to_vmem [thread:$0]  %s6482_s28, 384, %s50_s22, [#allocation6], %s5624_s25, %s5624_s25, %s5625_s3  }
  0x1d   :  { %p5466_p9 = pnand %p5465_p8, %p5459_p5 }
  0x1f   :  { %5469 = shalt.err (!%p5466_p9)
}
  0x20   :  { %87 = dma.hbm_to_vmem [thread:$0]  %s6462_s8, 512, %s82_s24, [#allocation9], %s5624_s25, %s5624_s25, %s5625_s3  }
  0x21   :  { %s5626_s0 = smov [#allocation2]   ;;  %s5627_s1 = smov [#allocation7]  }
  0x22   :  { %s37_s21 = sshll.u32 %s5626_s0, 4  ;;  %s68_s23 = sshll.u32 %s5627_s1, 4  ;;  %s38_s21 = int_to_ptr.vmem [resolvable:$true] %s37_s21  ;;  %s69_s23 = int_to_ptr.vmem [resolvable:$true] %s68_s23 }
  0x23   :  { %s5478_s22 = scalar_lea.vmem %s38_s21, 256  ;;  %p5483_p11 = scmp.lt.s32.totalorder %s38_s21, %s38_s21 }
  0x24   :  { %p5479_p10 = scmp.ne.s32.totalorder %s38_s21, %s5478_s22  ;;  %p5484_p12 = scmp.lt.s32.totalorder %s5478_s22, %s5478_s22 }
  0x26   :  { %p5485_p13 = por %p5484_p12, %p5483_p11 }
  0x28   :  { %p5486_p0 = pnand %p5485_p13, %p5479_p10 }
  0x2a   :  { %5489 = shalt.err (!%p5486_p0)
}
  0x2b   :  { %s6483_s27 = sld [smem:[#allocation23_spill]]  ;;  %s5498_s8 = scalar_lea.vmem %s69_s23, 16 }
  0x2c   :  { %p5499_p1 = scmp.ne.s32.totalorder %s69_s23, %s5498_s8  ;;  %s5502_s24 = scalar_lea.vmem %s69_s23, 32 }
  0x2d   :  { %p5503_p2 = scmp.lt.s32.totalorder %s69_s23, %s69_s23  ;;  %p5504_p3 = scmp.lt.s32.totalorder %s5502_s24, %s5498_s8 }
  0x2f   :  { %p5505_p4 = por %p5504_p3, %p5503_p2 }
  0x31   :  { %43 = dma.hbm_to_vmem [thread:$0]  %s6483_s27, 256, %s38_s21, [#allocation3], %s5624_s25, %s5624_s25, %s5625_s3  }
  0x32   :  { %p5506_p5 = pnand %p5505_p4, %p5499_p1 }
  0x34   :  { %5509 = shalt.err (!%p5506_p5)
}
  0x35   :  { %71 = dma.hbm_to_vmem [thread:$0]  %s6459_s5, 16, %s69_s23, [#allocation6]  }
  0x36   :  { %s5628_s29 = smov [#allocation10]   ;;  %s5629_s0 = smov [#allocation11]  }
  0x37   :  { %s95_s30 = sshll.u32 %s5628_s29, 4  ;;  %s109_s1 = sshll.u32 %s5629_s0, 4  ;;  %s96_s30 = int_to_ptr.vmem [resolvable:$true] %s95_s30  ;;  %s110_s1 = int_to_ptr.vmem [resolvable:$true] %s109_s1 }
  0x38   :  { %s5518_s22 = scalar_lea.vmem %s96_s30, 512  ;;  %p5523_p7 = scmp.lt.s32.totalorder %s96_s30, %s96_s30 }
  0x39   :  { %p5519_p6 = scmp.ne.s32.totalorder %s96_s30, %s5518_s22  ;;  %p5524_p8 = scmp.lt.s32.totalorder %s5518_s22, %s5518_s22 }
  0x3b   :  { %p5525_p9 = por %p5524_p8, %p5523_p7 }
  0x3d   :  { %p5526_p10 = pnand %p5525_p9, %p5519_p6 }
  0x3f   :  { %5529 = shalt.err (!%p5526_p10)
}
  0x40   :  { %101 = dma.hbm_to_vmem [thread:$0]  %s6464_s10, 512, %s96_s30, [#allocation9], %s5624_s25, %s5624_s25, %s5625_s3  }
  0x41   :  { %s5538_s5 = scalar_lea.vmem %s110_s1, 512  ;;  %p5543_p12 = scmp.lt.s32.totalorder %s110_s1, %s110_s1 }
  0x42   :  { %p5539_p11 = scmp.ne.s32.totalorder %s110_s1, %s5538_s5  ;;  %p5544_p13 = scmp.lt.s32.totalorder %s5538_s5, %s5538_s5 }
  0x44   :  { %p5545_p0 = por %p5544_p13, %p5543_p12 }
  0x46   :  { %p5546_p1 = pnand %p5545_p0, %p5539_p11 }
  0x48   :  { %5549 = shalt.err (!%p5546_p1)
}
  0x49   :  { %115 = dma.hbm_to_vmem [thread:$0]  %s6466_s12, 512, %s110_s1, [#allocation12], %s5624_s25, %s5624_s25, %s5625_s3  }
  0x4a   :  { %5610 = dma.done.wait [#allocation3], 256  }
  0x4b   :  { %5611 = vsyncadd [#allocation3], 4294967040 }
  0x4c   :  { %5612 = dma.done.wait [#allocation6], 400  }
  0x4d   :  { %5613 = vsyncadd [#allocation6], 4294966896 }
  0x4e   :  { %5614 = dma.done.wait [#allocation9], 1024  }
  0x4f   :  { %5615 = vsyncadd [#allocation9], 4294966272 }
  0x50   :  { %5616 = dma.done.wait [#allocation12], 512  }
  0x51   :  { %5617 = vsyncadd [#allocation12], 4294966784  ;;  %vm162_vm0 = vcmask 261120   ;;  %s6484_s8 = sld [smem:[#allocation25_spill]]  ;;  %v5790_v2 = vld [vmem:[#allocation2] sm:$0xff]  ;;  %v5800_v5 = vld [vmem:[#allocation2 + $0x8] sm:$0xff] }
  0x52   :  { %4995 = vmatprep.mubr.msk.f32.mxu1 %vm162_vm0, %v5790_v2  ;;  %v5630_v6 = vmov 0.0   ;;  %vm5631_vm1 = vmmov 0   ;;  %s6485_s22 = sld [smem:[#allocation26_spill]]  ;;  %s5632_s21 = smov 64   ;;  %vm251_vm2 = vcmask 64512   ;;  %vm2500_vm3 = vcmask 97280  }
  0x53   :  { %5003 = vmatprep.subr.mxu0 %v5630_v6  ;;  %5005 = vmatprep.mubr.msk.f32.mxu0 %vm5631_vm1, %v5630_v6  ;;  %s5633_s2 = smov 96   ;;  %s5634_s5 = smov 88   ;;  %vm2520_vm4 = vcmask 1043456   ;;  %vm4567_vm5 = vcmask 523264  }
  0x54   :  { %s5635_s23 = smov 120   ;;  %s5636_s26 = smov 56  }
  0x55   :  { %s5637_s10 = smov 80   ;;  %s5638_s27 = smov 112  }
  0x56   :  { %s6486_s28 = sld [smem:[#allocation27_spill]]  ;;  %s5639_s29 = smov 48  }
  0x57   :  { %v154_v0 = vld [vmem:[%s6484_s8 + $0x18] sm:$0xff]  ;;  %v153_v1 = vld [vmem:[%s6484_s8 + $0x10] sm:$0xff]  ;;  %v152_v3 = vld [vmem:[%s6484_s8 + $0x8] sm:$0xff]  ;;  %s5640_s30 = smov 72   ;;  %s5641_s0 = smov 104  }
  0x58   :  { %4987 = vmatprep.subr.mxu1 %v154_v0  ;;  %v151_v4 = vld [vmem:[%s6484_s8] sm:$0xff]  ;;  %s5642_s1 = smov 40  }
  0x59   :  { %4988 = vmatpush3.msra.mxu1 %v154_v0  ;;  %v4742_v7 = vld [vmem:[%s6485_s22] ss:$0 sm:$0xff] }
  0x5a   :  { %4989 = vmatprep.subr.mxu1 %v153_v1 }
  0x5b   :  { %4990 = vmatpush3.msra.mxu1 %v153_v1 }
  0x5c   :  { %4991 = vmatprep.subr.mxu1 %v152_v3  ;;  %v5856_v39 = vld [vmem:[%s6486_s28 + $0x8] sm:$0xff]  ;;  %v5864_v44 = vld [vmem:[%s6486_s28] sm:$0xff]  ;;  %v5900_v63 = vld [vmem:[%s6486_s28 + $0x10] sm:$0xff] }
  0x5d   :  { %4992 = vmatpush3.msra.mxu1 %v152_v3 }
  0x5e   :  { %4993 = vmatprep.subr.mxu1 %v151_v4 }
  0x5f   :  { %4994 = vmatpush3.msra.mxu1 %v151_v4 }
  0x60   :  { %4996 = vmatmul.mubr.msk.f32.vlgmr.msra.gmra.mxu1 %vm162_vm0, %v5800_v5  ;;  %4998 = vmatprep.subr.mxu1 %v5630_v6 }
  0x61   :  { %5000 = vmatprep.mubr.msk.f32.mxu1 %vm5631_vm1, %v5630_v6 }
 0x120   :  { %v4997_v8 = vpop.f32.mrf.mxu1 }
 0x121   :  { %v5813_v9 = vadd.f32 %v4997_v8, %v4742_v7 }
 0x122   :  { %v235_v10 = vpop.f32.mrf.mxu1 }
 0x123   :  { %v5815_v11 = vadd.f32 %v4742_v7, %v235_v10 }
 0x125   :  { %338 = vrot.lane.b32.xlu1 %v5815_v11, %s5632_s21  ;;  %249 = vrot.lane.b32.xlu0 %v5815_v11, %s5633_s2 }
 0x129   :  { %416 = vrot.lane.b32.xlu1 %v5815_v11, %s5634_s5 }
 0x197   :  { %v339_v12 = vpop.permute.xlu1 %338  ;;  %v250_v13 = vpop.permute.xlu0 %249 }
 0x198   :  { %4999 = vmatpush3.xpose.msk.msra.mxu1 %vm251_vm2, %v250_v13  ;;  %5004 = vmatpush3.msra.mxu0 %v339_v12 }
 0x199   :  { %5008 = vmatprep.subr.mxu0 %v5630_v6  ;;  %5013 = vmatprep.subr.mxu1 %v5630_v6 }
 0x19b   :  { %5001 = vmatmul.mubr.msk.f32.vlgmr.msra.gmra.mxu1 %vm251_vm2, %v5815_v11  ;;  %v417_v23 = vpop.permute.xlu1 %416 }
 0x19c   :  { %5015 = vmatprep.mubr.msk.f32.mxu1 %vm5631_vm1, %v5630_v6 }
 0x25b   :  { %v322_v14 = vpop.f32.mrf.mxu1 }
 0x25c   :  { %v326_v15 = vmul.f32 0.35355338, %v322_v14 }
 0x25d   :  { %v5002_v16 = vpop.f32.mrf.mxu1 }
 0x25e   :  { %v327_v17 = vsel %vm251_vm2, %v326_v15, -inf }
 0x25f   :  { %328 = vmax.xlane.f32.xlu0 %v327_v17 }
 0x2e8   :  { %v329_v18 = vpop.xlane.xlu0 %328 }
 0x2e9   :  { %v330_v19 = vsub.f32 %v326_v15, %v329_v18 }
 0x2eb   :  { %v331_v20 = vmul.f32 1.442695, %v330_v19 }
 0x2ed   :  { %5352 = vpow2.f32 %v331_v20 }
 0x2fa   :  { %v5353_v21 = vpop.eup %5352 }
 0x2fb   :  { %v333_v22 = vsel %vm251_vm2, %v5353_v21, 0.0 }
 0x2fc   :  { %334 = vadd.xlane.f32.xlu1 %v333_v22 }
 0x30d   :  { %414 = vrot.lane.b32.xlu1 %v5815_v11, %s5635_s23 }
 0x385   :  { %v335_v24 = vpop.xlane.xlu1 %334 }
 0x386   :  { %5354 = vrcp.f32 %v335_v24 }
 0x389   :  { %v415_v27 = vpop.permute.xlu1 %414 }
 0x393   :  { %v5355_v25 = vpop.eup %5354 }
 0x394   :  { %v5834_v26 = vmul.f32 %v5355_v25, %v5353_v21 }
 0x396   :  { %5006 = vmatmul.mubr.msk.f32.vlgmr.msra.gmra.mxu0 %vm251_vm2, %v5834_v26 }
 0x397   :  { %5009 = vmatpush3.xpose.msk.msra.mxu0 %vm251_vm2, %v417_v23  ;;  %5010 = vmatprep.mubr.msk.f32.mxu0 %vm5631_vm1, %v5630_v6 }
 0x398   :  { %5018 = vmatprep.subr.mxu0 %v5630_v6 }
 0x39a   :  { %5011 = vmatmul.mubr.msk.f32.vlgmr.msra.gmra.mxu0 %vm251_vm2, %v415_v27 }
 0x39b   :  { %5020 = vmatprep.mubr.msk.f32.mxu0 %vm5631_vm1, %v5630_v6  ;;  %5019 = vmatpush3.msra.mxu0 %v5856_v39 }
 0x39c   :  { %5028 = vmatprep.subr.mxu0 %v5630_v6 }
 0x456   :  { %v410_v28 = vpop.f32.mrf.mxu0 }
 0x458   :  { %v5007_v29 = vpop.f32.mrf.mxu0 }
 0x45a   :  { %v488_v30 = vpop.f32.mrf.mxu0 }
 0x45b   :  { %v492_v31 = vmul.f32 0.35355338, %v488_v30 }
 0x45c   :  { %v5012_v32 = vpop.f32.mrf.mxu0 }
 0x45d   :  { %v493_v33 = vsel %vm251_vm2, %v492_v31, -inf }
 0x45e   :  { %494 = vmax.xlane.f32.xlu1 %v493_v33 }
 0x4e7   :  { %v495_v34 = vpop.xlane.xlu1 %494 }
 0x4e8   :  { %v496_v35 = vsub.f32 %v492_v31, %v495_v34 }
 0x4ea   :  { %v497_v36 = vmul.f32 1.442695, %v496_v35  ;;  %v5947_v35 = vld [vmem:[%s6486_s28 + $0x18] sm:$0xff] }
 0x4ec   :  { %5356 = vpow2.f32 %v497_v36 }
 0x4f9   :  { %v5357_v37 = vpop.eup %5356 }
 0x4fa   :  { %v499_v38 = vsel %vm251_vm2, %v5357_v37, 0.0 }
 0x4fb   :  { %500 = vadd.xlane.f32.xlu0 %v499_v38 }
 0x511   :  { %505 = vrot.lane.b32.xlu0 %v5815_v11, %s5636_s26 }
 0x515   :  { %729 = vrot.lane.b32.xlu0 %v5815_v11, %s5637_s10 }
 0x519   :  { %727 = vrot.lane.b32.xlu0 %v5815_v11, %s5638_s27 }
 0x584   :  { %v501_v40 = vpop.xlane.xlu0 %500 }
 0x585   :  { %5358 = vrcp.f32 %v501_v40 }
 0x588   :  { %v506_v41 = vpop.permute.xlu0 %505 }
 0x589   :  { %5014 = vmatpush3.msra.mxu1 %v506_v41 }
 0x58a   :  { %5023 = vmatprep.subr.mxu1 %v5630_v6 }
 0x58c   :  { %v730_v45 = vpop.permute.xlu0 %729 }
 0x590   :  { %v728_v48 = vpop.permute.xlu0 %727 }
 0x592   :  { %v5359_v42 = vpop.eup %5358 }
 0x593   :  { %v503_v43 = vmul.f32 %v5359_v42, %v5357_v37 }
 0x595   :  { %5016 = vmatmul.mubr.msk.f32.vlgmr.msra.gmra.mxu1 %vm251_vm2, %v503_v43  ;;  %v504_v7 = vadd.f32 %v503_v43, %v5834_v26 }
 0x596   :  { %5024 = vmatpush3.msra.mxu1 %v5864_v44  ;;  %5025 = vmatprep.mubr.msk.f32.mxu1 %vm5631_vm1, %v5630_v6 }
 0x597   :  { %5033 = vmatprep.subr.mxu1 %v5630_v6 }
 0x599   :  { %5026 = vmatmul.mubr.msk.f32.vlgmr.msra.gmra.mxu1 %vm251_vm2, %v410_v28 }
 0x59a   :  { %5035 = vmatprep.mubr.msk.f32.mxu1 %vm5631_vm1, %v5630_v6 }
 0x655   :  { %v577_v46 = vpop.f32.mrf.mxu1 }
 0x656   :  { %5021 = vmatmul.mubr.msk.f32.vlgmr.msra.gmra.mxu0 %vm251_vm2, %v577_v46 }
 0x657   :  { %5029 = vmatpush3.xpose.msk.msra.mxu0 %vm251_vm2, %v730_v45  ;;  %v5017_v47 = vpop.f32.mrf.mxu1  ;;  %5030 = vmatprep.mubr.msk.f32.mxu0 %vm5631_vm1, %v5630_v6 }
 0x658   :  { %5038 = vmatprep.subr.mxu0 %v5630_v6 }
 0x659   :  { %v5879_v49 = vpop.f32.mrf.mxu1 }
 0x65a   :  { %5031 = vmatmul.mubr.msk.f32.vlgmr.msra.gmra.mxu0 %vm251_vm2, %v728_v48 }
 0x65b   :  { %v5027_v50 = vpop.f32.mrf.mxu1  ;;  %5040 = vmatprep.mubr.msk.f32.mxu0 %vm5631_vm1, %v5630_v6  ;;  %5039 = vmatpush3.msra.mxu0 %v5900_v63 }
 0x65c   :  { %5048 = vmatprep.subr.mxu0 %v5630_v6 }
 0x716   :  { %v5884_v51 = vpop.f32.mrf.mxu0 }
 0x717   :  { %v724_v23 = vadd.f32 %v5879_v49, %v5884_v51 }
 0x718   :  { %v5022_v52 = vpop.f32.mrf.mxu0 }
 0x71a   :  { %v801_v53 = vpop.f32.mrf.mxu0 }
 0x71b   :  { %v805_v54 = vmul.f32 0.35355338, %v801_v53 }
 0x71c   :  { %v5032_v55 = vpop.f32.mrf.mxu0 }
 0x71d   :  { %v806_v56 = vsel %vm251_vm2, %v805_v54, -inf }
 0x71e   :  { %807 = vmax.xlane.f32.xlu1 %v806_v56 }
 0x72f   :  { %818 = vrot.lane.b32.xlu1 %v5815_v11, %s5639_s29 }
 0x733   :  { %970 = vrot.lane.b32.xlu1 %v5815_v11, %s5640_s30 }
 0x737   :  { %968 = vrot.lane.b32.xlu1 %v5815_v11, %s5641_s0 }
 0x7a7   :  { %v808_v57 = vpop.xlane.xlu1 %807 }
 0x7a8   :  { %v809_v58 = vsub.f32 %v805_v54, %v808_v57 }
 0x7aa   :  { %v810_v59 = vmul.f32 1.442695, %v809_v58 }
 0x7ab   :  { %v819_v60 = vpop.permute.xlu1 %818 }
 0x7ac   :  { %5360 = vpow2.f32 %v810_v59  ;;  %5034 = vmatpush3.msra.mxu1 %v819_v60 }
 0x7ad   :  { %5043 = vmatprep.subr.mxu1 %v5630_v6 }
 0x7af   :  { %v971_v3 = vpop.permute.xlu1 %970 }
 0x7b3   :  { %v969_v10 = vpop.permute.xlu1 %968 }
 0x7b9   :  { %v5361_v61 = vpop.eup %5360 }
 0x7ba   :  { %v812_v62 = vsel %vm251_vm2, %v5361_v61, 0.0 }
 0x7bb   :  { %813 = vadd.xlane.f32.xlu0 %v812_v62 }
 0x7d1   :  { %1059 = vrot.lane.b32.xlu0 %v5815_v11, %s5642_s1 }
 0x844   :  { %v814_v0 = vpop.xlane.xlu0 %813 }
 0x845   :  { %5362 = vrcp.f32 %v814_v0 }
 0x848   :  { %v1060_v12 = vpop.permute.xlu0 %1059 }
 0x852   :  { %v5363_v1 = vpop.eup %5362 }
 0x853   :  { %v816_v4 = vmul.f32 %v5363_v1, %v5361_v61 }
 0x855   :  { %5036 = vmatmul.mubr.msk.f32.vlgmr.msra.gmra.mxu1 %vm251_vm2, %v816_v4  ;;  %v817_v8 = vadd.f32 %v816_v4, %v504_v7 }
 0x856   :  { %5044 = vmatpush3.xpose.msk.msra.mxu1 %vm251_vm2, %v971_v3  ;;  %5045 = vmatprep.mubr.msk.f32.mxu1 %vm5631_vm1, %v5630_v6 }
 0x857   :  { %5053 = vmatprep.subr.mxu1 %v5630_v6 }
 0x859   :  { %5046 = vmatmul.mubr.msk.f32.vlgmr.msra.gmra.mxu1 %vm251_vm2, %v969_v10 }
 0x85a   :  { %5055 = vmatprep.mubr.msk.f32.mxu1 %vm5631_vm1, %v5630_v6  ;;  %5054 = vmatpush3.msra.mxu1 %v5947_v35 }
 0x85b   :  { %5063 = vmatprep.subr.mxu1 %v5630_v6 }
 0x915   :  { %v890_v11 = vpop.f32.mrf.mxu1 }
 0x916   :  { %5041 = vmatmul.mubr.msk.f32.vlgmr.msra.gmra.mxu0 %vm251_vm2, %v890_v11 }
 0x917   :  { %5049 = vmatpush3.msra.mxu0 %v1060_v12  ;;  %v5037_v13 = vpop.f32.mrf.mxu1  ;;  %5050 = vmatprep.mubr.msk.f32.mxu0 %vm5631_vm1, %v5630_v6 }
 0x918   :  { %5058 = vmatprep.subr.mxu0 %v5630_v6 }
 0x919   :  { %v1042_v14 = vpop.f32.mrf.mxu1 }
 0x91a   :  { %v1046_v15 = vmul.f32 0.35355338, %v1042_v14 }
 0x91b   :  { %v5047_v16 = vpop.f32.mrf.mxu1 }
 0x91c   :  { %v1047_v17 = vsel %vm251_vm2, %v1046_v15, -inf }
 0x91d   :  { %1048 = vmax.xlane.f32.xlu1 %v1047_v17 }
 0x92e   :  { %1376 = vrot.lane.b32.xlu1 %v5813_v9, %s5635_s23 }
 0x9a6   :  { %v1049_v18 = vpop.xlane.xlu1 %1048 }
 0x9a7   :  { %v1050_v19 = vsub.f32 %v1046_v15, %v1049_v18 }
 0x9a9   :  { %v1051_v20 = vmul.f32 1.442695, %v1050_v19 }
 0x9aa   :  { %v1377_v34 = vpop.permute.xlu1 %1376 }
 0x9ab   :  { %5364 = vpow2.f32 %v1051_v20 }
 0x9b8   :  { %v5365_v21 = vpop.eup %5364 }
 0x9b9   :  { %v1053_v22 = vsel %vm251_vm2, %v5365_v21, 0.0 }
 0x9ba   :  { %1054 = vadd.xlane.f32.xlu0 %v1053_v22 }
 0x9d0   :  { %1212 = vrot.lane.b32.xlu0 %v5813_v9, %s5633_s2 }
 0x9d4   :  { %1378 = vrot.lane.b32.xlu0 %v5813_v9, %s5634_s5 }
 0x9d6   :  { %v963_v24 = vpop.f32.mrf.mxu0 }
 0x9d7   :  { %v967_v25 = vadd.f32 %v963_v24, %v724_v23 }
 0x9d8   :  { %v5042_v26 = vpop.f32.mrf.mxu0 }
 0xa43   :  { %v1055_v27 = vpop.xlane.xlu0 %1054 }
 0xa44   :  { %5366 = vrcp.f32 %v1055_v27 }
 0xa47   :  { %v1213_v29 = vpop.permute.xlu0 %1212 }
 0xa4b   :  { %v1379_v33 = vpop.permute.xlu0 %1378 }
 0xa51   :  { %v5367_v28 = vpop.eup %5366 }
 0xa52   :  { %v1057_v30 = vmul.f32 %v5367_v28, %v5365_v21 }
 0xa54   :  { %5051 = vmatmul.mubr.msk.f32.vlgmr.msra.gmra.mxu0 %vm251_vm2, %v1057_v30  ;;  %v1058_v31 = vadd.f32 %v1057_v30, %v817_v8 }
 0xa55   :  { %5059 = vmatpush3.xpose.msk.msra.mxu0 %vm251_vm2, %v1213_v29  ;;  %5060 = vmatprep.mubr.msk.f32.mxu0 %vm5631_vm1, %v5630_v6 }
 0xa56   :  { %5068 = vmatprep.subr.mxu0 %v5630_v6  ;;  %v1209_v32 = vmul.f32 0.25, %v1058_v31 }
 0xa58   :  { %5061 = vmatmul.mubr.msk.f32.vlgmr.msra.gmra.mxu0 %vm251_vm2, %v5813_v9  ;;  %1210 = vst.msk [vmem:[#allocation14] sm:$0xff] %vm251_vm2, %v1209_v32 }
 0xa59   :  { %5069 = vmatpush3.xpose.msk.msra.mxu0 %vm251_vm2, %v1379_v33  ;;  %5070 = vmatprep.mubr.msk.f32.mxu0 %vm5631_vm1, %v5630_v6 }
 0xa5a   :  { %5078 = vmatprep.subr.mxu0 %v5630_v6 }
 0xa5c   :  { %5071 = vmatmul.mubr.msk.f32.vlgmr.msra.gmra.mxu0 %vm251_vm2, %v1377_v34 }
 0xa5d   :  { %5079 = vmatpush3.msra.mxu0 %v5856_v39  ;;  %5080 = vmatprep.mubr.msk.f32.mxu0 %vm5631_vm1, %v5630_v6 }
 0xa5e   :  { %5088 = vmatprep.subr.mxu0 %v5630_v6 }
 0xb14   :  { %v1131_v36 = vpop.f32.mrf.mxu0 }
 0xb15   :  { %5056 = vmatmul.mubr.msk.f32.vlgmr.msra.gmra.mxu1 %vm251_vm2, %v1131_v36 }
 0xb16   :  { %v5052_v37 = vpop.f32.mrf.mxu0  ;;  %5065 = vmatprep.mubr.msk.f32.mxu1 %vm5631_vm1, %v5630_v6 }
 0xb18   :  { %v1284_v38 = vpop.f32.mrf.mxu0 }
 0xb19   :  { %v1288_v39 = vmul.f32 0.35355338, %v1284_v38 }
 0xb1a   :  { %v5062_v40 = vpop.f32.mrf.mxu0 }
 0xb1b   :  { %v1289_v41 = vsel %vm251_vm2, %v1288_v39, -inf }
 0xb1c   :  { %1290 = vmax.xlane.f32.xlu0 %v1289_v41  ;;  %v1450_v42 = vpop.f32.mrf.mxu0 }
 0xb1d   :  { %v1454_v43 = vmul.f32 0.35355338, %v1450_v42 }
 0xb1e   :  { %v5072_v45 = vpop.f32.mrf.mxu0 }
 0xb1f   :  { %v1455_v46 = vsel %vm251_vm2, %v1454_v43, -inf }
 0xb20   :  { %1456 = vmax.xlane.f32.xlu1 %v1455_v46  ;;  %v4777_v46 = vld [vmem:[#allocation7] ss:$0 sm:$0xff] }
 0xb31   :  { %1467 = vrot.lane.b32.xlu1 %v5813_v9, %s5636_s26 }
 0xba5   :  { %v1291_v47 = vpop.xlane.xlu0 %1290 }
 0xba6   :  { %v1292_v48 = vsub.f32 %v1288_v39, %v1291_v47 }
 0xba8   :  { %v1293_v49 = vmul.f32 1.442695, %v1292_v48 }
 0xba9   :  { %v1457_v50 = vpop.xlane.xlu1 %1456 }
 0xbaa   :  { %5368 = vpow2.f32 %v1293_v49  ;;  %v1458_v51 = vsub.f32 %v1454_v43, %v1457_v50 }
 0xbac   :  { %v1459_v52 = vmul.f32 1.442695, %v1458_v51 }
 0xbad   :  { %v1468_v3 = vpop.permute.xlu1 %1467 }
 0xbae   :  { %5370 = vpow2.f32 %v1459_v52 }
 0xbb7   :  { %v5369_v53 = vpop.eup %5368 }
 0xbb8   :  { %v1295_v54 = vsel %vm251_vm2, %v5369_v53, 0.0 }
 0xbb9   :  { %1296 = vadd.xlane.f32.xlu0 %v1295_v54 }
 0xbbb   :  { %v5371_v55 = vpop.eup %5370 }
 0xbbc   :  { %v1461_v56 = vsel %vm251_vm2, %v5371_v55, 0.0 }
 0xbbd   :  { %1462 = vadd.xlane.f32.xlu0 %v1461_v56 }
 0xbd3   :  { %1300 = vrot.lane.b32.xlu0 %v5813_v9, %s5632_s21 }
 0xbd5   :  { %v1204_v57 = vpop.f32.mrf.mxu1 }
 0xbd6   :  { %v5962_v58 = vadd.f32 %v1204_v57, %v967_v25 }
 0xbd7   :  { %1691 = vrot.lane.b32.xlu0 %v5813_v9, %s5637_s10  ;;  %v5057_v59 = vpop.f32.mrf.mxu1 }
 0xbd8   :  { %v2181_v47 = vadd.f32 %v4777_v46, %v5962_v58 }
 0xbda   :  { %v2183_v50 = vadd.f32 %v2181_v47, %v5790_v2  ;;  %v4781_v47 = vld [vmem:[%s6463_s9] ss:$0 sm:$0xff] }
 0xbdb   :  { %1689 = vrot.lane.b32.xlu0 %v5813_v9, %s5638_s27 }
 0xbdc   :  { %v2185_v51 = vsel %vm162_vm0, %v2183_v50, 0.0 }
 0xc42   :  { %v1297_v60 = vpop.xlane.xlu0 %1296 }
 0xc43   :  { %5372 = vrcp.f32 %v1297_v60 }
 0xc46   :  { %v1463_v61 = vpop.xlane.xlu0 %1462 }
 0xc47   :  { %5374 = vrcp.f32 %v1463_v61 }
 0xc4a   :  { %v1301_v62 = vpop.permute.xlu0 %1300 }
 0xc4b   :  { %5064 = vmatpush3.msra.mxu1 %v1301_v62 }
 0xc4c   :  { %5073 = vmatprep.subr.mxu1 %v5630_v6 }
 0xc4e   :  { %v1692_v11 = vpop.permute.xlu0 %1691 }
 0xc50   :  { %v5373_v0 = vpop.eup %5372 }
 0xc51   :  { %v1299_v1 = vmul.f32 %v5373_v0, %v5369_v53 }
 0xc53   :  { %5066 = vmatmul.mubr.msk.f32.vlgmr.msra.gmra.mxu1 %vm251_vm2, %v1299_v1 }
 0xc54   :  { %v5375_v4 = vpop.eup %5374  ;;  %5074 = vmatpush3.msra.mxu1 %v1468_v3  ;;  %5075 = vmatprep.mubr.msk.f32.mxu1 %vm5631_vm1, %v5630_v6 }
 0xc55   :  { %v1465_v7 = vmul.f32 %v5375_v4, %v5371_v55  ;;  %5083 = vmatprep.subr.mxu1 %v5630_v6 }
 0xc57   :  { %5076 = vmatmul.mubr.msk.f32.vlgmr.msra.gmra.mxu1 %vm251_vm2, %v1465_v7  ;;  %v1466_v8 = vadd.f32 %v1465_v7, %v1299_v1 }
 0xc58   :  { %5084 = vmatpush3.msra.mxu1 %v5864_v44  ;;  %5085 = vmatprep.mubr.msk.f32.mxu1 %vm5631_vm1, %v5630_v6  ;;  %v1690_v44 = vpop.permute.xlu0 %1689 }
 0xc59   :  { %5093 = vmatprep.subr.mxu1 %v5630_v6 }
 0xd13   :  { %v1372_v10 = vpop.f32.mrf.mxu1 }
 0xd14   :  { %5086 = vmatmul.mubr.msk.f32.vlgmr.msra.gmra.mxu1 %vm251_vm2, %v1372_v10 }
 0xd15   :  { %v5067_v12 = vpop.f32.mrf.mxu1  ;;  %5095 = vmatprep.mubr.msk.f32.mxu1 %vm5631_vm1, %v5630_v6 }
 0xd16   :  { %v2319_v12 = vld [vmem:[#allocation8 + $0x18] sm:$0xff] }
 0xd17   :  { %v1539_v13 = vpop.f32.mrf.mxu1 }
 0xd18   :  { %5081 = vmatmul.mubr.msk.f32.vlgmr.msra.gmra.mxu0 %vm251_vm2, %v1539_v13  ;;  %v2318_v13 = vld [vmem:[#allocation8 + $0x10] sm:$0xff] }
 0xd19   :  { %5089 = vmatpush3.xpose.msk.msra.mxu0 %vm251_vm2, %v1692_v11  ;;  %v5077_v14 = vpop.f32.mrf.mxu1  ;;  %5090 = vmatprep.mubr.msk.f32.mxu0 %vm5631_vm1, %v5630_v6 }
 0xd1a   :  { %5098 = vmatprep.subr.mxu0 %v5630_v6 }
 0xd1c   :  { %5091 = vmatmul.mubr.msk.f32.vlgmr.msra.gmra.mxu0 %vm251_vm2, %v1690_v44 }
 0xd1d   :  { %5099 = vmatpush3.msra.mxu0 %v5900_v63  ;;  %5100 = vmatprep.mubr.msk.f32.mxu0 %vm5631_vm1, %v5630_v6 }
 0xd1e   :  { %5108 = vmatprep.subr.mxu0 %v5630_v6 }
 0xdd4   :  { %v1685_v15 = vpop.f32.mrf.mxu1 }
 0xdd6   :  { %v5087_v16 = vpop.f32.mrf.mxu1 }
 0xdd8   :  { %v1612_v17 = vpop.f32.mrf.mxu0 }
 0xdd9   :  { %v1686_v18 = vadd.f32 %v1685_v15, %v1612_v17 }
 0xdda   :  { %v5082_v19 = vpop.f32.mrf.mxu0 }
 0xddc   :  { %v1763_v20 = vpop.f32.mrf.mxu0 }
 0xddd   :  { %v1767_v21 = vmul.f32 0.35355338, %v1763_v20  ;;  %v2212_v20 = vlaneseq }
 0xdde   :  { %v5092_v22 = vpop.f32.mrf.mxu0 }
 0xddf   :  { %v1768_v23 = vsel %vm251_vm2, %v1767_v21, -inf }
 0xde0   :  { %1769 = vmax.xlane.f32.xlu1 %v1768_v23  ;;  %v6037_v23 = vld [vmem:[%s6470_s16] sm:$0x7] }
 0xdf1   :  { %1932 = vrot.lane.b32.xlu1 %v5813_v9, %s5640_s30 }
 0xdf5   :  { %1930 = vrot.lane.b32.xlu1 %v5813_v9, %s5641_s0 }
 0xe69   :  { %v1770_v63 = vpop.xlane.xlu1 %1769 }
 0xe6a   :  { %v1771_v24 = vsub.f32 %v1767_v21, %v1770_v63  ;;  %v6031_v21 = vshrl.u32 %v2212_v20, 7  ;;  %v6042_v63 = vld [vmem:[%s6471_s17] sm:$0x7] }
 0xe6c   :  { %v1772_v25 = vmul.f32 1.442695, %v1771_v24  ;;  %v2214_v22 = vsub.s32 0, %v6031_v21 }
 0xe6d   :  { %v1933_v31 = vpop.permute.xlu1 %1932 }
 0xe6e   :  { %5376 = vpow2.f32 %v1772_v25  ;;  %v2215_v24 = vrot.slane %v6037_v23, %v2214_v22 }
 0xe71   :  { %v1931_v34 = vpop.permute.xlu1 %1930 }
 0xe7b   :  { %v5377_v26 = vpop.eup %5376 }
 0xe7c   :  { %v1774_v27 = vsel %vm251_vm2, %v5377_v26, 0.0 }
 0xe7d   :  { %1775 = vadd.xlane.f32.xlu0 %v1774_v27 }
 0xe93   :  { %1780 = vrot.lane.b32.xlu0 %v5813_v9, %s5639_s29 }
 0xf06   :  { %v1776_v28 = vpop.xlane.xlu0 %1775 }
 0xf07   :  { %5378 = vrcp.f32 %v1776_v28  ;;  %v2221_v28 = vrot.slane %v6042_v63, %v2214_v22 }
 0xf0a   :  { %v1781_v29 = vpop.permute.xlu0 %1780 }
 0xf0b   :  { %5094 = vmatpush3.msra.mxu1 %v1781_v29  ;;  %v2316_v29 = vld [vmem:[#allocation8] sm:$0xff] }
 0xf0c   :  { %5103 = vmatprep.subr.mxu1 %v5630_v6 }
 0xf14   :  { %v5379_v30 = vpop.eup %5378 }
 0xf15   :  { %v1778_v32 = vmul.f32 %v5379_v30, %v5377_v26  ;;  %v2317_v26 = vld [vmem:[#allocation8 + $0x8] sm:$0xff] }
 0xf17   :  { %5096 = vmatmul.mubr.msk.f32.vlgmr.msra.gmra.mxu1 %vm251_vm2, %v1778_v32  ;;  %v1779_v33 = vadd.f32 %v1778_v32, %v1466_v8 }
 0xf18   :  { %5104 = vmatpush3.xpose.msk.msra.mxu1 %vm251_vm2, %v1933_v31  ;;  %5105 = vmatprep.mubr.msk.f32.mxu1 %vm5631_vm1, %v5630_v6  ;;  %v146_v31 = vld [vmem:[#allocation5] sm:$0xff] }
 0xf19   :  { %5113 = vmatprep.subr.mxu1 %v5630_v6 }
 0xf1b   :  { %5106 = vmatmul.mubr.msk.f32.vlgmr.msra.gmra.mxu1 %vm251_vm2, %v1931_v34  ;;  %v2227_v34 = vld [vmem:[%s6460_s6 + $0x18] sm:$0xff] }
 0xf1c   :  { %5114 = vmatpush3.msra.mxu1 %v5947_v35  ;;  %5115 = vmatprep.mubr.msk.f32.mxu1 %vm5631_vm1, %v5630_v6 }
 0xf1d   :  { %5129 = vmatprep.subr.mxu1 %v5630_v6 }
 0xfd7   :  { %v1852_v36 = vpop.f32.mrf.mxu1 }
 0xfd8   :  { %5101 = vmatmul.mubr.msk.f32.vlgmr.msra.gmra.mxu0 %vm251_vm2, %v1852_v36  ;;  %v148_v36 = vld [vmem:[#allocation5 + $0x10] sm:$0xff] }
 0xfd9   :  { %v5097_v37 = vpop.f32.mrf.mxu1  ;;  %5110 = vmatprep.mubr.msk.f32.mxu0 %vm5631_vm1, %v5630_v6 }
 0xfda   :  { %v2226_v37 = vld [vmem:[%s6460_s6 + $0x10] sm:$0xff] }
 0xfdb   :  { %v2004_v38 = vpop.f32.mrf.mxu1 }
 0xfdc   :  { %v2008_v39 = vmul.f32 0.35355338, %v2004_v38  ;;  %v2225_v38 = vld [vmem:[%s6460_s6 + $0x8] sm:$0xff] }
 0xfdd   :  { %v5107_v40 = vpop.f32.mrf.mxu1 }
 0xfde   :  { %v2009_v41 = vsel %vm251_vm2, %v2008_v39, -inf }
 0xfdf   :  { %2010 = vmax.xlane.f32.xlu0 %v2009_v41 }
 0xff5   :  { %2021 = vrot.lane.b32.xlu0 %v5813_v9, %s5642_s1 }
0x1068   :  { %v2011_v35 = vpop.xlane.xlu0 %2010 }
0x1069   :  { %v2012_v42 = vsub.f32 %v2008_v39, %v2011_v35  ;;  %v2224_v39 = vld [vmem:[%s6460_s6] sm:$0xff] }
0x106b   :  { %v2013_v43 = vmul.f32 1.442695, %v2012_v42 }
0x106c   :  { %v2022_v45 = vpop.permute.xlu0 %2021 }
0x106d   :  { %5380 = vpow2.f32 %v2013_v43  ;;  %5109 = vmatpush3.msra.mxu0 %v2022_v45 }
0x106e   :  { %5118 = vmatprep.subr.mxu0 %v2227_v34 }
0x107a   :  { %v5381_v48 = vpop.eup %5380 }
0x107b   :  { %v2015_v49 = vsel %vm251_vm2, %v5381_v48, 0.0 }
0x107c   :  { %2016 = vadd.xlane.f32.xlu1 %v2015_v49 }
0x1080   :  { %2186 = vadd.xlane.f32.xlu1 %v2185_v51 }
0x1098   :  { %v1925_v52 = vpop.f32.mrf.mxu0 }
0x1099   :  { %v1929_v9 = vadd.f32 %v1925_v52, %v1686_v18 }
0x109a   :  { %v5102_v53 = vpop.f32.mrf.mxu0 }
0x1105   :  { %v2017_v54 = vpop.xlane.xlu1 %2016 }
0x1106   :  { %5382 = vrcp.f32 %v2017_v54 }
0x1109   :  { %v2187_v60 = vpop.xlane.xlu1 %2186 }
0x110a   :  { %v2192_v61 = vmul.f32 0.03125, %v2187_v60 }
0x110c   :  { %v2194_v3 = vsub.f32 %v2183_v50, %v2192_v61 }
0x110e   :  { %v2196_v10 = vmul.f32 %v2194_v3, %v2194_v3 }
0x1110   :  { %v2198_v11 = vsel %vm162_vm0, %v2196_v10, 0.0 }
0x1113   :  { %v5383_v55 = vpop.eup %5382 }
0x1114   :  { %v2019_v56 = vmul.f32 %v5383_v55, %v5381_v48 }
0x1116   :  { %5111 = vmatmul.mubr.msk.f32.vlgmr.msra.gmra.mxu0 %vm251_vm2, %v2019_v56  ;;  %v2020_v57 = vadd.f32 %v2019_v56, %v1779_v33  ;;  %v147_v33 = vld [vmem:[#allocation5 + $0x8] sm:$0xff] }
0x1117   :  { %5119 = vmatpush3.msra.mxu0 %v2227_v34  ;;  %v6155_v34 = vld [vmem:[#allocation10] sm:$0xff] }
0x1118   :  { %v2171_v58 = vmul.f32 0.25, %v2020_v57  ;;  %5120 = vmatprep.subr.mxu0 %v2226_v37 }
0x1119   :  { %5121 = vmatpush3.msra.mxu0 %v2226_v37 }
0x111a   :  { %2173 = vst.msk [vmem:[#allocation14 + $0x8] sm:$0xff] %vm251_vm2, %v2171_v58  ;;  %5122 = vmatprep.subr.mxu0 %v2225_v38  ;;  %v4778_v58 = vld [vmem:[%s6461_s7] ss:$0 sm:$0xff] }
0x111b   :  { %5123 = vmatpush3.msra.mxu0 %v2225_v38 }
0x111c   :  { %5124 = vmatprep.subr.mxu0 %v2224_v39 }
0x111d   :  { %5125 = vmatpush3.msra.mxu0 %v2224_v39 }
0x111e   :  { %5146 = vmatprep.subr.mxu0 %v5630_v6 }
0x11d6   :  { %v2093_v59 = vpop.f32.mrf.mxu0 }
0x11d7   :  { %5116 = vmatmul.mubr.msk.f32.vlgmr.msra.gmra.mxu1 %vm251_vm2, %v2093_v59 }
0x11d8   :  { %v5112_v2 = vpop.f32.mrf.mxu0  ;;  %5137 = vmatprep.mubr.msk.f32.mxu1 %vm5631_vm1, %v5630_v6  ;;  %5130 = vmatpush3.msra.mxu1 %v2319_v12 }
0x11d9   :  { %5131 = vmatprep.subr.mxu1 %v5630_v6 }
0x11da   :  { %5132 = vmatpush3.msra.mxu1 %v2318_v13 }
0x11db   :  { %5133 = vmatprep.subr.mxu1 %v5630_v6 }
0x11dc   :  { %5134 = vmatpush3.msra.mxu1 %v2317_v26 }
0x11dd   :  { %5135 = vmatprep.subr.mxu1 %v5630_v6 }
0x11de   :  { %5136 = vmatpush3.msra.mxu1 %v2316_v29 }
0x11df   :  { %5138 = vmatmul.mubr.msk.f32.vlgmr.msra.gmra.mxu1 %vm162_vm0, %v146_v31  ;;  %5160 = vmatprep.subr.mxu1 %v5630_v6 }
0x11e0   :  { %5140 = vmatprep.mubr.msk.f32.mxu1 %vm5631_vm1, %v5630_v6 }
0x11e3   :  { %5141 = vmatmul.mubr.msk.f32.gmra.mxu1 %vm162_vm0, %v147_v33 }
0x11e4   :  { %5143 = vmatprep.mubr.msk.f32.mxu1 %vm5631_vm1, %v5630_v6 }
0x11e7   :  { %5144 = vmatmul.mubr.msk.f32.gmra.mxu1 %vm162_vm0, %v148_v36 }
0x11e8   :  { %5164 = vmatprep.mubr.msk.f32.mxu1 %vm5631_vm1, %v5630_v6 }
0x1297   :  { %v2166_v62 = vpop.f32.mrf.mxu1 }
0x1298   :  { %v2170_v0 = vadd.f32 %v2166_v62, %v1929_v9 }
0x1299   :  { %v5117_v1 = vpop.f32.mrf.mxu1 }
0x129a   :  { %v2182_v4 = vadd.f32 %v4777_v46, %v2170_v0 }
0x129c   :  { %v2184_v7 = vadd.f32 %v2182_v4, %v5800_v5 }
0x129e   :  { %v2188_v8 = vsel %vm162_vm0, %v2184_v7, 0.0 }
0x129f   :  { %2189 = vadd.xlane.f32.xlu1 %v2188_v8  ;;  %v2402_v48 = vpop.f32.mrf.mxu1 }
0x12a0   :  { %v6083_v49 = vadd.f32 %v4781_v47, %v2402_v48 }
0x12a1   :  { %v5139_v50 = vpop.f32.mrf.mxu1 }
0x12a3   :  { %2199 = vadd.xlane.f32.xlu1 %v2198_v11  ;;  %v2407_v51 = vpop.f32.mrf.mxu1 }
0x12a4   :  { %v6087_v52 = vadd.f32 %v4781_v47, %v2407_v51 }
0x12a5   :  { %v5142_v9 = vpop.f32.mrf.mxu1 }
0x12a6   :  { %2597 = vrot.lane.b32.xlu0 %v6087_v52, %s5635_s23  ;;  %v3415_v48 = vrot.slane %v6087_v52, 4 }
0x12a7   :  { %v2412_v53 = vpop.f32.mrf.mxu1 }
0x12a8   :  { %v6096_v54 = vadd.f32 %v4781_v47, %v2412_v53 }
0x12a9   :  { %v5145_v55 = vpop.f32.mrf.mxu1 }
0x1318   :  { %v2598_v56 = vpop.permute.xlu0 %2597 }
0x1319   :  { %5161 = vmatpush3.xpose.msk.msra.mxu1 %vm251_vm2, %v2598_v56 }
0x131a   :  { %5162 = vmatprep.subr.mxu1 %v5630_v6 }
0x1328   :  { %v2190_v14 = vpop.xlane.xlu1 %2189 }
0x1329   :  { %v2193_v44 = vmul.f32 0.03125, %v2190_v14 }
0x132b   :  { %v2195_v15 = vsub.f32 %v2184_v7, %v2193_v44 }
0x132c   :  { %v2200_v16 = vpop.xlane.xlu1 %2199 }
0x132d   :  { %v2204_v5 = vmul.f32 0.03125, %v2200_v16  ;;  %v2197_v17 = vmul.f32 %v2195_v15, %v2195_v15 }
0x132f   :  { %v2206_v18 = vadd.f32 1e-05, %v2204_v5  ;;  %v2201_v19 = vsel %vm162_vm0, %v2197_v17, 0.0 }
0x1330   :  { %2202 = vadd.xlane.f32.xlu1 %v2201_v19 }
0x1331   :  { %5384 = vrsqrt.f32 %v2206_v18 }
0x133e   :  { %v5385_v25 = vpop.eup %5384 }
0x133f   :  { %v2210_v27 = vmul.f32 %v5385_v25, %v2194_v3 }
0x1341   :  { %v2216_v30 = vmul.f32 %v2215_v24, %v2210_v27  ;;  %2595 = vrot.lane.b32.xlu1 %v6083_v49, %s5635_s23  ;;  %v6146_v27 = vld [vmem:[#allocation10 + $0x8] sm:$0xff] }
0x1343   :  { %v6049_v32 = vadd.f32 %v2221_v28, %v2216_v30 }
0x1345   :  { %5126 = vmatprep.mubr.msk.f32.mxu0 %vm162_vm0, %v6049_v32 }
0x13b9   :  { %v2203_v40 = vpop.xlane.xlu1 %2202 }
0x13ba   :  { %v2205_v41 = vmul.f32 0.03125, %v2203_v40 }
0x13bc   :  { %v2207_v35 = vadd.f32 1e-05, %v2205_v41 }
0x13bd   :  { %v2596_v57 = vpop.permute.xlu1 %2595 }
0x13be   :  { %5386 = vrsqrt.f32 %v2207_v35  ;;  %5163 = vmatpush3.xpose.msk.msra.mxu1 %vm251_vm2, %v2596_v57 }
0x13bf   :  { %5174 = vmatprep.subr.mxu1 %v5630_v6 }
0x13cb   :  { %v5387_v42 = vpop.eup %5386 }
0x13cc   :  { %v2211_v43 = vmul.f32 %v5387_v42, %v2195_v15 }
0x13ce   :  { %v2217_v45 = vmul.f32 %v2215_v24, %v2211_v43 }
0x13d0   :  { %v6074_v46 = vadd.f32 %v2221_v28, %v2217_v45  ;;  %v6181_v45 = vrot.slane %v6096_v54, 4 }
0x13d2   :  { %5127 = vmatmul.mubr.msk.f32.vlgmr.msra.gmra.mxu0 %vm162_vm0, %v6074_v46  ;;  %v6192_v50 = vsel %vm2520_vm4, %v3415_v48, %v6181_v45 }
0x13d3   :  { %5150 = vmatprep.mubr.msk.f32.mxu0 %vm5631_vm1, %v5630_v6  ;;  %5147 = vmatpush3.xpose.msk.msra.mxu0 %vm251_vm2, %v6087_v52 }
0x13d4   :  { %5148 = vmatprep.subr.mxu0 %v5630_v6 }
0x13d7   :  { %5149 = vmatpush3.xpose.msk.msra.mxu0 %vm251_vm2, %v6083_v49 }
0x13d8   :  { %5153 = vmatprep.subr.mxu0 %v5630_v6 }
0x1492   :  { %v5128_v59 = vpop.f32.mrf.mxu0 }
0x1493   :  { %v6106_v2 = vadd.f32 %v5128_v59, %v4778_v58 }
0x1494   :  { %v2307_v60 = vpop.f32.mrf.mxu0 }
0x1495   :  { %v2308_v61 = vadd.f32 %v4778_v58, %v2307_v60 }
0x1497   :  { %2593 = vrot.lane.b32.xlu0 %v2308_v61, %s5635_s23  ;;  %5151 = vmatmul.mubr.msk.f32.vlgmr.msra.gmra.mxu0 %vm251_vm2, %v2308_v61 }
0x1498   :  { %5157 = vmatprep.mubr.msk.f32.mxu0 %vm5631_vm1, %v5630_v6 }
0x1509   :  { %v2594_v62 = vpop.permute.xlu0 %2593 }
0x150a   :  { %5165 = vmatmul.mubr.msk.f32.vlgmr.msra.gmra.mxu1 %vm251_vm2, %v2594_v62 }
0x150b   :  { %5176 = vmatprep.mubr.msk.f32.mxu1 %vm5631_vm1, %v5630_v6  ;;  %5175 = vmatpush3.msra.mxu1 %v6146_v27 }
0x150c   :  { %5184 = vmatprep.subr.mxu1 %v5630_v6 }
0x1557   :  { %v2495_v0 = vpop.f32.mrf.mxu0 }
0x1558   :  { %v2499_v1 = vmul.f32 0.35355338, %v2495_v0 }
0x1559   :  { %v5152_v3 = vpop.f32.mrf.mxu0 }
0x155a   :  { %v2501_v4 = vsel %vm2500_vm3, %v2499_v1, -inf }
0x155b   :  { %2502 = vmax.xlane.f32.xlu0 %v2501_v4 }
0x1571   :  { %2514 = vrot.lane.b32.xlu0 %v6087_v52, %s5633_s2 }
0x15ca   :  { %v2671_v7 = vpop.f32.mrf.mxu1 }
0x15cb   :  { %v2675_v8 = vmul.f32 0.35355338, %v2671_v7 }
0x15cc   :  { %v5166_v10 = vpop.f32.mrf.mxu1 }
0x15cd   :  { %v2676_v11 = vsel %vm2500_vm3, %v2675_v8, -inf }
0x15ce   :  { %2677 = vmax.xlane.f32.xlu1 %v2676_v11 }
0x15df   :  { %2512 = vrot.lane.b32.xlu1 %v6083_v49, %s5633_s2 }
0x15e3   :  { %2688 = vrot.lane.b32.xlu1 %v6083_v49, %s5634_s5 }
0x15e4   :  { %v2503_v12 = vpop.xlane.xlu0 %2502 }
0x15e5   :  { %v2504_v13 = vsub.f32 %v2499_v1, %v2503_v12 }
0x15e7   :  { %v2505_v14 = vmul.f32 1.442695, %v2504_v13  ;;  %2916 = vrot.lane.b32.xlu1 %v6083_v49, %s5638_s27 }
0x15e8   :  { %v2515_v44 = vpop.permute.xlu0 %2514 }
0x15e9   :  { %5388 = vpow2.f32 %v2505_v14  ;;  %5154 = vmatpush3.msk.msra.mxu0 %vm2520_vm4, %v2515_v44 }
0x15ea   :  { %5155 = vmatprep.subr.mxu0 %v5630_v6 }
0x15eb   :  { %3167 = vrot.lane.b32.xlu1 %v6087_v52, %s5641_s0 }
0x15ef   :  { %3163 = vrot.lane.b32.xlu1 %v2308_v61, %s5641_s0 }
0x15f6   :  { %v5389_v15 = vpop.eup %5388 }
0x15f7   :  { %v2507_v16 = vsel %vm2500_vm3, %v5389_v15, 0.0 }
0x15f8   :  { %2508 = vadd.xlane.f32.xlu0 %v2507_v16 }
0x1657   :  { %v2678_v5 = vpop.xlane.xlu1 %2677 }
0x1658   :  { %v2679_v17 = vsub.f32 %v2675_v8, %v2678_v5 }
0x165a   :  { %v2680_v18 = vmul.f32 1.442695, %v2679_v17 }
0x165b   :  { %v2513_v19 = vpop.permute.xlu1 %2512 }
0x165c   :  { %5390 = vpow2.f32 %v2680_v18  ;;  %5156 = vmatpush3.msra.mxu0 %v2513_v19 }
0x165d   :  { %5167 = vmatprep.subr.mxu0 %v5630_v6 }
0x165f   :  { %v2689_v30 = vpop.permute.xlu1 %2688 }
0x1663   :  { %v2917_v41 = vpop.permute.xlu1 %2916 }
0x1667   :  { %v3168_v42 = vpop.permute.xlu1 %3167 }
0x1669   :  { %v5391_v20 = vpop.eup %5390 }
0x166a   :  { %v2682_v22 = vsel %vm2500_vm3, %v5391_v20, 0.0 }
0x166b   :  { %2683 = vadd.xlane.f32.xlu0 %v2682_v22  ;;  %v3164_v47 = vpop.permute.xlu1 %3163 }
0x1681   :  { %v2509_v24 = vpop.xlane.xlu0 %2508  ;;  %2690 = vrot.lane.b32.xlu0 %v6087_v52, %s5634_s5 }
0x1682   :  { %5392 = vrcp.f32 %v2509_v24 }
0x1685   :  { %2918 = vrot.lane.b32.xlu0 %v6087_v52, %s5638_s27 }
0x1689   :  { %2914 = vrot.lane.b32.xlu0 %v2308_v61, %s5638_s27 }
0x168d   :  { %3165 = vrot.lane.b32.xlu0 %v6083_v49, %s5641_s0 }
0x168f   :  { %v5393_v25 = vpop.eup %5392 }
0x1690   :  { %v6140_v26 = vmul.f32 %v5393_v25, %v5389_v15 }
0x1692   :  { %5158 = vmatmul.mubr.msk.f32.vlgmr.msra.gmra.mxu0 %vm2500_vm3, %v6140_v26 }
0x1693   :  { %5171 = vmatprep.mubr.msk.f32.mxu0 %vm5631_vm1, %v5630_v6 }
0x16f4   :  { %v2684_v28 = vpop.xlane.xlu0 %2683 }
0x16f5   :  { %5394 = vrcp.f32 %v2684_v28 }
0x16f8   :  { %v2691_v29 = vpop.permute.xlu0 %2690 }
0x16f9   :  { %5168 = vmatpush3.msk.msra.mxu0 %vm2520_vm4, %v2691_v29  ;;  %v6232_v29 = vld [vmem:[#allocation10 + $0x10] sm:$0xff] }
0x16fa   :  { %5169 = vmatprep.subr.mxu0 %v5630_v6 }
0x16fb   :  { %5170 = vmatpush3.msra.mxu0 %v2689_v30 }
0x16fc   :  { %5179 = vmatprep.subr.mxu0 %v5630_v6  ;;  %v2919_v39 = vpop.permute.xlu0 %2918 }
0x1700   :  { %v2915_v35 = vpop.permute.xlu0 %2914 }
0x1702   :  { %v5395_v31 = vpop.eup %5394 }
0x1703   :  { %v6153_v33 = vmul.f32 %v5395_v31, %v5391_v20 }
0x1704   :  { %v3166_v43 = vpop.permute.xlu0 %3165 }
0x1705   :  { %5172 = vmatmul.mubr.msk.f32.vlgmr.msra.gmra.mxu0 %vm2500_vm3, %v6153_v33  ;;  %v2687_v31 = vadd.f32 %v6153_v33, %v6140_v26  ;;  %v6251_v26 = vld [vmem:[#allocation10 + $0x18] sm:$0xff] }
0x1706   :  { %5180 = vmatpush3.msra.mxu0 %v6155_v34  ;;  %5181 = vmatprep.mubr.msk.f32.mxu0 %vm5631_vm1, %v5630_v6 }
0x1707   :  { %5191 = vmatprep.subr.mxu0 %v5630_v6 }
0x1752   :  { %v2589_v36 = vpop.f32.mrf.mxu0 }
0x1753   :  { %5182 = vmatmul.mubr.msk.f32.vlgmr.msra.gmra.mxu0 %vm251_vm2, %v2589_v36 }
0x1754   :  { %v5159_v37 = vpop.f32.mrf.mxu0  ;;  %5195 = vmatprep.mubr.msk.f32.mxu0 %vm5631_vm1, %v5630_v6 }
0x17c5   :  { %v2764_v38 = vpop.f32.mrf.mxu0 }
0x17c6   :  { %5177 = vmatmul.mubr.msk.f32.vlgmr.msra.gmra.mxu1 %vm251_vm2, %v2764_v38 }
0x17c7   :  { %5185 = vmatpush3.xpose.msk.msra.mxu1 %vm251_vm2, %v2919_v39  ;;  %v5173_v40 = vpop.f32.mrf.mxu0  ;;  %5188 = vmatprep.mubr.msk.f32.mxu1 %vm5631_vm1, %v5630_v6 }
0x17c8   :  { %5186 = vmatprep.subr.mxu1 %v5630_v6 }
0x17cb   :  { %5187 = vmatpush3.xpose.msk.msra.mxu1 %vm251_vm2, %v2917_v41 }
0x17cc   :  { %5203 = vmatprep.subr.mxu1 %v5630_v6 }
0x17ce   :  { %5189 = vmatmul.mubr.msk.f32.vlgmr.msra.gmra.mxu1 %vm251_vm2, %v2915_v35 }
0x17cf   :  { %5204 = vmatpush3.xpose.msk.msra.mxu1 %vm251_vm2, %v3168_v42  ;;  %5207 = vmatprep.mubr.msk.f32.mxu1 %vm5631_vm1, %v5630_v6 }
0x17d0   :  { %5205 = vmatprep.subr.mxu1 %v5630_v6 }
0x17d3   :  { %5206 = vmatpush3.xpose.msk.msra.mxu1 %vm251_vm2, %v3166_v43 }
0x17d4   :  { %5222 = vmatprep.subr.mxu1 %v5630_v6 }
0x17d6   :  { %5208 = vmatmul.mubr.msk.f32.vlgmr.msra.gmra.mxu1 %vm251_vm2, %v3164_v47 }
0x17d7   :  { %5223 = vmatpush3.xpose.msk.msra.mxu1 %vm251_vm2, %v6181_v45  ;;  %5226 = vmatprep.mubr.msk.f32.mxu1 %vm5631_vm1, %v5630_v6 }
0x17d8   :  { %5224 = vmatprep.subr.mxu1 %v5630_v6 }
0x17db   :  { %5225 = vmatpush3.xpose.msk.msra.mxu1 %vm251_vm2, %v6192_v50 }
0x17dc   :  { %5243 = vmatprep.subr.mxu1 %v5630_v6 }
0x17de   :  { %5227 = vmatmul.mubr.msk.f32.vlgmr.msra.gmra.mxu1 %vm251_vm2, %v6106_v2 }
0x17df   :  { %5247 = vmatprep.mubr.msk.f32.mxu1 %vm5631_vm1, %v5630_v6 }
0x1813   :  { %v6201_v51 = vpop.f32.mrf.mxu0 }
0x1815   :  { %v5183_v9 = vpop.f32.mrf.mxu0 }
0x1886   :  { %v6203_v53 = vpop.f32.mrf.mxu1 }
0x1887   :  { %v2911_v47 = vadd.f32 %v6201_v51, %v6203_v53 }
0x1888   :  { %v5178_v54 = vpop.f32.mrf.mxu1 }
0x188e   :  { %v2992_v55 = vpop.f32.mrf.mxu1 }
0x188f   :  { %v2996_v56 = vmul.f32 0.35355338, %v2992_v55 }
0x1890   :  { %v5190_v57 = vpop.f32.mrf.mxu1 }
0x1891   :  { %v2997_v58 = vsel %vm2500_vm3, %v2996_v56, -inf }
0x1892   :  { %2998 = vmax.xlane.f32.xlu0 %v2997_v58 }
0x1896   :  { %v3241_v59 = vpop.f32.mrf.mxu1 }
0x1897   :  { %v3245_v0 = vmul.f32 0.35355338, %v3241_v59 }
0x1898   :  { %v5209_v60 = vpop.f32.mrf.mxu1 }
0x1899   :  { %v3246_v1 = vsel %vm2500_vm3, %v3245_v0, -inf }
0x189e   :  { %v3491_v61 = vpop.f32.mrf.mxu1 }
0x189f   :  { %v3495_v3 = vmul.f32 0.35355338, %v3491_v61 }
0x18a0   :  { %v5228_v62 = vpop.f32.mrf.mxu1 }
0x18a1   :  { %v3496_v4 = vsel %vm2500_vm3, %v3495_v3, -inf }
0x18a8   :  { %3011 = vrot.lane.b32.xlu0 %v6087_v52, %s5637_s10 }
0x18c7   :  { %3247 = vmax.xlane.f32.xlu0 %v3246_v1 }
0x18dd   :  { %3260 = vrot.lane.b32.xlu0 %v6087_v52, %s5640_s30 }
0x18fc   :  { %3497 = vmax.xlane.f32.xlu0 %v3496_v4 }
0x1912   :  { %3509 = vrot.lane.b32.xlu0 %v6181_v45, %s5633_s2 }
0x1916   :  { %3591 = vrot.lane.b32.xlu0 %v6181_v45, %s5635_s23 }
0x191a   :  { %3587 = vrot.lane.b32.xlu0 %v6106_v2, %s5635_s23 }
0x191b   :  { %v2999_v7 = vpop.xlane.xlu0 %2998 }
0x191c   :  { %v3000_v8 = vsub.f32 %v2996_v56, %v2999_v7 }
0x191e   :  { %v3001_v10 = vmul.f32 1.442695, %v3000_v8 }
0x191f   :  { %v3012_v11 = vpop.permute.xlu0 %3011 }
0x1920   :  { %5396 = vpow2.f32 %v3001_v10  ;;  %5192 = vmatpush3.msk.msra.mxu0 %vm2520_vm4, %v3012_v11 }
0x1921   :  { %5193 = vmatprep.subr.mxu0 %v5630_v6 }
0x192d   :  { %v5397_v52 = vpop.eup %5396 }
0x192e   :  { %v3003_v12 = vsel %vm2500_vm3, %v5397_v52, 0.0 }
0x192f   :  { %3004 = vadd.xlane.f32.xlu1 %v3003_v12 }
0x1940   :  { %3009 = vrot.lane.b32.xlu1 %v6083_v49, %s5637_s10 }
0x1950   :  { %v3248_v13 = vpop.xlane.xlu0 %3247 }
0x1951   :  { %v3249_v14 = vsub.f32 %v3245_v0, %v3248_v13 }
0x1953   :  { %v3250_v44 = vmul.f32 1.442695, %v3249_v14 }
0x1954   :  { %v3261_v5 = vpop.permute.xlu0 %3260 }
0x1955   :  { %5398 = vpow2.f32 %v3250_v44 }
0x1962   :  { %v5399_v15 = vpop.eup %5398 }
0x1963   :  { %v3252_v16 = vsel %vm2500_vm3, %v5399_v15, 0.0 }
0x1964   :  { %3253 = vadd.xlane.f32.xlu1 %v3252_v16 }
0x1975   :  { %3258 = vrot.lane.b32.xlu1 %v6083_v49, %s5640_s30 }
0x1979   :  { %3507 = vrot.lane.b32.xlu1 %v6192_v50, %s5633_s2 }
0x1985   :  { %v3498_v17 = vpop.xlane.xlu0 %3497 }
0x1986   :  { %v3499_v18 = vsub.f32 %v3495_v3, %v3498_v17 }
0x1988   :  { %v3500_v19 = vmul.f32 1.442695, %v3499_v18 }
0x1989   :  { %v3510_v55 = vpop.permute.xlu0 %3509 }
0x198a   :  { %5400 = vpow2.f32 %v3500_v19 }
0x198d   :  { %v3592_v51 = vpop.permute.xlu0 %3591 }
0x1991   :  { %v3588_v60 = vpop.permute.xlu0 %3587 }
0x1997   :  { %v5401_v20 = vpop.eup %5400 }
0x1998   :  { %v3502_v22 = vsel %vm2500_vm3, %v5401_v20, 0.0 }
0x199d   :  { %3503 = vadd.xlane.f32.xlu1 %v3502_v22 }
0x19ae   :  { %3589 = vrot.lane.b32.xlu1 %v6192_v50, %s5635_s23 }
0x19b8   :  { %v3005_v24 = vpop.xlane.xlu1 %3004 }
0x19b9   :  { %5402 = vrcp.f32 %v3005_v24 }
0x19bc   :  { %v3010_v25 = vpop.permute.xlu1 %3009 }
0x19bd   :  { %5194 = vmatpush3.msra.mxu0 %v3010_v25 }
0x19be   :  { %5198 = vmatprep.subr.mxu0 %v5630_v6 }
0x19c6   :  { %v5403_v49 = vpop.eup %5402 }
0x19c7   :  { %v3007_v28 = vmul.f32 %v5403_v49, %v5397_v52 }
0x19c9   :  { %5196 = vmatmul.mubr.msk.f32.vlgmr.msra.gmra.mxu0 %vm2500_vm3, %v3007_v28  ;;  %v3008_v38 = vadd.f32 %v3007_v28, %v2687_v31 }
0x19ca   :  { %5199 = vmatpush3.msra.mxu0 %v6232_v29  ;;  %5200 = vmatprep.mubr.msk.f32.mxu0 %vm5631_vm1, %v5630_v6 }
0x19cb   :  { %5210 = vmatprep.subr.mxu0 %v5630_v6 }
0x19ed   :  { %v3254_v30 = vpop.xlane.xlu1 %3253 }
0x19ee   :  { %5404 = vrcp.f32 %v3254_v30 }
0x19f1   :  { %v3259_v42 = vpop.permute.xlu1 %3258 }
0x19f5   :  { %v3508_v33 = vpop.permute.xlu1 %3507 }
0x19fb   :  { %v5405_v36 = vpop.eup %5404 }
0x19fc   :  { %v3256_v37 = vmul.f32 %v5405_v36, %v5399_v15 }
0x19fe   :  { %v3257_v39 = vadd.f32 %v3256_v37, %v3008_v38 }
0x1a00   :  { %v3412_v40 = vmul.f32 0.25, %v3257_v39 }
0x1a02   :  { %3413 = vst.msk [vmem:[#allocation16] sm:$0xff] %vm2500_vm3, %v3412_v40 }
0x1a26   :  { %v3504_v43 = vpop.xlane.xlu1 %3503 }
0x1a27   :  { %5406 = vrcp.f32 %v3504_v43 }
0x1a2a   :  { %v3590_v53 = vpop.permute.xlu1 %3589 }
0x1a34   :  { %v5407_v56 = vpop.eup %5406 }
0x1a35   :  { %v6262_v59 = vmul.f32 %v5407_v56, %v5401_v20 }
0x1a89   :  { %v3085_v41 = vpop.f32.mrf.mxu0 }
0x1a8a   :  { %5201 = vmatmul.mubr.msk.f32.vlgmr.msra.gmra.mxu0 %vm251_vm2, %v3085_v41 }
0x1a8b   :  { %5211 = vmatpush3.msk.msra.mxu0 %vm2520_vm4, %v3261_v5  ;;  %v5197_v35 = vpop.f32.mrf.mxu0  ;;  %5214 = vmatprep.mubr.msk.f32.mxu0 %vm5631_vm1, %v5630_v6 }
0x1a8c   :  { %5212 = vmatprep.subr.mxu0 %v5630_v6 }
0x1a8d   :  { %5213 = vmatpush3.msra.mxu0 %v3259_v42  ;;  %v6339_v42 = vld [vmem:[%s6465_s11] ss:$0 sm:$0xff] }
0x1a8e   :  { %5215 = vmatmul.mubr.msk.f32.vlgmr.msra.gmra.mxu0 %vm2500_vm3, %v3256_v37  ;;  %5217 = vmatprep.subr.mxu0 %v5630_v6 }
0x1a8f   :  { %5219 = vmatprep.mubr.msk.f32.mxu0 %vm5631_vm1, %v5630_v6  ;;  %5218 = vmatpush3.msra.mxu0 %v6251_v26 }
0x1a90   :  { %5229 = vmatprep.subr.mxu0 %v5630_v6 }
0x1b4a   :  { %v3158_v48 = vpop.f32.mrf.mxu0 }
0x1b4b   :  { %v3162_v9 = vadd.f32 %v3158_v48, %v2911_v47 }
0x1b4c   :  { %v5202_v54 = vpop.f32.mrf.mxu0 }
0x1b4e   :  { %v3334_v57 = vpop.f32.mrf.mxu0 }
0x1b4f   :  { %5220 = vmatmul.mubr.msk.f32.vlgmr.msra.gmra.mxu0 %vm251_vm2, %v3334_v57 }
0x1b50   :  { %5230 = vmatpush3.msk.msra.mxu0 %vm2520_vm4, %v3510_v55  ;;  %v5216_v58 = vpop.f32.mrf.mxu0  ;;  %5233 = vmatprep.mubr.msk.f32.mxu0 %vm5631_vm1, %v5630_v6 }
0x1b51   :  { %5231 = vmatprep.subr.mxu0 %v5630_v6 }
0x1b52   :  { %5232 = vmatpush3.msra.mxu0 %v3508_v33 }
0x1b53   :  { %5236 = vmatprep.subr.mxu0 %v5630_v6  ;;  %5234 = vmatmul.mubr.msk.f32.vlgmr.msra.gmra.mxu0 %vm2500_vm3, %v6262_v59 }
0x1b54   :  { %5237 = vmatpush3.xpose.msk.msra.mxu0 %vm251_vm2, %v3592_v51  ;;  %5240 = vmatprep.mubr.msk.f32.mxu0 %vm5631_vm1, %v5630_v6 }
0x1b55   :  { %5238 = vmatprep.subr.mxu0 %v5630_v6 }
0x1b58   :  { %5239 = vmatpush3.xpose.msk.msra.mxu0 %vm251_vm2, %v3590_v53 }
0x1b59   :  { %5255 = vmatprep.subr.mxu0 %v5630_v6 }
0x1b5b   :  { %5241 = vmatmul.mubr.msk.f32.vlgmr.msra.gmra.mxu0 %vm251_vm2, %v3588_v60 }
0x1b5c   :  { %5256 = vmatpush3.msra.mxu0 %v6155_v34  ;;  %5257 = vmatprep.mubr.msk.f32.mxu0 %vm5631_vm1, %v5630_v6 }
0x1b5d   :  { %5267 = vmatprep.subr.mxu0 %v5630_v6 }
0x1c0f   :  { %v3407_v61 = vpop.f32.mrf.mxu0 }
0x1c10   :  { %v6278_v62 = vadd.f32 %v3407_v61, %v3162_v9 }
0x1c11   :  { %v5221_v0 = vpop.f32.mrf.mxu0 }
0x1c12   :  { %v4416_v33 = vadd.f32 %v6339_v42, %v6278_v62 }
0x1c13   :  { %v3583_v1 = vpop.f32.mrf.mxu0 }
0x1c14   :  { %5258 = vmatmul.mubr.msk.f32.vlgmr.msra.gmra.mxu0 %vm251_vm2, %v3583_v1  ;;  %v6344_v43 = vadd.f32 %v4416_v33, %v6049_v32  ;;  %v4461_v33 = vld [vmem:[#allocation11 + $0x18] sm:$0xff] }
0x1c15   :  { %v5235_v3 = vpop.f32.mrf.mxu0  ;;  %5271 = vmatprep.mubr.msk.f32.mxu0 %vm5631_vm1, %v5630_v6 }
0x1c16   :  { %v4420_v47 = vsel %vm162_vm0, %v6344_v43, 0.0 }
0x1c1b   :  { %v3665_v4 = vpop.f32.mrf.mxu0 }
0x1c1c   :  { %v3669_v7 = vmul.f32 0.35355338, %v3665_v4 }
0x1c1d   :  { %v5242_v8 = vpop.f32.mrf.mxu0 }
0x1c1e   :  { %v3670_v34 = vsel %vm2500_vm3, %v3669_v7, -inf }
0x1c1f   :  { %3671 = vmax.xlane.f32.xlu1 %v3670_v34 }
0x1c30   :  { %3682 = vrot.lane.b32.xlu1 %v6192_v50, %s5634_s5 }
0x1c34   :  { %3912 = vrot.lane.b32.xlu1 %v6181_v45, %s5638_s27 }
0x1c38   :  { %3908 = vrot.lane.b32.xlu1 %v6106_v2, %s5638_s27 }
0x1c3c   :  { %4159 = vrot.lane.b32.xlu1 %v6192_v50, %s5641_s0 }
0x1ca8   :  { %v3672_v10 = vpop.xlane.xlu1 %3671 }
0x1ca9   :  { %v3673_v11 = vsub.f32 %v3669_v7, %v3672_v10 }
0x1cab   :  { %v3674_v52 = vmul.f32 1.442695, %v3673_v11 }
0x1cac   :  { %v3683_v5 = vpop.permute.xlu1 %3682 }
0x1cad   :  { %5408 = vpow2.f32 %v3674_v52 }
0x1cb0   :  { %v3913_v19 = vpop.permute.xlu1 %3912 }
0x1cba   :  { %v5409_v12 = vpop.eup %5408 }
0x1cbb   :  { %v3676_v13 = vsel %vm2500_vm3, %v5409_v12, 0.0 }
0x1cbc   :  { %3677 = vadd.xlane.f32.xlu0 %v3676_v13 }
0x1cd2   :  { %3684 = vrot.lane.b32.xlu0 %v6181_v45, %s5634_s5 }
0x1cd4   :  { %v6295_v14 = vpop.f32.mrf.mxu0 }
0x1cd6   :  { %3910 = vrot.lane.b32.xlu0 %v6192_v50, %s5638_s27  ;;  %v5259_v44 = vpop.f32.mrf.mxu0 }
0x1cda   :  { %4161 = vrot.lane.b32.xlu0 %v6181_v45, %s5641_s0 }
0x1cde   :  { %4157 = vrot.lane.b32.xlu0 %v6106_v2, %s5641_s0 }
0x1d45   :  { %v3678_v15 = vpop.xlane.xlu0 %3677 }
0x1d46   :  { %5410 = vrcp.f32 %v3678_v15 }
0x1d49   :  { %v3685_v16 = vpop.permute.xlu0 %3684 }
0x1d4a   :  { %5244 = vmatpush3.msk.msra.mxu1 %vm2520_vm4, %v3685_v16 }
0x1d4b   :  { %5245 = vmatprep.subr.mxu1 %v5630_v6 }
0x1d4c   :  { %5246 = vmatpush3.msra.mxu1 %v3683_v5 }
0x1d4d   :  { %5250 = vmatprep.subr.mxu1 %v5630_v6  ;;  %v3911_v22 = vpop.permute.xlu0 %3910 }
0x1d51   :  { %v4162_v24 = vpop.permute.xlu0 %4161 }
0x1d53   :  { %v5411_v17 = vpop.eup %5410 }
0x1d54   :  { %v6306_v18 = vmul.f32 %v5411_v17, %v5409_v12 }
0x1d55   :  { %v4158_v49 = vpop.permute.xlu0 %4157 }
0x1d56   :  { %5248 = vmatmul.mubr.msk.f32.vlgmr.msra.gmra.mxu1 %vm2500_vm3, %v6306_v18  ;;  %v3681_v1 = vadd.f32 %v6306_v18, %v6262_v59 }
0x1d57   :  { %5251 = vmatpush3.msra.mxu1 %v6146_v27  ;;  %5252 = vmatprep.mubr.msk.f32.mxu1 %vm5631_vm1, %v5630_v6  ;;  %v3909_v27 = vpop.permute.xlu1 %3908 }
0x1d58   :  { %5260 = vmatprep.subr.mxu1 %v5630_v6 }
0x1d5b   :  { %v4160_v25 = vpop.permute.xlu1 %4159 }
0x1e16   :  { %v3758_v2 = vpop.f32.mrf.mxu1 }
0x1e17   :  { %5253 = vmatmul.mubr.msk.f32.vlgmr.msra.gmra.mxu1 %vm251_vm2, %v3758_v2 }
0x1e18   :  { %5261 = vmatpush3.xpose.msk.msra.mxu1 %vm251_vm2, %v3913_v19  ;;  %v5249_v20 = vpop.f32.mrf.mxu1  ;;  %5264 = vmatprep.mubr.msk.f32.mxu1 %vm5631_vm1, %v5630_v6 }
0x1e19   :  { %5262 = vmatprep.subr.mxu1 %v5630_v6 }
0x1e1c   :  { %5263 = vmatpush3.xpose.msk.msra.mxu1 %vm251_vm2, %v3911_v22 }
0x1e1d   :  { %5279 = vmatprep.subr.mxu1 %v5630_v6 }
0x1e1f   :  { %5265 = vmatmul.mubr.msk.f32.vlgmr.msra.gmra.mxu1 %vm251_vm2, %v3909_v27 }
0x1e20   :  { %5280 = vmatpush3.xpose.msk.msra.mxu1 %vm251_vm2, %v4162_v24  ;;  %5283 = vmatprep.mubr.msk.f32.mxu1 %vm5631_vm1, %v5630_v6 }
0x1e21   :  { %5281 = vmatprep.subr.mxu1 %v5630_v6 }
0x1e24   :  { %5282 = vmatpush3.xpose.msk.msra.mxu1 %vm251_vm2, %v4160_v25 }
0x1e25   :  { %5298 = vmatprep.subr.mxu1 %v4461_v33 }
0x1e27   :  { %5284 = vmatmul.mubr.msk.f32.vlgmr.msra.gmra.mxu1 %vm251_vm2, %v4158_v49 }
0x1e28   :  { %5299 = vmatpush3.msra.mxu1 %v4461_v33 }
0x1ed7   :  { %v6328_v28 = vpop.f32.mrf.mxu1 }
0x1ed8   :  { %v3905_v59 = vadd.f32 %v6295_v14, %v6328_v28 }
0x1ed9   :  { %v5254_v30 = vpop.f32.mrf.mxu1 }
0x1edf   :  { %v3986_v31 = vpop.f32.mrf.mxu1 }
0x1ee0   :  { %v3990_v36 = vmul.f32 0.35355338, %v3986_v31 }
0x1ee1   :  { %v5266_v37 = vpop.f32.mrf.mxu1 }
0x1ee2   :  { %v3991_v38 = vsel %vm2500_vm3, %v3990_v36, -inf }
0x1ee3   :  { %3992 = vmax.xlane.f32.xlu1 %v3991_v38 }
0x1ee7   :  { %v4235_v39 = vpop.f32.mrf.mxu1 }
0x1ee8   :  { %v4239_v41 = vmul.f32 0.35355338, %v4235_v39 }
0x1ee9   :  { %v5285_v40 = vpop.f32.mrf.mxu1 }
0x1eea   :  { %v4240_v35 = vsel %vm2500_vm3, %v4239_v41, -inf }
0x1ef4   :  { %4003 = vrot.lane.b32.xlu1 %v6192_v50, %s5637_s10 }
0x1f18   :  { %4241 = vmax.xlane.f32.xlu1 %v4240_v35 }
0x1f29   :  { %4252 = vrot.lane.b32.xlu1 %v6192_v50, %s5640_s30 }
0x1f4d   :  { %4421 = vadd.xlane.f32.xlu1 %v4420_v47  ;;  %v4459_v47 = vld [vmem:[#allocation11 + $0x8] sm:$0xff] }
0x1f6c   :  { %v3993_v48 = vpop.xlane.xlu1 %3992 }
0x1f6d   :  { %v3994_v9 = vsub.f32 %v3990_v36, %v3993_v48  ;;  %v4458_v48 = vld [vmem:[#allocation11] sm:$0xff] }
0x1f6f   :  { %v3995_v54 = vmul.f32 1.442695, %v3994_v9  ;;  %v4557_v9 = vld [vmem:[%s6468_s14 + $0x28] sm:$0xff] }
0x1f70   :  { %v4004_v56 = vpop.permute.xlu1 %4003 }
0x1f71   :  { %5412 = vpow2.f32 %v3995_v54  ;;  %v4556_v54 = vld [vmem:[%s6468_s14 + $0x20] sm:$0xff] }
0x1f7e   :  { %v5413_v50 = vpop.eup %5412 }
0x1f7f   :  { %v3997_v55 = vsel %vm2500_vm3, %v5413_v50, 0.0 }
0x1f80   :  { %3998 = vadd.xlane.f32.xlu0 %v3997_v55 }
0x1f96   :  { %4005 = vrot.lane.b32.xlu0 %v6181_v45, %s5637_s10 }
0x1fa1   :  { %v4242_v57 = vpop.xlane.xlu1 %4241 }
0x1fa2   :  { %v4243_v58 = vsub.f32 %v4239_v41, %v4242_v57 }
0x1fa4   :  { %v4244_v32 = vmul.f32 1.442695, %v4243_v58 }
0x1fa5   :  { %v4253_v52 = vpop.permute.xlu1 %4252 }
0x1fa6   :  { %5414 = vpow2.f32 %v4244_v32 }
0x1fb3   :  { %v5415_v51 = vpop.eup %5414 }
0x1fb4   :  { %v4246_v53 = vsel %vm2500_vm3, %v5415_v51, 0.0 }
0x1fb5   :  { %4247 = vadd.xlane.f32.xlu0 %v4246_v53  ;;  %v4555_v53 = vld [vmem:[%s6468_s14 + $0x18] sm:$0xff] }
0x1fcb   :  { %4254 = vrot.lane.b32.xlu0 %v6181_v45, %s5640_s30 }
0x1fd6   :  { %v4422_v5 = vpop.xlane.xlu1 %4421 }
0x1fd7   :  { %v4426_v17 = vmul.f32 0.03125, %v4422_v5 }
0x2009   :  { %v3999_v60 = vpop.xlane.xlu0 %3998 }
0x200a   :  { %5416 = vrcp.f32 %v3999_v60  ;;  %v4554_v60 = vld [vmem:[%s6468_s14 + $0x10] sm:$0xff] }
0x200d   :  { %v4006_v61 = vpop.permute.xlu0 %4005 }
0x200e   :  { %5268 = vmatpush3.msk.msra.mxu0 %vm2520_vm4, %v4006_v61  ;;  %v4553_v61 = vld [vmem:[%s6468_s14 + $0x8] sm:$0xff] }
0x200f   :  { %5269 = vmatprep.subr.mxu0 %v5630_v6 }
0x2010   :  { %5270 = vmatpush3.msra.mxu0 %v4004_v56 }
0x2011   :  { %5274 = vmatprep.subr.mxu0 %v5630_v6 }
0x2017   :  { %v5417_v62 = vpop.eup %5416 }
0x2018   :  { %v4001_v0 = vmul.f32 %v5417_v62, %v5413_v50  ;;  %v4552_v62 = vld [vmem:[%s6468_s14] sm:$0xff] }
0x201a   :  { %5272 = vmatmul.mubr.msk.f32.vlgmr.msra.gmra.mxu0 %vm2500_vm3, %v4001_v0  ;;  %v4002_v7 = vadd.f32 %v4001_v0, %v3681_v1  ;;  %v4834_v0 = vld [vmem:[%s6467_s13] ss:$0 sm:$0xff]  ;;  %s5643_s13 = smov [#allocation14]  }
0x201b   :  { %5275 = vmatpush3.msra.mxu0 %v6232_v29  ;;  %5276 = vmatprep.mubr.msk.f32.mxu0 %vm5631_vm1, %v5630_v6 }
0x201c   :  { %5286 = vmatprep.subr.mxu0 %v5630_v6 }
0x203e   :  { %v4248_v45 = vpop.xlane.xlu0 %4247 }
0x203f   :  { %5418 = vrcp.f32 %v4248_v45 }
0x2042   :  { %v4255_v11 = vpop.permute.xlu0 %4254 }
0x204c   :  { %v5419_v3 = vpop.eup %5418 }
0x204d   :  { %v4250_v4 = vmul.f32 %v5419_v3, %v5415_v51 }
0x204f   :  { %v4251_v8 = vadd.f32 %v4250_v4, %v4002_v7 }
0x2051   :  { %v4406_v34 = vmul.f32 0.25, %v4251_v8 }
0x2053   :  { %4408 = vst.msk [vmem:[#allocation16 + $0x8] sm:$0xff] %vm2500_vm3, %v4406_v34  ;;  %v4837_v34 = vld [vmem:[%s6469_s15] ss:$0 sm:$0xff] }
0x20da   :  { %v4079_v10 = vpop.f32.mrf.mxu0 }
0x20db   :  { %5277 = vmatmul.mubr.msk.f32.vlgmr.msra.gmra.mxu0 %vm251_vm2, %v4079_v10 }
0x20dc   :  { %5287 = vmatpush3.msk.msra.mxu0 %vm2520_vm4, %v4255_v11  ;;  %v5273_v29 = vpop.f32.mrf.mxu0  ;;  %5290 = vmatprep.mubr.msk.f32.mxu0 %vm5631_vm1, %v5630_v6 }
0x20dd   :  { %5288 = vmatprep.subr.mxu0 %v5630_v6 }
0x20de   :  { %5289 = vmatpush3.msra.mxu0 %v4253_v52 }
0x20df   :  { %5291 = vmatmul.mubr.msk.f32.vlgmr.msra.gmra.mxu0 %vm2500_vm3, %v4250_v4  ;;  %5293 = vmatprep.subr.mxu0 %v5630_v6 }
0x20e0   :  { %5294 = vmatpush3.msra.mxu0 %v6251_v26  ;;  %5295 = vmatprep.mubr.msk.f32.mxu0 %vm5631_vm1, %v5630_v6  ;;  %v4428_v26 = vsub.f32 %v6344_v43, %v4426_v17  ;;  %v4460_v43 = vld [vmem:[#allocation11 + $0x10] sm:$0xff] }
0x20e1   :  { %5300 = vmatprep.subr.mxu1 %v4460_v43 }
0x20e2   :  { %v4430_v22 = vmul.f32 %v4428_v26, %v4428_v26  ;;  %5301 = vmatpush3.msra.mxu1 %v4460_v43 }
0x20e3   :  { %5302 = vmatprep.subr.mxu1 %v4459_v47 }
0x20e4   :  { %v4432_v27 = vsel %vm162_vm0, %v4430_v22, 0.0  ;;  %5303 = vmatpush3.msra.mxu1 %v4459_v47 }
0x20e5   :  { %5304 = vmatprep.subr.mxu1 %v4458_v48 }
0x20e6   :  { %5305 = vmatpush3.msra.mxu1 %v4458_v48 }
0x219b   :  { %v4152_v12 = vpop.f32.mrf.mxu0 }
0x219c   :  { %v4156_v13 = vadd.f32 %v4152_v12, %v3905_v59 }
0x219d   :  { %v5278_v44 = vpop.f32.mrf.mxu0 }
0x219f   :  { %v4328_v15 = vpop.f32.mrf.mxu0 }
0x21a0   :  { %5296 = vmatmul.mubr.msk.f32.vlgmr.msra.gmra.mxu0 %vm251_vm2, %v4328_v15 }
0x21a1   :  { %v5292_v16 = vpop.f32.mrf.mxu0 }
0x2260   :  { %v4401_v18 = vpop.f32.mrf.mxu0 }
0x2261   :  { %v4405_v2 = vadd.f32 %v4401_v18, %v4156_v13 }
0x2262   :  { %v5297_v19 = vpop.f32.mrf.mxu0 }
0x2263   :  { %v4417_v20 = vadd.f32 %v6339_v42, %v4405_v2 }
0x2265   :  { %v4419_v6 = vadd.f32 %v4417_v20, %v6074_v46  ;;  %v4448_v46 = vsub.s32 1, %v6031_v21 }
0x2267   :  { %v4423_v14 = vsel %vm162_vm0, %v4419_v6, 0.0  ;;  %v4449_v38 = vrot.slane %v6037_v23, %v4448_v46  ;;  %v4455_v41 = vrot.slane %v6042_v63, %v4448_v46  ;;  %v4559_v23 = vld [vmem:[%s6468_s14 + $0x38] sm:$0xff]  ;;  %v4558_v63 = vld [vmem:[%s6468_s14 + $0x30] sm:$0xff]  ;;  %s4708_s14 = sshll.u32 %s5643_s13, 4  ;;  %s4709_s14 = int_to_ptr.vmem [resolvable:$true] %s4708_s14 }
0x2268   :  { %4424 = vadd.xlane.f32.xlu0 %v4423_v14  ;;  %5309 = vmatprep.subr.mxu0 %v4559_v23  ;;  %s5550_s15 = scalar_lea.vmem %s4709_s14, 256  ;;  %p5555_p3 = scmp.lt.s32.totalorder %s4709_s14, %s4709_s14 }
0x2269   :  { %5310 = vmatpush3.msra.mxu0 %v4559_v23  ;;  %p5551_p2 = scmp.ne.s32.totalorder %s4709_s14, %s5550_s15  ;;  %p5556_p4 = scmp.lt.s32.totalorder %s5550_s15, %s5550_s15 }
0x226a   :  { %5311 = vmatprep.subr.mxu0 %v4558_v63 }
0x226b   :  { %5312 = vmatpush3.msra.mxu0 %v4558_v63  ;;  %p5557_p5 = por %p5556_p4, %p5555_p3 }
0x226c   :  { %4433 = vadd.xlane.f32.xlu0 %v4432_v27  ;;  %5313 = vmatprep.subr.mxu0 %v4557_v9 }
0x226d   :  { %5314 = vmatpush3.msra.mxu0 %v4557_v9  ;;  %p5558_p6 = pnand %p5557_p5, %p5551_p2 }
0x226e   :  { %5315 = vmatprep.subr.mxu0 %v4556_v54 }
0x226f   :  { %5316 = vmatpush3.msra.mxu0 %v4556_v54 }
0x2270   :  { %5317 = vmatprep.subr.mxu0 %v4555_v53 }
0x2271   :  { %5318 = vmatpush3.msra.mxu0 %v4555_v53 }
0x2272   :  { %5319 = vmatprep.subr.mxu0 %v4554_v60 }
0x2273   :  { %5320 = vmatpush3.msra.mxu0 %v4554_v60 }
0x2274   :  { %5321 = vmatprep.subr.mxu0 %v4553_v61 }
0x2275   :  { %5322 = vmatpush3.msra.mxu0 %v4553_v61 }
0x2276   :  { %5323 = vmatprep.subr.mxu0 %v4552_v62 }
0x2277   :  { %5324 = vmatpush3.msra.mxu0 %v4552_v62 }
0x22f1   :  { %v4425_v24 = vpop.xlane.xlu0 %4424 }
0x22f2   :  { %v4427_v25 = vmul.f32 0.03125, %v4425_v24 }
0x22f4   :  { %v4429_v49 = vsub.f32 %v4419_v6, %v4427_v25 }
0x22f5   :  { %v4434_v28 = vpop.xlane.xlu0 %4433 }
0x22f6   :  { %v4438_v30 = vmul.f32 0.03125, %v4434_v28  ;;  %v4431_v31 = vmul.f32 %v4429_v49, %v4429_v49 }
0x22f8   :  { %v4440_v36 = vadd.f32 1e-05, %v4438_v30  ;;  %v4435_v37 = vsel %vm162_vm0, %v4431_v31, 0.0 }
0x22f9   :  { %4436 = vadd.xlane.f32.xlu1 %v4435_v37 }
0x22fa   :  { %5420 = vrsqrt.f32 %v4440_v36 }
0x2307   :  { %v5421_v39 = vpop.eup %5420 }
0x2308   :  { %v4444_v40 = vmul.f32 %v5421_v39, %v4428_v26 }
0x230a   :  { %v4450_v35 = vmul.f32 %v4449_v38, %v4444_v40 }
0x230c   :  { %v6387_v42 = vadd.f32 %v4455_v41, %v4450_v35 }
0x230e   :  { %5306 = vmatprep.mubr.msk.f32.mxu1 %vm162_vm0, %v6387_v42 }
0x2382   :  { %v4437_v50 = vpop.xlane.xlu1 %4436 }
0x2383   :  { %v4439_v55 = vmul.f32 0.03125, %v4437_v50 }
0x2385   :  { %v4441_v56 = vadd.f32 1e-05, %v4439_v55 }
0x2387   :  { %5422 = vrsqrt.f32 %v4441_v56 }
0x2394   :  { %v5423_v57 = vpop.eup %5422 }
0x2395   :  { %v4445_v58 = vmul.f32 %v5423_v57, %v4429_v49 }
0x2397   :  { %v4451_v32 = vmul.f32 %v4449_v38, %v4445_v58 }
0x2399   :  { %v4457_v51 = vadd.f32 %v4455_v41, %v4451_v32 }
0x239b   :  { %5307 = vmatmul.mubr.msk.f32.vlgmr.msra.gmra.mxu1 %vm162_vm0, %v4457_v51 }
0x245b   :  { %v5308_v45 = vpop.f32.mrf.mxu1 }
0x245c   :  { %v4547_v1 = vadd.f32 %v5308_v45, %v4834_v0 }
0x245d   :  { %v4541_v3 = vpop.f32.mrf.mxu1 }
0x245e   :  { %v4542_v4 = vadd.f32 %v4834_v0, %v4541_v3  ;;  %v4551_v8 = vmax.f32 %v4547_v1, 0.0 }
0x2460   :  { %v4550_v7 = vmax.f32 %v4542_v4, 0.0 }
0x2462   :  { %5325 = vmatprep.mubr.msk.f32.mxu0 %vm4567_vm5, %v4550_v7 }
0x2463   :  { %5326 = vmatmul.mubr.msk.f32.vlgmr.msra.gmra.mxu0 %vm4567_vm5, %v4551_v8 }
0x2523   :  { %v5327_v10 = vpop.f32.mrf.mxu0 }
0x2524   :  { %v4646_v11 = vadd.f32 %v5327_v10, %v4837_v34 }
0x2525   :  { %v4640_v29 = vpop.f32.mrf.mxu0 }
0x2526   :  { %v4641_v52 = vadd.f32 %v4837_v34, %v4640_v29  ;;  %v4650_v59 = vadd.f32 %v4646_v11, %v4457_v51 }
0x2528   :  { %v4649_v12 = vadd.f32 %v4641_v52, %v6387_v42  ;;  %v4654_v13 = vsel %vm162_vm0, %v4650_v59, 0.0 }
0x2529   :  { %4655 = vadd.xlane.f32.xlu1 %v4654_v13 }
0x252a   :  { %v4651_v44 = vsel %vm162_vm0, %v4649_v12, 0.0 }
0x252b   :  { %4652 = vadd.xlane.f32.xlu0 %v4651_v44 }
0x25b2   :  { %v4656_v15 = vpop.xlane.xlu1 %4655 }
0x25b3   :  { %v4658_v16 = vmul.f32 0.03125, %v4656_v15 }
0x25b4   :  { %v4653_v5 = vpop.xlane.xlu0 %4652 }
0x25b5   :  { %v4660_v17 = vsub.f32 %v4650_v59, %v4658_v16  ;;  %v4657_v18 = vmul.f32 0.03125, %v4653_v5 }
0x25b7   :  { %v4659_v2 = vsub.f32 %v4649_v12, %v4657_v18  ;;  %v4662_v19 = vmul.f32 %v4660_v17, %v4660_v17 }
0x25b9   :  { %v4666_v26 = vsel %vm162_vm0, %v4662_v19, 0.0  ;;  %v4661_v20 = vmul.f32 %v4659_v2, %v4659_v2 }
0x25ba   :  { %4667 = vadd.xlane.f32.xlu1 %v4666_v26 }
0x25bb   :  { %v4663_v6 = vsel %vm162_vm0, %v4661_v20, 0.0 }
0x25bc   :  { %4664 = vadd.xlane.f32.xlu0 %v4663_v6 }
0x25bd   :  { %5561 = shalt.err (!%p5558_p6)
}
0x25be   :  { %4714 = dma.vmem_to_hbm [thread:$0]  %s4709_s14, 256, %s6473_s19, [#allocation15], %s5624_s25, %s5624_s25, %s5625_s3  }
0x25bf   :  { %s5644_s5 = smov [#allocation16]  }
0x25c0   :  { %s4720_s23 = sshll.u32 %s5644_s5, 4  ;;  %s4721_s23 = int_to_ptr.vmem [resolvable:$true] %s4720_s23 }
0x25c1   :  { %s5570_s10 = scalar_lea.vmem %s4721_s23, 256  ;;  %p5575_p8 = scmp.lt.s32.totalorder %s4721_s23, %s4721_s23 }
0x25c2   :  { %p5571_p7 = scmp.ne.s32.totalorder %s4721_s23, %s5570_s10  ;;  %p5576_p9 = scmp.lt.s32.totalorder %s5570_s10, %s5570_s10 }
0x25c4   :  { %p5577_p10 = por %p5576_p9, %p5575_p8 }
0x25c6   :  { %p5578_p11 = pnand %p5577_p10, %p5571_p7 }
0x25c8   :  { %5581 = shalt.err (!%p5578_p11)
}
0x25c9   :  { %4726 = dma.vmem_to_hbm [thread:$0]  %s4721_s23, 256, %s6474_s20, [#allocation15], %s5624_s25, %s5624_s25, %s5625_s3   ;;  %v4679_v28 = vsub.s32 2, %v6031_v21 }
0x25ca   :  { %v5428_v30 = vld [vmem:[%s6470_s16] sm:$0x7]  ;;  %s5645_s20 = smov [#allocation13]  }
0x25cb   :  { %v4680_v31 = vrot.slane %v5428_v30, %v4679_v28  ;;  %v5429_v46 = vld [vmem:[%s6471_s17] sm:$0x7]  ;;  %s4696_s22 = sshll.u32 %s5645_s20, 4  ;;  %s4697_s22 = int_to_ptr.vmem [resolvable:$true] %s4696_s22 }
0x25cc   :  { %v4686_v38 = vrot.slane %v5429_v46, %v4679_v28  ;;  %s5590_s16 = scalar_lea.vmem %s4697_s22, 256  ;;  %p5595_p13 = scmp.lt.s32.totalorder %s4697_s22, %s4697_s22 }
0x25cd   :  { %p5591_p12 = scmp.ne.s32.totalorder %s4697_s22, %s5590_s16  ;;  %p5596_p0 = scmp.lt.s32.totalorder %s5590_s16, %s5590_s16 }
0x25cf   :  { %p5597_p1 = por %p5596_p0, %p5595_p13 }
0x25d1   :  { %p5598_p2 = pnand %p5597_p1, %p5591_p12 }
0x2643   :  { %v4668_v14 = vpop.xlane.xlu1 %4667 }
0x2644   :  { %v4670_v22 = vmul.f32 0.03125, %v4668_v14 }
0x2645   :  { %v4665_v27 = vpop.xlane.xlu0 %4664 }
0x2646   :  { %v4672_v24 = vadd.f32 1e-05, %v4670_v22  ;;  %v4669_v25 = vmul.f32 0.03125, %v4665_v27 }
0x2648   :  { %5424 = vrsqrt.f32 %v4672_v24  ;;  %v4671_v49 = vadd.f32 1e-05, %v4669_v25 }
0x264a   :  { %5426 = vrsqrt.f32 %v4671_v49 }
0x2655   :  { %v5425_v36 = vpop.eup %5424 }
0x2656   :  { %v4676_v37 = vmul.f32 %v5425_v36, %v4660_v17 }
0x2657   :  { %v5427_v39 = vpop.eup %5426 }
0x2658   :  { %v4675_v40 = vmul.f32 %v5427_v39, %v4659_v2  ;;  %v4682_v41 = vmul.f32 %v4680_v31, %v4676_v37 }
0x265a   :  { %v4681_v35 = vmul.f32 %v4680_v31, %v4675_v40  ;;  %v4688_v42 = vadd.f32 %v4686_v38, %v4682_v41 }
0x265c   :  { %v4687_v21 = vadd.f32 %v4686_v38, %v4681_v35  ;;  %4690 = vst.msk [vmem:[#allocation13 + $0x8] sm:$0xff] %vm162_vm0, %v4688_v42 }
0x265e   :  { %4689 = vst.msk [vmem:[#allocation13] sm:$0xff] %vm162_vm0, %v4687_v21 }
0x265f   :  { %5601 = shalt.err (!%p5598_p2)
}
0x2660   :  { %4702 = dma.vmem_to_hbm [thread:$0]  %s4697_s22, 256, %s6472_s18, [#allocation4], %s5624_s25, %s5624_s25, %s5625_s3  }
0x2661   :  { %5618 = dma.done.wait [#allocation4], 256  }
0x2662   :  { %5619 = vsyncadd [#allocation4], 4294967040 }
0x2663   :  { %5620 = dma.done.wait [#allocation15], 512  }
0x2664   :  { %5621 = vsyncadd [#allocation15], 4294966784 }
0x2665   :  { %4736 = vsyncpa [#allocation3], 1 }
0x2666   :  { %4737 = vsyncpa [#allocation6], 1 }
0x2667   :  { %4738 = vsyncpa [#allocation9], 1 }
0x2668   :  { %4739 = vsyncpa [#allocation12], 1 }
0x2669   :  { %4740 = vsyncpa [#allocation4], 1 }
0x266a   :  { %4741 = vsyncpa [#allocation15], 1 }

</bundles_post_ra>
